<compile_context>
chip_gen: v6e
topology: v6e:2x2x1
jax: 0.10.0
libtpu: 0.0.40
codegen_flags: <defaults>
</compile_context>

<pallas_src>
import functools

import jax
import jax.numpy as jnp
from jax import lax
from jax.experimental import pallas as pl
from jax.experimental.pallas import tpu as pltpu

KSIZE = 7
PAD = 3
NTAPS = KSIZE * KSIZE


def _cbam_kernel(x_ref, w1_ref, w2t_ref, xmask_ref, ws_ref, o_ref, *, W):
    # x_ref block: (bb, C, HW) lane-dense
    # w1: (Cr, C), w2t: (Cr, C), xmask: (KSIZE, HW) f32, ws (SMEM 1-D): (2*49,)
    x3 = x_ref[...].astype(jnp.float32)                       # (bb, C, HW)
    bb, C, HW = x3.shape

    # ---------------- Channel attention ----------------
    avg_c = jnp.sum(x3, axis=-1) * (1.0 / float(HW))          # (bb, C)  lane reduce
    max_c = jnp.max(x3, axis=-1)                              # (bb, C)

    w1 = w1_ref[...].astype(jnp.float32)                      # (Cr, C)
    w2t = w2t_ref[...].astype(jnp.float32)                    # (Cr, C)

    # Tiny MLP on the VPU (broadcast-mul + reduce).
    h_avg = jnp.maximum(
        jnp.sum(avg_c[:, None, :] * w1[None, :, :], axis=-1), 0.0)   # (bb, Cr)
    h_max = jnp.maximum(
        jnp.sum(max_c[:, None, :] * w1[None, :, :], axis=-1), 0.0)   # (bb, Cr)
    hs = h_avg + h_max                                               # (bb, Cr)
    ca = jax.nn.sigmoid(
        jnp.sum(hs[:, :, None] * w2t[None, :, :], axis=1))           # (bb, C)

    xc = x3 * ca[:, :, None]                                  # (bb, C, HW)

    # ---------------- Spatial attention ----------------
    avg_s = jnp.sum(xc, axis=1) * (1.0 / float(C))            # (bb, HW) sublane reduce
    max_s = jnp.max(xc, axis=1)                               # (bb, HW)

    # 7x7 "same" conv on the flattened maps: pad along lanes, 49 static lane
    # shifts; per-kx column masks handle horizontal row wrap; vertical
    # over/underflow falls into the zero pad.
    PADF = PAD * W + PAD
    zpad = jnp.zeros((bb, PADF), jnp.float32)
    pa = jnp.concatenate([zpad, avg_s, zpad], axis=-1)        # (bb, HW + 2*PADF)
    pm = jnp.concatenate([zpad, max_s, zpad], axis=-1)

    xmask = xmask_ref[...].astype(jnp.float32)                # (KSIZE, HW)

    acc = jnp.zeros((bb, HW), jnp.float32)
    for kx in range(KSIZE):
        dx = kx - PAD
        col = jnp.zeros((bb, HW), jnp.float32)
        for ky in range(KSIZE):
            dy = ky - PAD
            t = ky * KSIZE + kx
            start = PADF + dy * W + dx                        # static, >= 0
            col = col + (ws_ref[t] * pa[:, start:start + HW]
                         + ws_ref[NTAPS + t] * pm[:, start:start + HW])
        # Column-validity mask depends only on kx -> apply once per kx
        # (7 masked adds instead of 49).
        acc = acc + xmask[kx:kx + 1, :] * col

    sa = jax.nn.sigmoid(acc)[:, None, :]                      # (bb, 1, HW)
    o_ref[...] = (xc * sa).astype(o_ref.dtype)                # lane-dense store


def _choose_bb(B, C, HW, itemsize, vmem_budget=48 * 1024 * 1024):
    """Images per grid step: fill VMEM (double-buffered in+out blocks within a
    v7x-safe budget) but keep >= 2 grid steps so both v7x cores get work."""
    per_img = C * HW * itemsize
    bb = max(1, min(B, int(vmem_budget // (4 * per_img))))
    while bb > 1 and B // bb < 2:
        bb -= 1
    while B % bb != 0:
        bb -= 1
    return bb


@functools.partial(jax.jit, static_argnames=("bb",))
def cbam_pallas(x, w1, w2t, ws_flat, bb=None):
    B, C, H, W = x.shape
    HW = H * W
    Cr = w1.shape[0]
    if bb is None:
        bb = _choose_bb(B, C, HW, x.dtype.itemsize)

    xf = x.reshape(B, C, HW)

    # Column-validity masks for the 7 horizontal kernel offsets, tiled over rows.
    cols = jnp.arange(W, dtype=jnp.int32)[None, :]                    # (1, W)
    dxs = jnp.arange(KSIZE, dtype=jnp.int32)[:, None] - PAD           # (7, 1)
    valid = ((cols + dxs >= 0) & (cols + dxs < W)).astype(jnp.float32)
    xmask = jnp.tile(valid, (1, H))                                   # (7, HW)

    block_bytes = bb * C * HW * x.dtype.itemsize
    vmem_limit = int(min(128 * 1024 * 1024,
                         max(32 * 1024 * 1024, 4 * block_bytes + (8 << 20))))

    kernel = functools.partial(_cbam_kernel, W=W)
    out = pl.pallas_call(
        kernel,
        out_shape=jax.ShapeDtypeStruct((B, C, HW), x.dtype),
        grid_spec=pltpu.PrefetchScalarGridSpec(
            num_scalar_prefetch=0,
            grid=(B // bb,),
            in_specs=[
                pl.BlockSpec((bb, C, HW), lambda b: (b, 0, 0)),
                pl.BlockSpec((Cr, C), lambda b: (0, 0)),
                pl.BlockSpec((Cr, C), lambda b: (0, 0)),
                pl.BlockSpec((KSIZE, HW), lambda b: (0, 0)),
                pl.BlockSpec(memory_space=pltpu.SMEM),
            ],
            out_specs=pl.BlockSpec((bb, C, HW), lambda b: (b, 0, 0)),
        ),
        compiler_params=pltpu.CompilerParams(
            dimension_semantics=("parallel",),
            vmem_limit_bytes=vmem_limit),
    )(xf, w1, w2t, xmask, ws_flat)
    return out.reshape(B, C, H, W)


def cbam_reference(x, w1, w2, ws):
    """Pure-JAX reference matching the PyTorch CBAMLayer forward."""
    avg = jnp.mean(x, axis=(2, 3), keepdims=True)
    mx = jnp.max(x, axis=(2, 3), keepdims=True)

    def mlp(p):
        h = jnp.maximum(jnp.einsum("rc,bcij->brij", w1, p), 0.0)
        return jnp.einsum("cr,brij->bcij", w2, h)

    ca = jax.nn.sigmoid(mlp(avg) + mlp(mx))
    xc = ca * x

    avg_s = jnp.mean(xc, axis=1, keepdims=True)
    max_s = jnp.max(xc, axis=1, keepdims=True)
    sa_in = jnp.concatenate([avg_s, max_s], axis=1)                # (B, 2, H, W)
    conv = lax.conv_general_dilated(
        sa_in, ws[None],                                           # (1, 2, 7, 7)
        window_strides=(1, 1),
        padding=((PAD, PAD), (PAD, PAD)),
        dimension_numbers=("NCHW", "OIHW", "NCHW"))
    sa = jax.nn.sigmoid(conv)
    return sa * xc


if __name__ == "__main__":
    B, C, H, W = 2, 32, 16, 16
    ratio = 16
    Cr = C // ratio

    key = jax.random.PRNGKey(0)
    kx_, k1, k2, k3 = jax.random.split(key, 4)

    x = jax.random.normal(kx_, (B, C, H, W), dtype=jnp.float32)
    # Deterministic parameter init (shapes from nn.Conv2d in __init__, bias=False).
    w1 = jax.random.normal(k1, (Cr, C), dtype=jnp.float32) * (1.0 / C) ** 0.5
    w2 = jax.random.normal(k2, (C, Cr), dtype=jnp.float32) * (1.0 / Cr) ** 0.5
    ws = jax.random.normal(k3, (2, KSIZE, KSIZE), dtype=jnp.float32) * 0.1
    ws_flat = ws.reshape(2 * NTAPS)                                # [avg taps, max taps]

    out = cbam_pallas(x, w1, jnp.transpose(w2), ws_flat)
    out = jax.block_until_ready(out)

    ref = cbam_reference(x, w1, w2, ws)
    assert out.shape == ref.shape == (B, C, H, W)
    assert jnp.allclose(out, ref, rtol=1e-5, atol=1e-5), (
        float(jnp.max(jnp.abs(out - ref))))

    print("KERNEL_OK")
</pallas_src>

<mosaic_0001>
module attributes {stable_mosaic.version = 11 : i64} {
  func.func @_cbam_kernel(%arg0: i32, %arg1: memref<1x32x256xf32, #tpu.memory_space<vmem>>, %arg2: memref<2x32xf32, #tpu.memory_space<vmem>>, %arg3: memref<2x32xf32, #tpu.memory_space<vmem>>, %arg4: memref<7x256xf32, #tpu.memory_space<vmem>>, %arg5: memref<98xf32, #tpu.memory_space<smem>>, %arg6: memref<1x32x256xf32, #tpu.memory_space<vmem>>) attributes {dimension_semantics = [#tpu.dimension_semantics<parallel>], iteration_bounds = array<i64: 2>, scalar_prefetch = 0 : i64, scratch_operands = 0 : i64, tpu.core_type = #tpu.core_type<tc>, window_params = [{transform_indices = @transform_0, window_bounds = array<i64: 1, 32, 256>}, {pipeline_mode = #tpu.pipeline_mode<synchronous>, transform_indices = @transform_1, window_bounds = array<i64: 2, 32>}, {pipeline_mode = #tpu.pipeline_mode<synchronous>, transform_indices = @transform_2, window_bounds = array<i64: 2, 32>}, {pipeline_mode = #tpu.pipeline_mode<synchronous>, transform_indices = @transform_3, window_bounds = array<i64: 7, 256>}, {transform_indices = @transform_4, window_bounds = array<i64: 98>}, {transform_indices = @transform_5, window_bounds = array<i64: 1, 32, 256>}]} {
    %c0 = arith.constant 0 : index
    %c0_0 = arith.constant 0 : index
    %c0_1 = arith.constant 0 : index
    %0 = vector.load %arg1[%c0, %c0_0, %c0_1] : memref<1x32x256xf32, #tpu.memory_space<vmem>>, vector<1x32x256xf32>
    %cst = arith.constant dense<0.000000e+00> : vector<1x32xf32>
    %1 = vector.multi_reduction <add>, %0, %cst [2] : vector<1x32x256xf32> to vector<1x32xf32>
    %cst_2 = arith.constant 3.906250e-03 : f32
    %2 = vector.broadcast %cst_2 : f32 to vector<1x32xf32>
    %3 = arith.mulf %1, %2 : vector<1x32xf32>
    %cst_3 = arith.constant dense<0xFF800000> : vector<1x32xf32>
    %4 = vector.multi_reduction <maximumf>, %0, %cst_3 [2] : vector<1x32x256xf32> to vector<1x32xf32>
    %c0_4 = arith.constant 0 : index
    %c0_5 = arith.constant 0 : index
    %5 = vector.load %arg2[%c0_4, %c0_5] : memref<2x32xf32, #tpu.memory_space<vmem>>, vector<2x32xf32>
    %c0_6 = arith.constant 0 : index
    %c0_7 = arith.constant 0 : index
    %6 = vector.load %arg3[%c0_6, %c0_7] : memref<2x32xf32, #tpu.memory_space<vmem>>, vector<2x32xf32>
    %7 = vector.shape_cast %3 : vector<1x32xf32> to vector<1x1x32xf32>
    %8 = vector.shape_cast %5 : vector<2x32xf32> to vector<1x2x32xf32>
    %9 = vector.broadcast %7 : vector<1x1x32xf32> to vector<1x2x32xf32>
    %10 = arith.mulf %9, %8 : vector<1x2x32xf32>
    %cst_8 = arith.constant dense<0.000000e+00> : vector<1x2xf32>
    %11 = vector.multi_reduction <add>, %10, %cst_8 [2] : vector<1x2x32xf32> to vector<1x2xf32>
    %cst_9 = arith.constant 0.000000e+00 : f32
    %12 = vector.broadcast %cst_9 : f32 to vector<1x2xf32>
    %13 = arith.maximumf %11, %12 : vector<1x2xf32>
    %14 = vector.shape_cast %4 : vector<1x32xf32> to vector<1x1x32xf32>
    %15 = vector.shape_cast %5 : vector<2x32xf32> to vector<1x2x32xf32>
    %16 = vector.broadcast %14 : vector<1x1x32xf32> to vector<1x2x32xf32>
    %17 = arith.mulf %16, %15 : vector<1x2x32xf32>
    %cst_10 = arith.constant dense<0.000000e+00> : vector<1x2xf32>
    %18 = vector.multi_reduction <add>, %17, %cst_10 [2] : vector<1x2x32xf32> to vector<1x2xf32>
    %cst_11 = arith.constant 0.000000e+00 : f32
    %19 = vector.broadcast %cst_11 : f32 to vector<1x2xf32>
    %20 = arith.maximumf %18, %19 : vector<1x2xf32>
    %21 = arith.addf %13, %20 : vector<1x2xf32>
    %22 = vector.shape_cast %21 : vector<1x2xf32> to vector<1x2x1xf32>
    %23 = vector.shape_cast %6 : vector<2x32xf32> to vector<1x2x32xf32>
    %24 = vector.broadcast %22 : vector<1x2x1xf32> to vector<1x2x32xf32>
    %25 = arith.mulf %24, %23 : vector<1x2x32xf32>
    %cst_12 = arith.constant dense<0.000000e+00> : vector<1x32xf32>
    %26 = vector.multi_reduction <add>, %25, %cst_12 [1] : vector<1x2x32xf32> to vector<1x32xf32>
    %27 = arith.negf %26 : vector<1x32xf32>
    %28 = math.exp %27 : vector<1x32xf32>
    %cst_13 = arith.constant 1.000000e+00 : f32
    %29 = vector.broadcast %cst_13 : f32 to vector<1x32xf32>
    %30 = arith.addf %29, %28 : vector<1x32xf32>
    %31 = arith.divf %29, %30 : vector<1x32xf32>
    %32 = vector.shape_cast %31 : vector<1x32xf32> to vector<1x32x1xf32>
    %33 = vector.broadcast %32 : vector<1x32x1xf32> to vector<1x32x256xf32>
    %34 = arith.mulf %0, %33 : vector<1x32x256xf32>
    %cst_14 = arith.constant dense<0.000000e+00> : vector<1x256xf32>
    %35 = vector.multi_reduction <add>, %34, %cst_14 [1] : vector<1x32x256xf32> to vector<1x256xf32>
    %cst_15 = arith.constant 3.125000e-02 : f32
    %36 = vector.broadcast %cst_15 : f32 to vector<1x256xf32>
    %37 = arith.mulf %35, %36 : vector<1x256xf32>
    %cst_16 = arith.constant dense<0xFF800000> : vector<1x256xf32>
    %38 = vector.multi_reduction <maximumf>, %34, %cst_16 [1] : vector<1x32x256xf32> to vector<1x256xf32>
    %cst_17 = arith.constant 0.000000e+00 : f32
    %39 = vector.broadcast %cst_17 : f32 to vector<1x51xf32>
    %40 = tpu.concatenate %39, %37, %39 in 1 : vector<1x51xf32>, vector<1x256xf32>, vector<1x51xf32> -> vector<1x358xf32>
    %41 = tpu.concatenate %39, %38, %39 in 1 : vector<1x51xf32>, vector<1x256xf32>, vector<1x51xf32> -> vector<1x358xf32>
    %c0_18 = arith.constant 0 : index
    %c0_19 = arith.constant 0 : index
    %42 = vector.load %arg4[%c0_18, %c0_19] : memref<7x256xf32, #tpu.memory_space<vmem>>, vector<7x256xf32>
    %cst_20 = arith.constant 0.000000e+00 : f32
    %43 = vector.broadcast %cst_20 : f32 to vector<1x256xf32>
    %cst_21 = arith.constant 0.000000e+00 : f32
    %44 = vector.broadcast %cst_21 : f32 to vector<1x256xf32>
    %c0_22 = arith.constant 0 : index
    %45 = memref.load %arg5[%c0_22] : memref<98xf32, #tpu.memory_space<smem>>
    %46 = vector.extract_strided_slice %40 {offsets = [0, 0], sizes = [1, 256], strides = [1, 1]} : vector<1x358xf32> to vector<1x256xf32>
    %47 = vector.broadcast %45 : f32 to vector<1x256xf32>
    %48 = arith.mulf %47, %46 : vector<1x256xf32>
    %c49 = arith.constant 49 : index
    %49 = memref.load %arg5[%c49] : memref<98xf32, #tpu.memory_space<smem>>
    %50 = vector.extract_strided_slice %41 {offsets = [0, 0], sizes = [1, 256], strides = [1, 1]} : vector<1x358xf32> to vector<1x256xf32>
    %51 = vector.broadcast %49 : f32 to vector<1x256xf32>
    %52 = arith.mulf %51, %50 : vector<1x256xf32>
    %53 = arith.addf %48, %52 : vector<1x256xf32>
    %54 = arith.addf %44, %53 : vector<1x256xf32>
    %c7 = arith.constant 7 : index
    %55 = memref.load %arg5[%c7] : memref<98xf32, #tpu.memory_space<smem>>
    %56 = vector.extract_strided_slice %40 {offsets = [0, 16], sizes = [1, 256], strides = [1, 1]} : vector<1x358xf32> to vector<1x256xf32>
    %57 = vector.broadcast %55 : f32 to vector<1x256xf32>
    %58 = arith.mulf %57, %56 : vector<1x256xf32>
    %c56 = arith.constant 56 : index
    %59 = memref.load %arg5[%c56] : memref<98xf32, #tpu.memory_space<smem>>
    %60 = vector.extract_strided_slice %41 {offsets = [0, 16], sizes = [1, 256], strides = [1, 1]} : vector<1x358xf32> to vector<1x256xf32>
    %61 = vector.broadcast %59 : f32 to vector<1x256xf32>
    %62 = arith.mulf %61, %60 : vector<1x256xf32>
    %63 = arith.addf %58, %62 : vector<1x256xf32>
    %64 = arith.addf %54, %63 : vector<1x256xf32>
    %c14 = arith.constant 14 : index
    %65 = memref.load %arg5[%c14] : memref<98xf32, #tpu.memory_space<smem>>
    %66 = vector.extract_strided_slice %40 {offsets = [0, 32], sizes = [1, 256], strides = [1, 1]} : vector<1x358xf32> to vector<1x256xf32>
    %67 = vector.broadcast %65 : f32 to vector<1x256xf32>
    %68 = arith.mulf %67, %66 : vector<1x256xf32>
    %c63 = arith.constant 63 : index
    %69 = memref.load %arg5[%c63] : memref<98xf32, #tpu.memory_space<smem>>
    %70 = vector.extract_strided_slice %41 {offsets = [0, 32], sizes = [1, 256], strides = [1, 1]} : vector<1x358xf32> to vector<1x256xf32>
    %71 = vector.broadcast %69 : f32 to vector<1x256xf32>
    %72 = arith.mulf %71, %70 : vector<1x256xf32>
    %73 = arith.addf %68, %72 : vector<1x256xf32>
    %74 = arith.addf %64, %73 : vector<1x256xf32>
    %c21 = arith.constant 21 : index
    %75 = memref.load %arg5[%c21] : memref<98xf32, #tpu.memory_space<smem>>
    %76 = vector.extract_strided_slice %40 {offsets = [0, 48], sizes = [1, 256], strides = [1, 1]} : vector<1x358xf32> to vector<1x256xf32>
    %77 = vector.broadcast %75 : f32 to vector<1x256xf32>
    %78 = arith.mulf %77, %76 : vector<1x256xf32>
    %c70 = arith.constant 70 : index
    %79 = memref.load %arg5[%c70] : memref<98xf32, #tpu.memory_space<smem>>
    %80 = vector.extract_strided_slice %41 {offsets = [0, 48], sizes = [1, 256], strides = [1, 1]} : vector<1x358xf32> to vector<1x256xf32>
    %81 = vector.broadcast %79 : f32 to vector<1x256xf32>
    %82 = arith.mulf %81, %80 : vector<1x256xf32>
    %83 = arith.addf %78, %82 : vector<1x256xf32>
    %84 = arith.addf %74, %83 : vector<1x256xf32>
    %c28 = arith.constant 28 : index
    %85 = memref.load %arg5[%c28] : memref<98xf32, #tpu.memory_space<smem>>
    %86 = vector.extract_strided_slice %40 {offsets = [0, 64], sizes = [1, 256], strides = [1, 1]} : vector<1x358xf32> to vector<1x256xf32>
    %87 = vector.broadcast %85 : f32 to vector<1x256xf32>
    %88 = arith.mulf %87, %86 : vector<1x256xf32>
    %c77 = arith.constant 77 : index
    %89 = memref.load %arg5[%c77] : memref<98xf32, #tpu.memory_space<smem>>
    %90 = vector.extract_strided_slice %41 {offsets = [0, 64], sizes = [1, 256], strides = [1, 1]} : vector<1x358xf32> to vector<1x256xf32>
    %91 = vector.broadcast %89 : f32 to vector<1x256xf32>
    %92 = arith.mulf %91, %90 : vector<1x256xf32>
    %93 = arith.addf %88, %92 : vector<1x256xf32>
    %94 = arith.addf %84, %93 : vector<1x256xf32>
    %c35 = arith.constant 35 : index
    %95 = memref.load %arg5[%c35] : memref<98xf32, #tpu.memory_space<smem>>
    %96 = vector.extract_strided_slice %40 {offsets = [0, 80], sizes = [1, 256], strides = [1, 1]} : vector<1x358xf32> to vector<1x256xf32>
    %97 = vector.broadcast %95 : f32 to vector<1x256xf32>
    %98 = arith.mulf %97, %96 : vector<1x256xf32>
    %c84 = arith.constant 84 : index
    %99 = memref.load %arg5[%c84] : memref<98xf32, #tpu.memory_space<smem>>
    %100 = vector.extract_strided_slice %41 {offsets = [0, 80], sizes = [1, 256], strides = [1, 1]} : vector<1x358xf32> to vector<1x256xf32>
    %101 = vector.broadcast %99 : f32 to vector<1x256xf32>
    %102 = arith.mulf %101, %100 : vector<1x256xf32>
    %103 = arith.addf %98, %102 : vector<1x256xf32>
    %104 = arith.addf %94, %103 : vector<1x256xf32>
    %c42 = arith.constant 42 : index
    %105 = memref.load %arg5[%c42] : memref<98xf32, #tpu.memory_space<smem>>
    %106 = vector.extract_strided_slice %40 {offsets = [0, 96], sizes = [1, 256], strides = [1, 1]} : vector<1x358xf32> to vector<1x256xf32>
    %107 = vector.broadcast %105 : f32 to vector<1x256xf32>
    %108 = arith.mulf %107, %106 : vector<1x256xf32>
    %c91 = arith.constant 91 : index
    %109 = memref.load %arg5[%c91] : memref<98xf32, #tpu.memory_space<smem>>
    %110 = vector.extract_strided_slice %41 {offsets = [0, 96], sizes = [1, 256], strides = [1, 1]} : vector<1x358xf32> to vector<1x256xf32>
    %111 = vector.broadcast %109 : f32 to vector<1x256xf32>
    %112 = arith.mulf %111, %110 : vector<1x256xf32>
    %113 = arith.addf %108, %112 : vector<1x256xf32>
    %114 = arith.addf %104, %113 : vector<1x256xf32>
    %115 = vector.extract_strided_slice %42 {offsets = [0, 0], sizes = [1, 256], strides = [1, 1]} : vector<7x256xf32> to vector<1x256xf32>
    %116 = arith.mulf %115, %114 : vector<1x256xf32>
    %117 = arith.addf %43, %116 : vector<1x256xf32>
    %cst_23 = arith.constant 0.000000e+00 : f32
    %118 = vector.broadcast %cst_23 : f32 to vector<1x256xf32>
    %c1 = arith.constant 1 : index
    %119 = memref.load %arg5[%c1] : memref<98xf32, #tpu.memory_space<smem>>
    %120 = vector.extract_strided_slice %40 {offsets = [0, 1], sizes = [1, 256], strides = [1, 1]} : vector<1x358xf32> to vector<1x256xf32>
    %121 = vector.broadcast %119 : f32 to vector<1x256xf32>
    %122 = arith.mulf %121, %120 : vector<1x256xf32>
    %c50 = arith.constant 50 : index
    %123 = memref.load %arg5[%c50] : memref<98xf32, #tpu.memory_space<smem>>
    %124 = vector.extract_strided_slice %41 {offsets = [0, 1], sizes = [1, 256], strides = [1, 1]} : vector<1x358xf32> to vector<1x256xf32>
    %125 = vector.broadcast %123 : f32 to vector<1x256xf32>
    %126 = arith.mulf %125, %124 : vector<1x256xf32>
    %127 = arith.addf %122, %126 : vector<1x256xf32>
    %128 = arith.addf %118, %127 : vector<1x256xf32>
    %c8 = arith.constant 8 : index
    %129 = memref.load %arg5[%c8] : memref<98xf32, #tpu.memory_space<smem>>
    %130 = vector.extract_strided_slice %40 {offsets = [0, 17], sizes = [1, 256], strides = [1, 1]} : vector<1x358xf32> to vector<1x256xf32>
    %131 = vector.broadcast %129 : f32 to vector<1x256xf32>
    %132 = arith.mulf %131, %130 : vector<1x256xf32>
    %c57 = arith.constant 57 : index
    %133 = memref.load %arg5[%c57] : memref<98xf32, #tpu.memory_space<smem>>
    %134 = vector.extract_strided_slice %41 {offsets = [0, 17], sizes = [1, 256], strides = [1, 1]} : vector<1x358xf32> to vector<1x256xf32>
    %135 = vector.broadcast %133 : f32 to vector<1x256xf32>
    %136 = arith.mulf %135, %134 : vector<1x256xf32>
    %137 = arith.addf %132, %136 : vector<1x256xf32>
    %138 = arith.addf %128, %137 : vector<1x256xf32>
    %c15 = arith.constant 15 : index
    %139 = memref.load %arg5[%c15] : memref<98xf32, #tpu.memory_space<smem>>
    %140 = vector.extract_strided_slice %40 {offsets = [0, 33], sizes = [1, 256], strides = [1, 1]} : vector<1x358xf32> to vector<1x256xf32>
    %141 = vector.broadcast %139 : f32 to vector<1x256xf32>
    %142 = arith.mulf %141, %140 : vector<1x256xf32>
    %c64 = arith.constant 64 : index
    %143 = memref.load %arg5[%c64] : memref<98xf32, #tpu.memory_space<smem>>
    %144 = vector.extract_strided_slice %41 {offsets = [0, 33], sizes = [1, 256], strides = [1, 1]} : vector<1x358xf32> to vector<1x256xf32>
    %145 = vector.broadcast %143 : f32 to vector<1x256xf32>
    %146 = arith.mulf %145, %144 : vector<1x256xf32>
    %147 = arith.addf %142, %146 : vector<1x256xf32>
    %148 = arith.addf %138, %147 : vector<1x256xf32>
    %c22 = arith.constant 22 : index
    %149 = memref.load %arg5[%c22] : memref<98xf32, #tpu.memory_space<smem>>
    %150 = vector.extract_strided_slice %40 {offsets = [0, 49], sizes = [1, 256], strides = [1, 1]} : vector<1x358xf32> to vector<1x256xf32>
    %151 = vector.broadcast %149 : f32 to vector<1x256xf32>
    %152 = arith.mulf %151, %150 : vector<1x256xf32>
    %c71 = arith.constant 71 : index
    %153 = memref.load %arg5[%c71] : memref<98xf32, #tpu.memory_space<smem>>
    %154 = vector.extract_strided_slice %41 {offsets = [0, 49], sizes = [1, 256], strides = [1, 1]} : vector<1x358xf32> to vector<1x256xf32>
    %155 = vector.broadcast %153 : f32 to vector<1x256xf32>
    %156 = arith.mulf %155, %154 : vector<1x256xf32>
    %157 = arith.addf %152, %156 : vector<1x256xf32>
    %158 = arith.addf %148, %157 : vector<1x256xf32>
    %c29 = arith.constant 29 : index
    %159 = memref.load %arg5[%c29] : memref<98xf32, #tpu.memory_space<smem>>
    %160 = vector.extract_strided_slice %40 {offsets = [0, 65], sizes = [1, 256], strides = [1, 1]} : vector<1x358xf32> to vector<1x256xf32>
    %161 = vector.broadcast %159 : f32 to vector<1x256xf32>
    %162 = arith.mulf %161, %160 : vector<1x256xf32>
    %c78 = arith.constant 78 : index
    %163 = memref.load %arg5[%c78] : memref<98xf32, #tpu.memory_space<smem>>
    %164 = vector.extract_strided_slice %41 {offsets = [0, 65], sizes = [1, 256], strides = [1, 1]} : vector<1x358xf32> to vector<1x256xf32>
    %165 = vector.broadcast %163 : f32 to vector<1x256xf32>
    %166 = arith.mulf %165, %164 : vector<1x256xf32>
    %167 = arith.addf %162, %166 : vector<1x256xf32>
    %168 = arith.addf %158, %167 : vector<1x256xf32>
    %c36 = arith.constant 36 : index
    %169 = memref.load %arg5[%c36] : memref<98xf32, #tpu.memory_space<smem>>
    %170 = vector.extract_strided_slice %40 {offsets = [0, 81], sizes = [1, 256], strides = [1, 1]} : vector<1x358xf32> to vector<1x256xf32>
    %171 = vector.broadcast %169 : f32 to vector<1x256xf32>
    %172 = arith.mulf %171, %170 : vector<1x256xf32>
    %c85 = arith.constant 85 : index
    %173 = memref.load %arg5[%c85] : memref<98xf32, #tpu.memory_space<smem>>
    %174 = vector.extract_strided_slice %41 {offsets = [0, 81], sizes = [1, 256], strides = [1, 1]} : vector<1x358xf32> to vector<1x256xf32>
    %175 = vector.broadcast %173 : f32 to vector<1x256xf32>
    %176 = arith.mulf %175, %174 : vector<1x256xf32>
    %177 = arith.addf %172, %176 : vector<1x256xf32>
    %178 = arith.addf %168, %177 : vector<1x256xf32>
    %c43 = arith.constant 43 : index
    %179 = memref.load %arg5[%c43] : memref<98xf32, #tpu.memory_space<smem>>
    %180 = vector.extract_strided_slice %40 {offsets = [0, 97], sizes = [1, 256], strides = [1, 1]} : vector<1x358xf32> to vector<1x256xf32>
    %181 = vector.broadcast %179 : f32 to vector<1x256xf32>
    %182 = arith.mulf %181, %180 : vector<1x256xf32>
    %c92 = arith.constant 92 : index
    %183 = memref.load %arg5[%c92] : memref<98xf32, #tpu.memory_space<smem>>
    %184 = vector.extract_strided_slice %41 {offsets = [0, 97], sizes = [1, 256], strides = [1, 1]} : vector<1x358xf32> to vector<1x256xf32>
    %185 = vector.broadcast %183 : f32 to vector<1x256xf32>
    %186 = arith.mulf %185, %184 : vector<1x256xf32>
    %187 = arith.addf %182, %186 : vector<1x256xf32>
    %188 = arith.addf %178, %187 : vector<1x256xf32>
    %189 = vector.extract_strided_slice %42 {offsets = [1, 0], sizes = [1, 256], strides = [1, 1]} : vector<7x256xf32> to vector<1x256xf32>
    %190 = arith.mulf %189, %188 : vector<1x256xf32>
    %191 = arith.addf %117, %190 : vector<1x256xf32>
    %cst_24 = arith.constant 0.000000e+00 : f32
    %192 = vector.broadcast %cst_24 : f32 to vector<1x256xf32>
    %c2 = arith.constant 2 : index
    %193 = memref.load %arg5[%c2] : memref<98xf32, #tpu.memory_space<smem>>
    %194 = vector.extract_strided_slice %40 {offsets = [0, 2], sizes = [1, 256], strides = [1, 1]} : vector<1x358xf32> to vector<1x256xf32>
    %195 = vector.broadcast %193 : f32 to vector<1x256xf32>
    %196 = arith.mulf %195, %194 : vector<1x256xf32>
    %c51 = arith.constant 51 : index
    %197 = memref.load %arg5[%c51] : memref<98xf32, #tpu.memory_space<smem>>
    %198 = vector.extract_strided_slice %41 {offsets = [0, 2], sizes = [1, 256], strides = [1, 1]} : vector<1x358xf32> to vector<1x256xf32>
    %199 = vector.broadcast %197 : f32 to vector<1x256xf32>
    %200 = arith.mulf %199, %198 : vector<1x256xf32>
    %201 = arith.addf %196, %200 : vector<1x256xf32>
    %202 = arith.addf %192, %201 : vector<1x256xf32>
    %c9 = arith.constant 9 : index
    %203 = memref.load %arg5[%c9] : memref<98xf32, #tpu.memory_space<smem>>
    %204 = vector.extract_strided_slice %40 {offsets = [0, 18], sizes = [1, 256], strides = [1, 1]} : vector<1x358xf32> to vector<1x256xf32>
    %205 = vector.broadcast %203 : f32 to vector<1x256xf32>
    %206 = arith.mulf %205, %204 : vector<1x256xf32>
    %c58 = arith.constant 58 : index
    %207 = memref.load %arg5[%c58] : memref<98xf32, #tpu.memory_space<smem>>
    %208 = vector.extract_strided_slice %41 {offsets = [0, 18], sizes = [1, 256], strides = [1, 1]} : vector<1x358xf32> to vector<1x256xf32>
    %209 = vector.broadcast %207 : f32 to vector<1x256xf32>
    %210 = arith.mulf %209, %208 : vector<1x256xf32>
    %211 = arith.addf %206, %210 : vector<1x256xf32>
    %212 = arith.addf %202, %211 : vector<1x256xf32>
    %c16 = arith.constant 16 : index
    %213 = memref.load %arg5[%c16] : memref<98xf32, #tpu.memory_space<smem>>
    %214 = vector.extract_strided_slice %40 {offsets = [0, 34], sizes = [1, 256], strides = [1, 1]} : vector<1x358xf32> to vector<1x256xf32>
    %215 = vector.broadcast %213 : f32 to vector<1x256xf32>
    %216 = arith.mulf %215, %214 : vector<1x256xf32>
    %c65 = arith.constant 65 : index
    %217 = memref.load %arg5[%c65] : memref<98xf32, #tpu.memory_space<smem>>
    %218 = vector.extract_strided_slice %41 {offsets = [0, 34], sizes = [1, 256], strides = [1, 1]} : vector<1x358xf32> to vector<1x256xf32>
    %219 = vector.broadcast %217 : f32 to vector<1x256xf32>
    %220 = arith.mulf %219, %218 : vector<1x256xf32>
    %221 = arith.addf %216, %220 : vector<1x256xf32>
    %222 = arith.addf %212, %221 : vector<1x256xf32>
    %c23 = arith.constant 23 : index
    %223 = memref.load %arg5[%c23] : memref<98xf32, #tpu.memory_space<smem>>
    %224 = vector.extract_strided_slice %40 {offsets = [0, 50], sizes = [1, 256], strides = [1, 1]} : vector<1x358xf32> to vector<1x256xf32>
    %225 = vector.broadcast %223 : f32 to vector<1x256xf32>
    %226 = arith.mulf %225, %224 : vector<1x256xf32>
    %c72 = arith.constant 72 : index
    %227 = memref.load %arg5[%c72] : memref<98xf32, #tpu.memory_space<smem>>
    %228 = vector.extract_strided_slice %41 {offsets = [0, 50], sizes = [1, 256], strides = [1, 1]} : vector<1x358xf32> to vector<1x256xf32>
    %229 = vector.broadcast %227 : f32 to vector<1x256xf32>
    %230 = arith.mulf %229, %228 : vector<1x256xf32>
    %231 = arith.addf %226, %230 : vector<1x256xf32>
    %232 = arith.addf %222, %231 : vector<1x256xf32>
    %c30 = arith.constant 30 : index
    %233 = memref.load %arg5[%c30] : memref<98xf32, #tpu.memory_space<smem>>
    %234 = vector.extract_strided_slice %40 {offsets = [0, 66], sizes = [1, 256], strides = [1, 1]} : vector<1x358xf32> to vector<1x256xf32>
    %235 = vector.broadcast %233 : f32 to vector<1x256xf32>
    %236 = arith.mulf %235, %234 : vector<1x256xf32>
    %c79 = arith.constant 79 : index
    %237 = memref.load %arg5[%c79] : memref<98xf32, #tpu.memory_space<smem>>
    %238 = vector.extract_strided_slice %41 {offsets = [0, 66], sizes = [1, 256], strides = [1, 1]} : vector<1x358xf32> to vector<1x256xf32>
    %239 = vector.broadcast %237 : f32 to vector<1x256xf32>
    %240 = arith.mulf %239, %238 : vector<1x256xf32>
    %241 = arith.addf %236, %240 : vector<1x256xf32>
    %242 = arith.addf %232, %241 : vector<1x256xf32>
    %c37 = arith.constant 37 : index
    %243 = memref.load %arg5[%c37] : memref<98xf32, #tpu.memory_space<smem>>
    %244 = vector.extract_strided_slice %40 {offsets = [0, 82], sizes = [1, 256], strides = [1, 1]} : vector<1x358xf32> to vector<1x256xf32>
    %245 = vector.broadcast %243 : f32 to vector<1x256xf32>
    %246 = arith.mulf %245, %244 : vector<1x256xf32>
    %c86 = arith.constant 86 : index
    %247 = memref.load %arg5[%c86] : memref<98xf32, #tpu.memory_space<smem>>
    %248 = vector.extract_strided_slice %41 {offsets = [0, 82], sizes = [1, 256], strides = [1, 1]} : vector<1x358xf32> to vector<1x256xf32>
    %249 = vector.broadcast %247 : f32 to vector<1x256xf32>
    %250 = arith.mulf %249, %248 : vector<1x256xf32>
    %251 = arith.addf %246, %250 : vector<1x256xf32>
    %252 = arith.addf %242, %251 : vector<1x256xf32>
    %c44 = arith.constant 44 : index
    %253 = memref.load %arg5[%c44] : memref<98xf32, #tpu.memory_space<smem>>
    %254 = vector.extract_strided_slice %40 {offsets = [0, 98], sizes = [1, 256], strides = [1, 1]} : vector<1x358xf32> to vector<1x256xf32>
    %255 = vector.broadcast %253 : f32 to vector<1x256xf32>
    %256 = arith.mulf %255, %254 : vector<1x256xf32>
    %c93 = arith.constant 93 : index
    %257 = memref.load %arg5[%c93] : memref<98xf32, #tpu.memory_space<smem>>
    %258 = vector.extract_strided_slice %41 {offsets = [0, 98], sizes = [1, 256], strides = [1, 1]} : vector<1x358xf32> to vector<1x256xf32>
    %259 = vector.broadcast %257 : f32 to vector<1x256xf32>
    %260 = arith.mulf %259, %258 : vector<1x256xf32>
    %261 = arith.addf %256, %260 : vector<1x256xf32>
    %262 = arith.addf %252, %261 : vector<1x256xf32>
    %263 = vector.extract_strided_slice %42 {offsets = [2, 0], sizes = [1, 256], strides = [1, 1]} : vector<7x256xf32> to vector<1x256xf32>
    %264 = arith.mulf %263, %262 : vector<1x256xf32>
    %265 = arith.addf %191, %264 : vector<1x256xf32>
    %cst_25 = arith.constant 0.000000e+00 : f32
    %266 = vector.broadcast %cst_25 : f32 to vector<1x256xf32>
    %c3 = arith.constant 3 : index
    %267 = memref.load %arg5[%c3] : memref<98xf32, #tpu.memory_space<smem>>
    %268 = vector.extract_strided_slice %40 {offsets = [0, 3], sizes = [1, 256], strides = [1, 1]} : vector<1x358xf32> to vector<1x256xf32>
    %269 = vector.broadcast %267 : f32 to vector<1x256xf32>
    %270 = arith.mulf %269, %268 : vector<1x256xf32>
    %c52 = arith.constant 52 : index
    %271 = memref.load %arg5[%c52] : memref<98xf32, #tpu.memory_space<smem>>
    %272 = vector.extract_strided_slice %41 {offsets = [0, 3], sizes = [1, 256], strides = [1, 1]} : vector<1x358xf32> to vector<1x256xf32>
    %273 = vector.broadcast %271 : f32 to vector<1x256xf32>
    %274 = arith.mulf %273, %272 : vector<1x256xf32>
    %275 = arith.addf %270, %274 : vector<1x256xf32>
    %276 = arith.addf %266, %275 : vector<1x256xf32>
    %c10 = arith.constant 10 : index
    %277 = memref.load %arg5[%c10] : memref<98xf32, #tpu.memory_space<smem>>
    %278 = vector.extract_strided_slice %40 {offsets = [0, 19], sizes = [1, 256], strides = [1, 1]} : vector<1x358xf32> to vector<1x256xf32>
    %279 = vector.broadcast %277 : f32 to vector<1x256xf32>
    %280 = arith.mulf %279, %278 : vector<1x256xf32>
    %c59 = arith.constant 59 : index
    %281 = memref.load %arg5[%c59] : memref<98xf32, #tpu.memory_space<smem>>
    %282 = vector.extract_strided_slice %41 {offsets = [0, 19], sizes = [1, 256], strides = [1, 1]} : vector<1x358xf32> to vector<1x256xf32>
    %283 = vector.broadcast %281 : f32 to vector<1x256xf32>
    %284 = arith.mulf %283, %282 : vector<1x256xf32>
    %285 = arith.addf %280, %284 : vector<1x256xf32>
    %286 = arith.addf %276, %285 : vector<1x256xf32>
    %c17 = arith.constant 17 : index
    %287 = memref.load %arg5[%c17] : memref<98xf32, #tpu.memory_space<smem>>
    %288 = vector.extract_strided_slice %40 {offsets = [0, 35], sizes = [1, 256], strides = [1, 1]} : vector<1x358xf32> to vector<1x256xf32>
    %289 = vector.broadcast %287 : f32 to vector<1x256xf32>
    %290 = arith.mulf %289, %288 : vector<1x256xf32>
    %c66 = arith.constant 66 : index
    %291 = memref.load %arg5[%c66] : memref<98xf32, #tpu.memory_space<smem>>
    %292 = vector.extract_strided_slice %41 {offsets = [0, 35], sizes = [1, 256], strides = [1, 1]} : vector<1x358xf32> to vector<1x256xf32>
    %293 = vector.broadcast %291 : f32 to vector<1x256xf32>
    %294 = arith.mulf %293, %292 : vector<1x256xf32>
    %295 = arith.addf %290, %294 : vector<1x256xf32>
    %296 = arith.addf %286, %295 : vector<1x256xf32>
    %c24 = arith.constant 24 : index
    %297 = memref.load %arg5[%c24] : memref<98xf32, #tpu.memory_space<smem>>
    %298 = vector.extract_strided_slice %40 {offsets = [0, 51], sizes = [1, 256], strides = [1, 1]} : vector<1x358xf32> to vector<1x256xf32>
    %299 = vector.broadcast %297 : f32 to vector<1x256xf32>
    %300 = arith.mulf %299, %298 : vector<1x256xf32>
    %c73 = arith.constant 73 : index
    %301 = memref.load %arg5[%c73] : memref<98xf32, #tpu.memory_space<smem>>
    %302 = vector.extract_strided_slice %41 {offsets = [0, 51], sizes = [1, 256], strides = [1, 1]} : vector<1x358xf32> to vector<1x256xf32>
    %303 = vector.broadcast %301 : f32 to vector<1x256xf32>
    %304 = arith.mulf %303, %302 : vector<1x256xf32>
    %305 = arith.addf %300, %304 : vector<1x256xf32>
    %306 = arith.addf %296, %305 : vector<1x256xf32>
    %c31 = arith.constant 31 : index
    %307 = memref.load %arg5[%c31] : memref<98xf32, #tpu.memory_space<smem>>
    %308 = vector.extract_strided_slice %40 {offsets = [0, 67], sizes = [1, 256], strides = [1, 1]} : vector<1x358xf32> to vector<1x256xf32>
    %309 = vector.broadcast %307 : f32 to vector<1x256xf32>
    %310 = arith.mulf %309, %308 : vector<1x256xf32>
    %c80 = arith.constant 80 : index
    %311 = memref.load %arg5[%c80] : memref<98xf32, #tpu.memory_space<smem>>
    %312 = vector.extract_strided_slice %41 {offsets = [0, 67], sizes = [1, 256], strides = [1, 1]} : vector<1x358xf32> to vector<1x256xf32>
    %313 = vector.broadcast %311 : f32 to vector<1x256xf32>
    %314 = arith.mulf %313, %312 : vector<1x256xf32>
    %315 = arith.addf %310, %314 : vector<1x256xf32>
    %316 = arith.addf %306, %315 : vector<1x256xf32>
    %c38 = arith.constant 38 : index
    %317 = memref.load %arg5[%c38] : memref<98xf32, #tpu.memory_space<smem>>
    %318 = vector.extract_strided_slice %40 {offsets = [0, 83], sizes = [1, 256], strides = [1, 1]} : vector<1x358xf32> to vector<1x256xf32>
    %319 = vector.broadcast %317 : f32 to vector<1x256xf32>
    %320 = arith.mulf %319, %318 : vector<1x256xf32>
    %c87 = arith.constant 87 : index
    %321 = memref.load %arg5[%c87] : memref<98xf32, #tpu.memory_space<smem>>
    %322 = vector.extract_strided_slice %41 {offsets = [0, 83], sizes = [1, 256], strides = [1, 1]} : vector<1x358xf32> to vector<1x256xf32>
    %323 = vector.broadcast %321 : f32 to vector<1x256xf32>
    %324 = arith.mulf %323, %322 : vector<1x256xf32>
    %325 = arith.addf %320, %324 : vector<1x256xf32>
    %326 = arith.addf %316, %325 : vector<1x256xf32>
    %c45 = arith.constant 45 : index
    %327 = memref.load %arg5[%c45] : memref<98xf32, #tpu.memory_space<smem>>
    %328 = vector.extract_strided_slice %40 {offsets = [0, 99], sizes = [1, 256], strides = [1, 1]} : vector<1x358xf32> to vector<1x256xf32>
    %329 = vector.broadcast %327 : f32 to vector<1x256xf32>
    %330 = arith.mulf %329, %328 : vector<1x256xf32>
    %c94 = arith.constant 94 : index
    %331 = memref.load %arg5[%c94] : memref<98xf32, #tpu.memory_space<smem>>
    %332 = vector.extract_strided_slice %41 {offsets = [0, 99], sizes = [1, 256], strides = [1, 1]} : vector<1x358xf32> to vector<1x256xf32>
    %333 = vector.broadcast %331 : f32 to vector<1x256xf32>
    %334 = arith.mulf %333, %332 : vector<1x256xf32>
    %335 = arith.addf %330, %334 : vector<1x256xf32>
    %336 = arith.addf %326, %335 : vector<1x256xf32>
    %337 = vector.extract_strided_slice %42 {offsets = [3, 0], sizes = [1, 256], strides = [1, 1]} : vector<7x256xf32> to vector<1x256xf32>
    %338 = arith.mulf %337, %336 : vector<1x256xf32>
    %339 = arith.addf %265, %338 : vector<1x256xf32>
    %cst_26 = arith.constant 0.000000e+00 : f32
    %340 = vector.broadcast %cst_26 : f32 to vector<1x256xf32>
    %c4 = arith.constant 4 : index
    %341 = memref.load %arg5[%c4] : memref<98xf32, #tpu.memory_space<smem>>
    %342 = vector.extract_strided_slice %40 {offsets = [0, 4], sizes = [1, 256], strides = [1, 1]} : vector<1x358xf32> to vector<1x256xf32>
    %343 = vector.broadcast %341 : f32 to vector<1x256xf32>
    %344 = arith.mulf %343, %342 : vector<1x256xf32>
    %c53 = arith.constant 53 : index
    %345 = memref.load %arg5[%c53] : memref<98xf32, #tpu.memory_space<smem>>
    %346 = vector.extract_strided_slice %41 {offsets = [0, 4], sizes = [1, 256], strides = [1, 1]} : vector<1x358xf32> to vector<1x256xf32>
    %347 = vector.broadcast %345 : f32 to vector<1x256xf32>
    %348 = arith.mulf %347, %346 : vector<1x256xf32>
    %349 = arith.addf %344, %348 : vector<1x256xf32>
    %350 = arith.addf %340, %349 : vector<1x256xf32>
    %c11 = arith.constant 11 : index
    %351 = memref.load %arg5[%c11] : memref<98xf32, #tpu.memory_space<smem>>
    %352 = vector.extract_strided_slice %40 {offsets = [0, 20], sizes = [1, 256], strides = [1, 1]} : vector<1x358xf32> to vector<1x256xf32>
    %353 = vector.broadcast %351 : f32 to vector<1x256xf32>
    %354 = arith.mulf %353, %352 : vector<1x256xf32>
    %c60 = arith.constant 60 : index
    %355 = memref.load %arg5[%c60] : memref<98xf32, #tpu.memory_space<smem>>
    %356 = vector.extract_strided_slice %41 {offsets = [0, 20], sizes = [1, 256], strides = [1, 1]} : vector<1x358xf32> to vector<1x256xf32>
    %357 = vector.broadcast %355 : f32 to vector<1x256xf32>
    %358 = arith.mulf %357, %356 : vector<1x256xf32>
    %359 = arith.addf %354, %358 : vector<1x256xf32>
    %360 = arith.addf %350, %359 : vector<1x256xf32>
    %c18 = arith.constant 18 : index
    %361 = memref.load %arg5[%c18] : memref<98xf32, #tpu.memory_space<smem>>
    %362 = vector.extract_strided_slice %40 {offsets = [0, 36], sizes = [1, 256], strides = [1, 1]} : vector<1x358xf32> to vector<1x256xf32>
    %363 = vector.broadcast %361 : f32 to vector<1x256xf32>
    %364 = arith.mulf %363, %362 : vector<1x256xf32>
    %c67 = arith.constant 67 : index
    %365 = memref.load %arg5[%c67] : memref<98xf32, #tpu.memory_space<smem>>
    %366 = vector.extract_strided_slice %41 {offsets = [0, 36], sizes = [1, 256], strides = [1, 1]} : vector<1x358xf32> to vector<1x256xf32>
    %367 = vector.broadcast %365 : f32 to vector<1x256xf32>
    %368 = arith.mulf %367, %366 : vector<1x256xf32>
    %369 = arith.addf %364, %368 : vector<1x256xf32>
    %370 = arith.addf %360, %369 : vector<1x256xf32>
    %c25 = arith.constant 25 : index
    %371 = memref.load %arg5[%c25] : memref<98xf32, #tpu.memory_space<smem>>
    %372 = vector.extract_strided_slice %40 {offsets = [0, 52], sizes = [1, 256], strides = [1, 1]} : vector<1x358xf32> to vector<1x256xf32>
    %373 = vector.broadcast %371 : f32 to vector<1x256xf32>
    %374 = arith.mulf %373, %372 : vector<1x256xf32>
    %c74 = arith.constant 74 : index
    %375 = memref.load %arg5[%c74] : memref<98xf32, #tpu.memory_space<smem>>
    %376 = vector.extract_strided_slice %41 {offsets = [0, 52], sizes = [1, 256], strides = [1, 1]} : vector<1x358xf32> to vector<1x256xf32>
    %377 = vector.broadcast %375 : f32 to vector<1x256xf32>
    %378 = arith.mulf %377, %376 : vector<1x256xf32>
    %379 = arith.addf %374, %378 : vector<1x256xf32>
    %380 = arith.addf %370, %379 : vector<1x256xf32>
    %c32 = arith.constant 32 : index
    %381 = memref.load %arg5[%c32] : memref<98xf32, #tpu.memory_space<smem>>
    %382 = vector.extract_strided_slice %40 {offsets = [0, 68], sizes = [1, 256], strides = [1, 1]} : vector<1x358xf32> to vector<1x256xf32>
    %383 = vector.broadcast %381 : f32 to vector<1x256xf32>
    %384 = arith.mulf %383, %382 : vector<1x256xf32>
    %c81 = arith.constant 81 : index
    %385 = memref.load %arg5[%c81] : memref<98xf32, #tpu.memory_space<smem>>
    %386 = vector.extract_strided_slice %41 {offsets = [0, 68], sizes = [1, 256], strides = [1, 1]} : vector<1x358xf32> to vector<1x256xf32>
    %387 = vector.broadcast %385 : f32 to vector<1x256xf32>
    %388 = arith.mulf %387, %386 : vector<1x256xf32>
    %389 = arith.addf %384, %388 : vector<1x256xf32>
    %390 = arith.addf %380, %389 : vector<1x256xf32>
    %c39 = arith.constant 39 : index
    %391 = memref.load %arg5[%c39] : memref<98xf32, #tpu.memory_space<smem>>
    %392 = vector.extract_strided_slice %40 {offsets = [0, 84], sizes = [1, 256], strides = [1, 1]} : vector<1x358xf32> to vector<1x256xf32>
    %393 = vector.broadcast %391 : f32 to vector<1x256xf32>
    %394 = arith.mulf %393, %392 : vector<1x256xf32>
    %c88 = arith.constant 88 : index
    %395 = memref.load %arg5[%c88] : memref<98xf32, #tpu.memory_space<smem>>
    %396 = vector.extract_strided_slice %41 {offsets = [0, 84], sizes = [1, 256], strides = [1, 1]} : vector<1x358xf32> to vector<1x256xf32>
    %397 = vector.broadcast %395 : f32 to vector<1x256xf32>
    %398 = arith.mulf %397, %396 : vector<1x256xf32>
    %399 = arith.addf %394, %398 : vector<1x256xf32>
    %400 = arith.addf %390, %399 : vector<1x256xf32>
    %c46 = arith.constant 46 : index
    %401 = memref.load %arg5[%c46] : memref<98xf32, #tpu.memory_space<smem>>
    %402 = vector.extract_strided_slice %40 {offsets = [0, 100], sizes = [1, 256], strides = [1, 1]} : vector<1x358xf32> to vector<1x256xf32>
    %403 = vector.broadcast %401 : f32 to vector<1x256xf32>
    %404 = arith.mulf %403, %402 : vector<1x256xf32>
    %c95 = arith.constant 95 : index
    %405 = memref.load %arg5[%c95] : memref<98xf32, #tpu.memory_space<smem>>
    %406 = vector.extract_strided_slice %41 {offsets = [0, 100], sizes = [1, 256], strides = [1, 1]} : vector<1x358xf32> to vector<1x256xf32>
    %407 = vector.broadcast %405 : f32 to vector<1x256xf32>
    %408 = arith.mulf %407, %406 : vector<1x256xf32>
    %409 = arith.addf %404, %408 : vector<1x256xf32>
    %410 = arith.addf %400, %409 : vector<1x256xf32>
    %411 = vector.extract_strided_slice %42 {offsets = [4, 0], sizes = [1, 256], strides = [1, 1]} : vector<7x256xf32> to vector<1x256xf32>
    %412 = arith.mulf %411, %410 : vector<1x256xf32>
    %413 = arith.addf %339, %412 : vector<1x256xf32>
    %cst_27 = arith.constant 0.000000e+00 : f32
    %414 = vector.broadcast %cst_27 : f32 to vector<1x256xf32>
    %c5 = arith.constant 5 : index
    %415 = memref.load %arg5[%c5] : memref<98xf32, #tpu.memory_space<smem>>
    %416 = vector.extract_strided_slice %40 {offsets = [0, 5], sizes = [1, 256], strides = [1, 1]} : vector<1x358xf32> to vector<1x256xf32>
    %417 = vector.broadcast %415 : f32 to vector<1x256xf32>
    %418 = arith.mulf %417, %416 : vector<1x256xf32>
    %c54 = arith.constant 54 : index
    %419 = memref.load %arg5[%c54] : memref<98xf32, #tpu.memory_space<smem>>
    %420 = vector.extract_strided_slice %41 {offsets = [0, 5], sizes = [1, 256], strides = [1, 1]} : vector<1x358xf32> to vector<1x256xf32>
    %421 = vector.broadcast %419 : f32 to vector<1x256xf32>
    %422 = arith.mulf %421, %420 : vector<1x256xf32>
    %423 = arith.addf %418, %422 : vector<1x256xf32>
    %424 = arith.addf %414, %423 : vector<1x256xf32>
    %c12 = arith.constant 12 : index
    %425 = memref.load %arg5[%c12] : memref<98xf32, #tpu.memory_space<smem>>
    %426 = vector.extract_strided_slice %40 {offsets = [0, 21], sizes = [1, 256], strides = [1, 1]} : vector<1x358xf32> to vector<1x256xf32>
    %427 = vector.broadcast %425 : f32 to vector<1x256xf32>
    %428 = arith.mulf %427, %426 : vector<1x256xf32>
    %c61 = arith.constant 61 : index
    %429 = memref.load %arg5[%c61] : memref<98xf32, #tpu.memory_space<smem>>
    %430 = vector.extract_strided_slice %41 {offsets = [0, 21], sizes = [1, 256], strides = [1, 1]} : vector<1x358xf32> to vector<1x256xf32>
    %431 = vector.broadcast %429 : f32 to vector<1x256xf32>
    %432 = arith.mulf %431, %430 : vector<1x256xf32>
    %433 = arith.addf %428, %432 : vector<1x256xf32>
    %434 = arith.addf %424, %433 : vector<1x256xf32>
    %c19 = arith.constant 19 : index
    %435 = memref.load %arg5[%c19] : memref<98xf32, #tpu.memory_space<smem>>
    %436 = vector.extract_strided_slice %40 {offsets = [0, 37], sizes = [1, 256], strides = [1, 1]} : vector<1x358xf32> to vector<1x256xf32>
    %437 = vector.broadcast %435 : f32 to vector<1x256xf32>
    %438 = arith.mulf %437, %436 : vector<1x256xf32>
    %c68 = arith.constant 68 : index
    %439 = memref.load %arg5[%c68] : memref<98xf32, #tpu.memory_space<smem>>
    %440 = vector.extract_strided_slice %41 {offsets = [0, 37], sizes = [1, 256], strides = [1, 1]} : vector<1x358xf32> to vector<1x256xf32>
    %441 = vector.broadcast %439 : f32 to vector<1x256xf32>
    %442 = arith.mulf %441, %440 : vector<1x256xf32>
    %443 = arith.addf %438, %442 : vector<1x256xf32>
    %444 = arith.addf %434, %443 : vector<1x256xf32>
    %c26 = arith.constant 26 : index
    %445 = memref.load %arg5[%c26] : memref<98xf32, #tpu.memory_space<smem>>
    %446 = vector.extract_strided_slice %40 {offsets = [0, 53], sizes = [1, 256], strides = [1, 1]} : vector<1x358xf32> to vector<1x256xf32>
    %447 = vector.broadcast %445 : f32 to vector<1x256xf32>
    %448 = arith.mulf %447, %446 : vector<1x256xf32>
    %c75 = arith.constant 75 : index
    %449 = memref.load %arg5[%c75] : memref<98xf32, #tpu.memory_space<smem>>
    %450 = vector.extract_strided_slice %41 {offsets = [0, 53], sizes = [1, 256], strides = [1, 1]} : vector<1x358xf32> to vector<1x256xf32>
    %451 = vector.broadcast %449 : f32 to vector<1x256xf32>
    %452 = arith.mulf %451, %450 : vector<1x256xf32>
    %453 = arith.addf %448, %452 : vector<1x256xf32>
    %454 = arith.addf %444, %453 : vector<1x256xf32>
    %c33 = arith.constant 33 : index
    %455 = memref.load %arg5[%c33] : memref<98xf32, #tpu.memory_space<smem>>
    %456 = vector.extract_strided_slice %40 {offsets = [0, 69], sizes = [1, 256], strides = [1, 1]} : vector<1x358xf32> to vector<1x256xf32>
    %457 = vector.broadcast %455 : f32 to vector<1x256xf32>
    %458 = arith.mulf %457, %456 : vector<1x256xf32>
    %c82 = arith.constant 82 : index
    %459 = memref.load %arg5[%c82] : memref<98xf32, #tpu.memory_space<smem>>
    %460 = vector.extract_strided_slice %41 {offsets = [0, 69], sizes = [1, 256], strides = [1, 1]} : vector<1x358xf32> to vector<1x256xf32>
    %461 = vector.broadcast %459 : f32 to vector<1x256xf32>
    %462 = arith.mulf %461, %460 : vector<1x256xf32>
    %463 = arith.addf %458, %462 : vector<1x256xf32>
    %464 = arith.addf %454, %463 : vector<1x256xf32>
    %c40 = arith.constant 40 : index
    %465 = memref.load %arg5[%c40] : memref<98xf32, #tpu.memory_space<smem>>
    %466 = vector.extract_strided_slice %40 {offsets = [0, 85], sizes = [1, 256], strides = [1, 1]} : vector<1x358xf32> to vector<1x256xf32>
    %467 = vector.broadcast %465 : f32 to vector<1x256xf32>
    %468 = arith.mulf %467, %466 : vector<1x256xf32>
    %c89 = arith.constant 89 : index
    %469 = memref.load %arg5[%c89] : memref<98xf32, #tpu.memory_space<smem>>
    %470 = vector.extract_strided_slice %41 {offsets = [0, 85], sizes = [1, 256], strides = [1, 1]} : vector<1x358xf32> to vector<1x256xf32>
    %471 = vector.broadcast %469 : f32 to vector<1x256xf32>
    %472 = arith.mulf %471, %470 : vector<1x256xf32>
    %473 = arith.addf %468, %472 : vector<1x256xf32>
    %474 = arith.addf %464, %473 : vector<1x256xf32>
    %c47 = arith.constant 47 : index
    %475 = memref.load %arg5[%c47] : memref<98xf32, #tpu.memory_space<smem>>
    %476 = vector.extract_strided_slice %40 {offsets = [0, 101], sizes = [1, 256], strides = [1, 1]} : vector<1x358xf32> to vector<1x256xf32>
    %477 = vector.broadcast %475 : f32 to vector<1x256xf32>
    %478 = arith.mulf %477, %476 : vector<1x256xf32>
    %c96 = arith.constant 96 : index
    %479 = memref.load %arg5[%c96] : memref<98xf32, #tpu.memory_space<smem>>
    %480 = vector.extract_strided_slice %41 {offsets = [0, 101], sizes = [1, 256], strides = [1, 1]} : vector<1x358xf32> to vector<1x256xf32>
    %481 = vector.broadcast %479 : f32 to vector<1x256xf32>
    %482 = arith.mulf %481, %480 : vector<1x256xf32>
    %483 = arith.addf %478, %482 : vector<1x256xf32>
    %484 = arith.addf %474, %483 : vector<1x256xf32>
    %485 = vector.extract_strided_slice %42 {offsets = [5, 0], sizes = [1, 256], strides = [1, 1]} : vector<7x256xf32> to vector<1x256xf32>
    %486 = arith.mulf %485, %484 : vector<1x256xf32>
    %487 = arith.addf %413, %486 : vector<1x256xf32>
    %cst_28 = arith.constant 0.000000e+00 : f32
    %488 = vector.broadcast %cst_28 : f32 to vector<1x256xf32>
    %c6 = arith.constant 6 : index
    %489 = memref.load %arg5[%c6] : memref<98xf32, #tpu.memory_space<smem>>
    %490 = vector.extract_strided_slice %40 {offsets = [0, 6], sizes = [1, 256], strides = [1, 1]} : vector<1x358xf32> to vector<1x256xf32>
    %491 = vector.broadcast %489 : f32 to vector<1x256xf32>
    %492 = arith.mulf %491, %490 : vector<1x256xf32>
    %c55 = arith.constant 55 : index
    %493 = memref.load %arg5[%c55] : memref<98xf32, #tpu.memory_space<smem>>
    %494 = vector.extract_strided_slice %41 {offsets = [0, 6], sizes = [1, 256], strides = [1, 1]} : vector<1x358xf32> to vector<1x256xf32>
    %495 = vector.broadcast %493 : f32 to vector<1x256xf32>
    %496 = arith.mulf %495, %494 : vector<1x256xf32>
    %497 = arith.addf %492, %496 : vector<1x256xf32>
    %498 = arith.addf %488, %497 : vector<1x256xf32>
    %c13 = arith.constant 13 : index
    %499 = memref.load %arg5[%c13] : memref<98xf32, #tpu.memory_space<smem>>
    %500 = vector.extract_strided_slice %40 {offsets = [0, 22], sizes = [1, 256], strides = [1, 1]} : vector<1x358xf32> to vector<1x256xf32>
    %501 = vector.broadcast %499 : f32 to vector<1x256xf32>
    %502 = arith.mulf %501, %500 : vector<1x256xf32>
    %c62 = arith.constant 62 : index
    %503 = memref.load %arg5[%c62] : memref<98xf32, #tpu.memory_space<smem>>
    %504 = vector.extract_strided_slice %41 {offsets = [0, 22], sizes = [1, 256], strides = [1, 1]} : vector<1x358xf32> to vector<1x256xf32>
    %505 = vector.broadcast %503 : f32 to vector<1x256xf32>
    %506 = arith.mulf %505, %504 : vector<1x256xf32>
    %507 = arith.addf %502, %506 : vector<1x256xf32>
    %508 = arith.addf %498, %507 : vector<1x256xf32>
    %c20 = arith.constant 20 : index
    %509 = memref.load %arg5[%c20] : memref<98xf32, #tpu.memory_space<smem>>
    %510 = vector.extract_strided_slice %40 {offsets = [0, 38], sizes = [1, 256], strides = [1, 1]} : vector<1x358xf32> to vector<1x256xf32>
    %511 = vector.broadcast %509 : f32 to vector<1x256xf32>
    %512 = arith.mulf %511, %510 : vector<1x256xf32>
    %c69 = arith.constant 69 : index
    %513 = memref.load %arg5[%c69] : memref<98xf32, #tpu.memory_space<smem>>
    %514 = vector.extract_strided_slice %41 {offsets = [0, 38], sizes = [1, 256], strides = [1, 1]} : vector<1x358xf32> to vector<1x256xf32>
    %515 = vector.broadcast %513 : f32 to vector<1x256xf32>
    %516 = arith.mulf %515, %514 : vector<1x256xf32>
    %517 = arith.addf %512, %516 : vector<1x256xf32>
    %518 = arith.addf %508, %517 : vector<1x256xf32>
    %c27 = arith.constant 27 : index
    %519 = memref.load %arg5[%c27] : memref<98xf32, #tpu.memory_space<smem>>
    %520 = vector.extract_strided_slice %40 {offsets = [0, 54], sizes = [1, 256], strides = [1, 1]} : vector<1x358xf32> to vector<1x256xf32>
    %521 = vector.broadcast %519 : f32 to vector<1x256xf32>
    %522 = arith.mulf %521, %520 : vector<1x256xf32>
    %c76 = arith.constant 76 : index
    %523 = memref.load %arg5[%c76] : memref<98xf32, #tpu.memory_space<smem>>
    %524 = vector.extract_strided_slice %41 {offsets = [0, 54], sizes = [1, 256], strides = [1, 1]} : vector<1x358xf32> to vector<1x256xf32>
    %525 = vector.broadcast %523 : f32 to vector<1x256xf32>
    %526 = arith.mulf %525, %524 : vector<1x256xf32>
    %527 = arith.addf %522, %526 : vector<1x256xf32>
    %528 = arith.addf %518, %527 : vector<1x256xf32>
    %c34 = arith.constant 34 : index
    %529 = memref.load %arg5[%c34] : memref<98xf32, #tpu.memory_space<smem>>
    %530 = vector.extract_strided_slice %40 {offsets = [0, 70], sizes = [1, 256], strides = [1, 1]} : vector<1x358xf32> to vector<1x256xf32>
    %531 = vector.broadcast %529 : f32 to vector<1x256xf32>
    %532 = arith.mulf %531, %530 : vector<1x256xf32>
    %c83 = arith.constant 83 : index
    %533 = memref.load %arg5[%c83] : memref<98xf32, #tpu.memory_space<smem>>
    %534 = vector.extract_strided_slice %41 {offsets = [0, 70], sizes = [1, 256], strides = [1, 1]} : vector<1x358xf32> to vector<1x256xf32>
    %535 = vector.broadcast %533 : f32 to vector<1x256xf32>
    %536 = arith.mulf %535, %534 : vector<1x256xf32>
    %537 = arith.addf %532, %536 : vector<1x256xf32>
    %538 = arith.addf %528, %537 : vector<1x256xf32>
    %c41 = arith.constant 41 : index
    %539 = memref.load %arg5[%c41] : memref<98xf32, #tpu.memory_space<smem>>
    %540 = vector.extract_strided_slice %40 {offsets = [0, 86], sizes = [1, 256], strides = [1, 1]} : vector<1x358xf32> to vector<1x256xf32>
    %541 = vector.broadcast %539 : f32 to vector<1x256xf32>
    %542 = arith.mulf %541, %540 : vector<1x256xf32>
    %c90 = arith.constant 90 : index
    %543 = memref.load %arg5[%c90] : memref<98xf32, #tpu.memory_space<smem>>
    %544 = vector.extract_strided_slice %41 {offsets = [0, 86], sizes = [1, 256], strides = [1, 1]} : vector<1x358xf32> to vector<1x256xf32>
    %545 = vector.broadcast %543 : f32 to vector<1x256xf32>
    %546 = arith.mulf %545, %544 : vector<1x256xf32>
    %547 = arith.addf %542, %546 : vector<1x256xf32>
    %548 = arith.addf %538, %547 : vector<1x256xf32>
    %c48 = arith.constant 48 : index
    %549 = memref.load %arg5[%c48] : memref<98xf32, #tpu.memory_space<smem>>
    %550 = vector.extract_strided_slice %40 {offsets = [0, 102], sizes = [1, 256], strides = [1, 1]} : vector<1x358xf32> to vector<1x256xf32>
    %551 = vector.broadcast %549 : f32 to vector<1x256xf32>
    %552 = arith.mulf %551, %550 : vector<1x256xf32>
    %c97 = arith.constant 97 : index
    %553 = memref.load %arg5[%c97] : memref<98xf32, #tpu.memory_space<smem>>
    %554 = vector.extract_strided_slice %41 {offsets = [0, 102], sizes = [1, 256], strides = [1, 1]} : vector<1x358xf32> to vector<1x256xf32>
    %555 = vector.broadcast %553 : f32 to vector<1x256xf32>
    %556 = arith.mulf %555, %554 : vector<1x256xf32>
    %557 = arith.addf %552, %556 : vector<1x256xf32>
    %558 = arith.addf %548, %557 : vector<1x256xf32>
    %559 = vector.extract_strided_slice %42 {offsets = [6, 0], sizes = [1, 256], strides = [1, 1]} : vector<7x256xf32> to vector<1x256xf32>
    %560 = arith.mulf %559, %558 : vector<1x256xf32>
    %561 = arith.addf %487, %560 : vector<1x256xf32>
    %562 = arith.negf %561 : vector<1x256xf32>
    %563 = math.exp %562 : vector<1x256xf32>
    %cst_29 = arith.constant 1.000000e+00 : f32
    %564 = vector.broadcast %cst_29 : f32 to vector<1x256xf32>
    %565 = arith.addf %564, %563 : vector<1x256xf32>
    %566 = arith.divf %564, %565 : vector<1x256xf32>
    %567 = vector.shape_cast %566 : vector<1x256xf32> to vector<1x1x256xf32>
    %568 = vector.broadcast %567 : vector<1x1x256xf32> to vector<1x32x256xf32>
    %569 = arith.mulf %34, %568 : vector<1x32x256xf32>
    %c0_30 = arith.constant 0 : index
    %c0_31 = arith.constant 0 : index
    %c0_32 = arith.constant 0 : index
    %570 = vector.load %arg6[%c0_30, %c0_31, %c0_32] : memref<1x32x256xf32, #tpu.memory_space<vmem>>, vector<1x32x256xf32>
    tpu.vector_store %arg6[%c0_30, %c0_31, %c0_32], %569 {strides = array<i32>} : memref<1x32x256xf32, #tpu.memory_space<vmem>>, vector<1x32x256xf32>,
    return
  }
  func.func @transform_0(%arg0: i32) -> (i32, i32, i32) {
    %c0_i32 = arith.constant 0 : i32
    %c0_i32_0 = arith.constant 0 : i32
    %c0_i32_1 = arith.constant 0 : i32
    return %arg0, %c0_i32, %c0_i32_0 : i32, i32, i32
  }
  func.func @transform_1(%arg0: i32) -> (i32, i32) {
    %c0_i32 = arith.constant 0 : i32
    %c0_i32_0 = arith.constant 0 : i32
    %c0_i32_1 = arith.constant 0 : i32
    return %c0_i32, %c0_i32_0 : i32, i32
  }
  func.func @transform_2(%arg0: i32) -> (i32, i32) {
    %c0_i32 = arith.constant 0 : i32
    %c0_i32_0 = arith.constant 0 : i32
    %c0_i32_1 = arith.constant 0 : i32
    return %c0_i32, %c0_i32_0 : i32, i32
  }
  func.func @transform_3(%arg0: i32) -> (i32, i32) {
    %c0_i32 = arith.constant 0 : i32
    %c0_i32_0 = arith.constant 0 : i32
    %c0_i32_1 = arith.constant 0 : i32
    return %c0_i32, %c0_i32_0 : i32, i32
  }
  func.func @transform_4(%arg0: i32) -> i32 {
    %c0_i32 = arith.constant 0 : i32
    %c0_i32_0 = arith.constant 0 : i32
    return %c0_i32 : i32
  }
  func.func @transform_5(%arg0: i32) -> (i32, i32, i32) {
    %c0_i32 = arith.constant 0 : i32
    %c0_i32_0 = arith.constant 0 : i32
    %c0_i32_1 = arith.constant 0 : i32
    return %arg0, %c0_i32, %c0_i32_0 : i32, i32, i32
  }
}

</mosaic_0001>

<bundles_post_ra>
// kernel: tile.9
= control target key start
LH: loop header
LB: loop body
LE: loop exit
PB: predicated region body
PF: predicated region fallthrough
CT: control target
= control target key end

     0   :  { %vm34_vm0 = vcmask 1043458   ;;  %s95_s6 = smov 3  ;;  %vm19_vm1 = vcmask 1045508   ;;  %s98_s9 = smov 12  ;;  %vm44_vm2 = vcmask 1047558   ;;  %vm4_vm3 = vcmask 1047556   ;;  %s696_s0 = inlined_call_operand.vmem [shape: f32[7,16,16], index: 0, kind: input, shape index: {}]   ;;  %s697_s1 = inlined_call_operand.vmem [shape: f32[7,256], index: 1, kind: output, shape index: {}]  }
   0x1   :  { %v344_v0 = vld [vmem:[%s696_s0 + $0x1e] ss:$16 sm:%s95_s6]   ;;  %s103_s10 = smov 48  ;;  %s53_s15 = smov 3  ;;  %vm6_vm4 = vcmask 130048   ;;  %vm48_vm5 = vcmask 1048448  }
   0x2   :  { %v345_v1 = vld [vmem:[%s696_s0 + $0x1e] ss:$16 sm:%s98_s9]   ;;  %v335_v4 = vld [vmem:[%s696_s0 + $0x1f] ss:$16 sm:%s53_s15]   ;;  %s56_s18 = smov 12  ;;  %s61_s19 = smov 48 }
   0x3   :  { %v346_v2 = vld [vmem:[%s696_s0 + $0x1e] ss:$16 sm:%s103_s10]   ;;  %v101_v3 = vsel %vm34_vm0, %v345_v1, %v344_v0  ;;  %v336_v6 = vld [vmem:[%s696_s0 + $0x1f] ss:$16 sm:%s56_s18]   ;;  %s71_s24 = smov 3  ;;  %s74_s25 = smov 12 }
   0x4   :  { %v106_v5 = vsel %vm19_vm1, %v346_v2, %v101_v3  ;;  %v337_v7 = vld [vmem:[%s696_s0 + $0x1f] ss:$16 sm:%s61_s19]   ;;  %s400_s26 = smov 96   ;;  %v59_v8 = vsel %vm34_vm0, %v336_v6, %v335_v4  ;;  %v339_v9 = vld [vmem:[%s696_s0 + $0x6] ss:$16 sm:%s71_s24]   ;;  %s79_s29 = smov 48 }
   0x5   :  { %107 = vrot.lane.b32.xlu1 %v106_v5, %s400_s26  ;;  %s84_s30 = smov 192  ;;  %v64_v10 = vsel %vm19_vm1, %v337_v7, %v59_v8  ;;  %v340_v11 = vld [vmem:[%s696_s0 + $0x6] ss:$16 sm:%s74_s25]   ;;  %s29_s6 = smov 3  ;;  %vm90_vm6 = vcmask 917248   ;;  %vm132_vm7 = vcmask 786048  }
   0x6   :  { %v341_v12 = vld [vmem:[%s696_s0 + $0x6] ss:$16 sm:%s79_s29]   ;;  %s32_s7 = smov 12  ;;  %s401_s8 = smov 112   ;;  %v77_v13 = vsel %vm34_vm0, %v340_v11, %v339_v9  ;;  %v330_v16 = vld [vmem:[%s696_s0 + $0x7] ss:$16 sm:%s29_s6]  }
   0x7   :  { %65 = vrot.lane.b32.xlu0 %v64_v10, %s401_s8  ;;  %v342_v14 = vld [vmem:[%s696_s0 + $0x276] ss:$-88 sm:%s84_s30]   ;;  %s37_s11 = smov 48  ;;  %s42_s12 = smov 192  ;;  %v82_v15 = vsel %vm19_vm1, %v341_v12, %v77_v13  ;;  %vm174_vm8 = vcmask 654848   ;;  %vm216_vm9 = vcmask 523648  }
   0x8   :  { %v331_v17 = vld [vmem:[%s696_s0 + $0x7] ss:$16 sm:%s32_s7]   ;;  %s137_s17 = smov 3  ;;  %v87_v18 = vsel %vm44_vm2, %v342_v14, %v82_v15  ;;  %s140_s22 = smov 12  ;;  %vm258_vm10 = vcmask 392448   ;;  %vm300_vm11 = vcmask 261248  }
   0x9   :  { %v35_v19 = vsel %vm34_vm0, %v331_v17, %v330_v16  ;;  %v332_v20 = vld [vmem:[%s696_s0 + $0x7] ss:$16 sm:%s37_s11]   ;;  %s145_s23 = smov 48  ;;  %88 = vrot.lane.b32.xlu1 %v87_v18, %s400_s26  ;;  %s113_s26 = smov 3 }
   0xa   :  { %v333_v21 = vld [vmem:[%s696_s0 + $0x277] ss:$-88 sm:%s42_s12]   ;;  %v40_v22 = vsel %vm19_vm1, %v332_v20, %v35_v19  ;;  %v353_v23 = vld [vmem:[%s696_s0 + $0x1d] ss:$16 sm:%s137_s17]   ;;  %s116_s27 = smov 12  ;;  %s121_s3 = smov 48 }
   0xb   :  { %v45_v24 = vsel %vm44_vm2, %v333_v21, %v40_v22  ;;  %v354_v25 = vld [vmem:[%s696_s0 + $0x1d] ss:$16 sm:%s140_s22]   ;;  %s126_s4 = smov 192  ;;  %v348_v28 = vld [vmem:[%s696_s0 + $0x5] ss:$16 sm:%s113_s26]   ;;  %s179_s7 = smov 3 }
   0xc   :  { %v355_v26 = vld [vmem:[%s696_s0 + $0x1d] ss:$16 sm:%s145_s23]   ;;  %46 = vrot.lane.b32.xlu0 %v45_v24, %s401_s8  ;;  %v143_v27 = vsel %vm34_vm0, %v354_v25, %v353_v23  ;;  %s182_s12 = smov 12  ;;  %s187_s13 = smov 48 }
   0xd   :  { %v148_v29 = vsel %vm19_vm1, %v355_v26, %v143_v27  ;;  %v349_v30 = vld [vmem:[%s696_s0 + $0x5] ss:$16 sm:%s116_s27]   ;;  %s402_s14 = smov 80   ;;  %s155_s17 = smov 3  ;;  %v362_v35 = vld [vmem:[%s696_s0 + $0x1c] ss:$16 sm:%s179_s7]  }
   0xe   :  { %v350_v31 = vld [vmem:[%s696_s0 + $0x5] ss:$16 sm:%s121_s3]   ;;  %149 = vrot.lane.b32.xlu1 %v148_v29, %s402_s14  ;;  %v119_v32 = vsel %vm34_vm0, %v349_v30, %v348_v28  ;;  %s158_s18 = smov 12  ;;  %s163_s23 = smov 48 }
   0xf   :  { %v351_v33 = vld [vmem:[%s696_s0 + $0x275] ss:$-88 sm:%s126_s4]   ;;  %v124_v34 = vsel %vm19_vm1, %v350_v31, %v119_v32  ;;  %v363_v36 = vld [vmem:[%s696_s0 + $0x1c] ss:$16 sm:%s182_s12]   ;;  %s168_s28 = smov 192  ;;  %s221_s29 = smov 3 }
  0x10   :  { %v129_v37 = vsel %vm44_vm2, %v351_v33, %v124_v34  ;;  %v185_v38 = vsel %vm34_vm0, %v363_v36, %v362_v35  ;;  %v364_v39 = vld [vmem:[%s696_s0 + $0x1c] ss:$16 sm:%s187_s13]   ;;  %v357_v40 = vld [vmem:[%s696_s0 + $0x4] ss:$16 sm:%s155_s17]   ;;  %s224_s3 = smov 12  ;;  %s229_s4 = smov 48 }
  0x11   :  { %130 = vrot.lane.b32.xlu0 %v129_v37, %s402_s14  ;;  %v190_v41 = vsel %vm19_vm1, %v364_v39, %v185_v38  ;;  %v358_v42 = vld [vmem:[%s696_s0 + $0x4] ss:$16 sm:%s158_s18]   ;;  %s403_s5 = smov 64   ;;  %s197_s8 = smov 3 }
  0x12   :  { %191 = vrot.lane.b32.xlu1 %v190_v41, %s403_s5  ;;  %v161_v43 = vsel %vm34_vm0, %v358_v42, %v357_v40  ;;  %v359_v44 = vld [vmem:[%s696_s0 + $0x4] ss:$16 sm:%s163_s23]   ;;  %s200_s13 = smov 12  ;;  %s205_s14 = smov 48 }
  0x13   :  { %v166_v45 = vsel %vm19_vm1, %v359_v44, %v161_v43  ;;  %v360_v46 = vld [vmem:[%s696_s0 + $0x274] ss:$-88 sm:%s168_s28]   ;;  %v371_v47 = vld [vmem:[%s696_s0 + $0x1b] ss:$16 sm:%s221_s29]   ;;  %s210_s19 = smov 192  ;;  %s263_s22 = smov 3 }
  0x14   :  { %v171_v48 = vsel %vm44_vm2, %v360_v46, %v166_v45  ;;  %v372_v49 = vld [vmem:[%s696_s0 + $0x1b] ss:$16 sm:%s224_s3]   ;;  %v366_v52 = vld [vmem:[%s696_s0 + $0x3] ss:$16 sm:%s197_s8]   ;;  %s266_s23 = smov 12  ;;  %s271_s28 = smov 48 }
  0x15   :  { %v373_v50 = vld [vmem:[%s696_s0 + $0x1b] ss:$16 sm:%s229_s4]   ;;  %172 = vrot.lane.b32.xlu0 %v171_v48, %s403_s5  ;;  %v227_v51 = vsel %vm34_vm0, %v372_v49, %v371_v47  ;;  %s239_s29 = smov 3  ;;  %s404_s30 = smov 48  }
  0x16   :  { %v232_v53 = vsel %vm19_vm1, %v373_v50, %v227_v51  ;;  %v367_v54 = vld [vmem:[%s696_s0 + $0x3] ss:$16 sm:%s200_s13]   ;;  %s242_s4 = smov 12  ;;  %v380_v59 = vld [vmem:[%s696_s0 + $0x1a] ss:$16 sm:%s263_s22]   ;;  %s247_s9 = smov 48 }
  0x17   :  { %v368_v55 = vld [vmem:[%s696_s0 + $0x3] ss:$16 sm:%s205_s14]   ;;  %233 = vrot.lane.b32.xlu1 %v232_v53, %s404_s30  ;;  %v203_v56 = vsel %vm34_vm0, %v367_v54, %v366_v52  ;;  %s252_s14 = smov 192  ;;  %s305_s15 = smov 3 }
  0x18   :  { %v369_v57 = vld [vmem:[%s696_s0 + $0x273] ss:$-88 sm:%s210_s19]   ;;  %v208_v58 = vsel %vm19_vm1, %v368_v55, %v203_v56  ;;  %v381_v60 = vld [vmem:[%s696_s0 + $0x1a] ss:$16 sm:%s266_s23]   ;;  %s308_s18 = smov 12  ;;  %s313_s19 = smov 48 }
  0x19   :  { %v213_v61 = vsel %vm44_vm2, %v369_v57, %v208_v58  ;;  %v269_v62 = vsel %vm34_vm0, %v381_v60, %v380_v59  ;;  %v382_v63 = vld [vmem:[%s696_s0 + $0x1a] ss:$16 sm:%s271_s28]   ;;  %v375_v0 = vld [vmem:[%s696_s0 + $0x2] ss:$16 sm:%s239_s29]   ;;  %s405_s20 = smov 32   ;;  %s281_s23 = smov 3 }
  0x1a   :  { %214 = vrot.lane.b32.xlu0 %v213_v61, %s404_s30  ;;  %v274_v1 = vsel %vm19_vm1, %v382_v63, %v269_v62  ;;  %v376_v2 = vld [vmem:[%s696_s0 + $0x2] ss:$16 sm:%s242_s4]   ;;  %s284_s28 = smov 12  ;;  %s289_s29 = smov 48 }
  0x1b   :  { %275 = vrot.lane.b32.xlu1 %v274_v1, %s405_s20  ;;  %v245_v3 = vsel %vm34_vm0, %v376_v2, %v375_v0  ;;  %v377_v4 = vld [vmem:[%s696_s0 + $0x2] ss:$16 sm:%s247_s9]   ;;  %s294_s5 = smov 192  ;;  %s17_s8 = smov 48 }
  0x1c   :  { %v250_v5 = vsel %vm19_vm1, %v377_v4, %v245_v3  ;;  %v378_v6 = vld [vmem:[%s696_s0 + $0x272] ss:$-88 sm:%s252_s14]   ;;  %v389_v7 = vld [vmem:[%s696_s0 + $0x19] ss:$16 sm:%s305_s15]   ;;  %s406_s15 = smov 16  }
  0x1d   :  { %v255_v8 = vsel %vm44_vm2, %v378_v6, %v250_v5  ;;  %v390_v9 = vld [vmem:[%s696_s0 + $0x19] ss:$16 sm:%s308_s18]   ;;  %v384_v12 = vld [vmem:[%s696_s0 + $0x1] ss:$16 sm:%s281_s23]  }
  0x1e   :  { %v391_v10 = vld [vmem:[%s696_s0 + $0x19] ss:$16 sm:%s313_s19]   ;;  %256 = vrot.lane.b32.xlu0 %v255_v8, %s405_s20  ;;  %v311_v11 = vsel %vm34_vm0, %v390_v9, %v389_v7  ;;  %v325_v13 = vld [vmem:[%s696_s0 + $0x40] ss:$8 sm:$0xf]  }
  0x1f   :  { %v316_v14 = vsel %vm19_vm1, %v391_v10, %v311_v11  ;;  %v385_v15 = vld [vmem:[%s696_s0 + $0x1] ss:$16 sm:%s284_s28]   ;;  %v2_v19 = vld [vmem:[%s696_s0] ss:$8 sm:$0xf]  }
  0x20   :  { %v386_v16 = vld [vmem:[%s696_s0 + $0x1] ss:$16 sm:%s289_s29]   ;;  %317 = vrot.lane.b32.xlu1 %v316_v14, %s406_s15  ;;  %v287_v17 = vsel %vm34_vm0, %v385_v15, %v384_v12  ;;  %v3_v22 = vld [vmem:[%s696_s0] ss:$8 sm:$0xf0]  }
  0x21   :  { %v387_v18 = vld [vmem:[%s696_s0 + $0x271] ss:$-88 sm:%s294_s5]   ;;  %v292_v20 = vsel %vm19_vm1, %v386_v16, %v287_v17  ;;  %v326_v21 = vld [vmem:[%s696_s0 + $0x40] ss:$8 sm:%s17_s8]   ;;  %v5_v25 = vsel %vm4_vm3, %v3_v22, %v2_v19 }
  0x22   :  { %v297_v23 = vsel %vm44_vm2, %v387_v18, %v292_v20  ;;  %v20_v24 = vsel %vm19_vm1, %v326_v21, %v325_v13  ;;  %7 = vst.msk [vmem:[%s697_s1] ss:$8 sm:$0x3] %vm6_vm4, %v5_v25   ;;  %322 = vst.msk [vmem:[%s697_s1 - $0xf] ss:$8 sm:$0xc] %vm6_vm4, %v5_v25  }
  0x23   :  { %298 = vrot.lane.b32.xlu0 %v297_v23, %s406_s15  ;;  %327 = vst.msk [vmem:[%s697_s1 + $0x4] ss:$8 sm:$0x3] %vm6_vm4, %v20_v24   ;;  %328 = vst.msk [vmem:[%s697_s1 - $0xb] ss:$8 sm:$0xc] %vm6_vm4, %v20_v24  }
  0x24   :  { %329 = vst.msk [vmem:[%s697_s1 - $0x1a] ss:$8 sm:$0x30] %vm6_vm4, %v20_v24   ;;  %323 = vst.msk [vmem:[%s697_s1 - $0x1e] ss:$8 sm:$0x30] %vm6_vm4, %v5_v25  }
  0x25   :  { %324 = vst.msk [vmem:[%s697_s1 - $0x2d] ss:$8 sm:$0xc0] %vm6_vm4, %v5_v25  }
  0x77   :  { %v108_v26 = vpop.permute.xlu1 %107  }
  0x79   :  { %v66_v27 = vpop.permute.xlu0 %65  }
  0x7a   :  { %338 = vst.msk [vmem:[%s697_s1 + $0x9] sm:$0x3f] %vm48_vm5, %v66_v27  }
  0x7b   :  { %347 = vst.msk [vmem:[%s697_s1 + $0x9] sm:$0x3f] %vm90_vm6, %v108_v26   ;;  %v89_v28 = vpop.permute.xlu1 %88  }
  0x7e   :  { %v47_v29 = vpop.permute.xlu0 %46  }
  0x7f   :  { %334 = vst.msk [vmem:[%s697_s1 + $0x1] sm:$0x80] %vm48_vm5, %v47_v29   ;;  %49 = vst.msk [vmem:[%s697_s1] sm:$0x7f] %vm48_vm5, %v47_v29  }
  0x80   :  { %343 = vst.msk [vmem:[%s697_s1 + $0x1] sm:$0x80] %vm90_vm6, %v89_v28   ;;  %v150_v30 = vpop.permute.xlu1 %149   ;;  %91 = vst.msk [vmem:[%s697_s1] sm:$0x7f] %vm90_vm6, %v89_v28  }
  0x81   :  { %356 = vst.msk [vmem:[%s697_s1 + $0x9] sm:$0x3f] %vm132_vm7, %v150_v30  }
  0x83   :  { %v131_v31 = vpop.permute.xlu0 %130  }
  0x84   :  { %133 = vst.msk [vmem:[%s697_s1] sm:$0x7f] %vm132_vm7, %v131_v31   ;;  %352 = vst.msk [vmem:[%s697_s1 + $0x1] sm:$0x80] %vm132_vm7, %v131_v31   ;;  %v192_v32 = vpop.permute.xlu1 %191  }
  0x85   :  { %365 = vst.msk [vmem:[%s697_s1 + $0x9] sm:$0x3f] %vm174_vm8, %v192_v32  }
  0x87   :  { %v173_v33 = vpop.permute.xlu0 %172  }
  0x88   :  { %175 = vst.msk [vmem:[%s697_s1] sm:$0x7f] %vm174_vm8, %v173_v33   ;;  %361 = vst.msk [vmem:[%s697_s1 + $0x1] sm:$0x80] %vm174_vm8, %v173_v33  }
  0x89   :  { %v234_v34 = vpop.permute.xlu1 %233  }
  0x8a   :  { %374 = vst.msk [vmem:[%s697_s1 + $0x9] sm:$0x3f] %vm216_vm9, %v234_v34  }
  0x8c   :  { %v215_v35 = vpop.permute.xlu0 %214  }
  0x8d   :  { %217 = vst.msk [vmem:[%s697_s1] sm:$0x7f] %vm216_vm9, %v215_v35   ;;  %370 = vst.msk [vmem:[%s697_s1 + $0x1] sm:$0x80] %vm216_vm9, %v215_v35   ;;  %v276_v36 = vpop.permute.xlu1 %275  }
  0x8e   :  { %383 = vst.msk [vmem:[%s697_s1 + $0x9] sm:$0x3f] %vm258_vm10, %v276_v36  }
  0x90   :  { %v257_v37 = vpop.permute.xlu0 %256  }
  0x91   :  { %259 = vst.msk [vmem:[%s697_s1] sm:$0x7f] %vm258_vm10, %v257_v37   ;;  %379 = vst.msk [vmem:[%s697_s1 + $0x1] sm:$0x80] %vm258_vm10, %v257_v37  }
  0x92   :  { %v318_v38 = vpop.permute.xlu1 %317  }
  0x93   :  { %392 = vst.msk [vmem:[%s697_s1 + $0x9] sm:$0x3f] %vm300_vm11, %v318_v38  }
  0x95   :  { %v299_v39 = vpop.permute.xlu0 %298  }
  0x96   :  { %301 = vst.msk [vmem:[%s697_s1] sm:$0x7f] %vm300_vm11, %v299_v39   ;;  %388 = vst.msk [vmem:[%s697_s1 + $0x1] sm:$0x80] %vm300_vm11, %v299_v39  }

// kernel: cbam_pallas.1
= control target key start
LH: loop header
LB: loop body
LE: loop exit
PB: predicated region body
PF: predicated region fallthrough
CT: control target
= control target key end

     0   :  { %10 = vsyncpa [#allocation3], 0  ;;  %s2470_s18 = smov 0   ;;  %s3571_s0 = inlined_call_operand.vmem [shape: f32[2,32,256], index: 0, kind: input, shape index: {}]   ;;  %s3572_s1 = inlined_call_operand.vmem [shape: f32[2,32], index: 1, kind: input, shape index: {}]   ;;  %s3573_s2 = inlined_call_operand.vmem [shape: f32[2,32], index: 2, kind: input, shape index: {}]   ;;  %s3574_s3 = inlined_call_operand.vmem [shape: f32[7,256], index: 3, kind: input, shape index: {}]   ;;  %s3575_s4 = inlined_call_operand.vmem [shape: f32[98], index: 4, kind: input, shape index: {}]   ;;  %s3576_s5 = inlined_call_operand.vmem [shape: f32[2,32,256], index: 5, kind: output, shape index: {}]  }
   0x1 LB: > { %s2236_s19 = sadd.s32 4294967295, %s2423_s18   ;;  %p2238_p0 = scmp.ge.s32.totalorder %s2423_s18, 1  ;;  %s2423_s18 = sphi %s2470_s18, %s16_s18  }
   0x2   : > { %p157_p1 = scmp.lt.s32.totalorder %s2423_s18, 3  ;;  %s179_s22 = sshll.u32 %s3575_s4, 4  ;;  %s180_s22 = int_to_ptr.vmem [resolvable:$true] %s179_s22 }
   0x3   : > { %p2359_p3 = scmp.eq.s32.totalorder %s2236_s19, 0  ;;  %s2398_s24 = scalar_lea.vmem %s180_s22, 16 }
   0x4   : > { %p2481_p2 = pnand %p2238_p0, %p157_p1  ;;  %p2399_p6 = scmp.ne.s32.totalorder %s180_s22, %s2398_s24 }
   0x5   : > { %p2406_p10 = scmp.lt.s32.totalorder %s180_s22, %s180_s22  ;;  %p2407_p11 = scmp.lt.s32.totalorder %s2398_s24, %s2398_s24 }
   0x6   : > { %p2355_p4 = pneg %p2481_p2 }
   0x7   : > { %p2408_p12 = por %p2407_p11, %p2406_p10 }
   0x8   : > { %p2356_p5 = pnand %p2359_p3, %p2355_p4 }
   0xa   : > { %p2400_p7 = pneg %p2356_p5 }
   0xc   : > { %p2401_p8 = pnand %p2400_p7, %p2399_p6 }
   0xe   : > { %p2402_p9 = pneg %p2401_p8 }
  0x10   : > { %p2409_p13 = pnand %p2408_p12, %p2402_p9 }
  0x12   : > { %2412 = shalt.err (!%p2409_p13)
}
  0x13   : > { %s2425_s25 = smov [#allocation2]   ;;  %200 = sbr.rel (%p2481_p2) target bundleno = 1344 (0x540), region = 40 }
  0x14   : > { %2358 = dma.vmem_to_smem (!%p2356_p5), %s180_s22, 16, %s2425_s25, [#allocation3]  }
  0x18   : > { %2418 = dma.done.wait (%p2359_p3), [#allocation3], 16  }
  0x19   : > { %2420 = vsyncadd (%p2359_p3), [#allocation3], 4294967280 }
  0x1a   : > { %206 = sfence }
  0x1b   : > { %p229_p0 = scmp.lt.s32.totalorder %s2236_s19, 1  ;;  %v278_v16 = vlaneseq  ;;  %v275_v19 = vld [vmem:[%s3572_s1] sm:$0x3]  ;;  %v2426_v22 = vmov 0   ;;  %vm375_vm0 = vcmask 130112   ;;  %vm382_vm1 = vcmask 195712  }
  0x1c   : > { %2385 = vset.pattern.permute.xlu0 %v2426_v22  ;;  %2384 = vset.pattern.permute.xlu1 %v2426_v22  ;;  %vm389_vm2 = vcmask 261312   ;;  %vm410_vm3 = vcmask 1041409   ;;  %vm413_vm4 = vcmask 254976   ;;  %s2427_s9 = smov 51   ;;  %s2250_s10 = sld [smem:[#allocation2 + $0x38]]  ;;  %vm584_vm5 = vcmask 416768  }
  0x1d   : > { %s3663_s19 = smov (!%p229_p0, %s2236_s19), 1  ;;  %v2533_v17 = vshrl.u32 %v278_v16, 7  ;;  %s2249_s11 = sld [smem:[#allocation2 + $0x7]]  ;;  %vm639_vm6 = vcmask 916480   ;;  %vm668_vm7 = vcmask 785408   ;;  %vm697_vm8 = vcmask 654336  }
  0x1e   : > { %s2349_s26 = sshll.u32 %s3663_s19, 6  ;;  %s2251_s12 = sld [smem:[#allocation2 + $0xe]]  ;;  %vm726_vm9 = vcmask 523264   ;;  %vm755_vm10 = vcmask 392192   ;;  %vm784_vm11 = vcmask 261120   ;;  %vm1003_vm12 = vcmask 1039360  }
  0x1f   : > { %s233_s29 = scalar_lea.vmem %s3571_s0, %s2349_s26  ;;  %v2536_v18 = vsub.s32 0, %v2533_v17  ;;  %v299_v21 = vsub.s32 1, %v2533_v17  ;;  %s2252_s13 = sld [smem:[#allocation2 + $0x3f]]  ;;  %vm1226_vm13 = vcmask 1031168   ;;  %vm1449_vm14 = vcmask 1022976  }
  0x20   : > { %v2500_v0 = vld [vmem:[%s233_s29 + $0x20] sm:$0xff]  ;;  %v2502_v1 = vld [vmem:[%s233_s29 + $0x28] sm:$0xff]  ;;  %v2510_v5 = vld [vmem:[%s233_s29 + $0x30] sm:$0xff]  ;;  %s2253_s14 = sld [smem:[#allocation2 + $0x15]]  ;;  %s2428_s17 = smov 112   ;;  %vm1895_vm15 = vcmask 1006592  }
  0x21   : > { %v2504_v2 = vld [vmem:[%s233_s29] sm:$0xff]  ;;  %v253_v3 = vadd.f32 %v2502_v1, %v2500_v0  ;;  %v2508_v4 = vld [vmem:[%s233_s29 + $0x8] sm:$0xff]  ;;  %v2512_v6 = vld [vmem:[%s233_s29 + $0x38] sm:$0xff]  ;;  %v269_v15 = vmax.f32 %v2500_v0, %v2502_v1  ;;  %3594 = vst [vmem:[#allocation5_spill] sm:$0xff] %v2536_v18  ;;  %v281_v20 = vrot.slane %v275_v19, %v2536_v18  ;;  %v300_v23 = vrot.slane %v275_v19, %v299_v21  ;;  %s2254_s15 = sld [smem:[#allocation2 + $0x46]]  ;;  %s2429_s21 = smov 96  }
  0x22   : > { %v247_v7 = vadd.f32 %v2508_v4, %v2504_v2  ;;  %v2516_v8 = vld [vmem:[%s233_s29 + $0x10] sm:$0xff]  ;;  %v2518_v9 = vld [vmem:[%s233_s29 + $0x18] sm:$0xff]  ;;  %v256_v10 = vadd.f32 %v2512_v6, %v2510_v5  ;;  %v263_v13 = vmax.f32 %v2504_v2, %v2508_v4  ;;  %v272_v14 = vmax.f32 %v2510_v5, %v2512_v6  ;;  %s2255_s16 = sld [smem:[#allocation2 + $0x1c]]  ;;  %s2430_s25 = smov 80  }
  0x23   : > { %254 = vadd.xlane.f32.xlu1 %v253_v3  ;;  %v250_v11 = vadd.f32 %v2518_v9, %v2516_v8  ;;  %v266_v12 = vmax.f32 %v2516_v8, %v2518_v9  ;;  %s2256_s20 = sld [smem:[#allocation2 + $0x4d]]  ;;  %s2431_s28 = smov 64  }
  0x24   : > { %248 = vadd.xlane.f32.xlu0 %v247_v7  ;;  %s2257_s22 = sld [smem:[#allocation2 + $0x23]]  ;;  %s2432_s7 = smov 48  }
  0x25   : > { %s2258_s23 = sld [smem:[#allocation2 + $0x54]] }
  0x26   : > { %s2259_s24 = sld [smem:[#allocation2 + $0x2a]] }
  0x27   : > { %257 = vadd.xlane.f32.xlu1 %v256_v10  ;;  %s2260_s27 = sld [smem:[#allocation2 + $0x5b]] }
  0x28   : > { %251 = vadd.xlane.f32.xlu0 %v250_v11  ;;  %v365_v11 = vand.u32 127, %v278_v16  ;;  %s2263_s29 = sld [smem:[#allocation2 + $0x8]] }
  0x29   : > { %s2264_s30 = sld [smem:[#allocation2 + $0x39]] }
  0x2a   : > { %v377_v19 = vadd.s32 4294967280, %v365_v11  ;;  %v368_v22 = vsub.s32 %v365_v11, %v2533_v17  ;;  %s2265_s6 = sld [smem:[#allocation2 + $0xf]] }
  0x2b   : > { %267 = vmax.xlane.f32.xlu1 %v266_v12  ;;  %s2266_s8 = sld [smem:[#allocation2 + $0x40]] }
  0x2c   : > { %264 = vmax.xlane.f32.xlu0 %v263_v13 }
  0x2f   : > { %273 = vmax.xlane.f32.xlu1 %v272_v14  ;;  %v370_v14 = vadd.s32 4294967288, %v365_v11 }
  0x30   : > { %270 = vmax.xlane.f32.xlu0 %v269_v15  ;;  %v384_v15 = vadd.s32 4294967272, %v365_v11 }
  0x40   : > { %287 = vbcast.lane.b32.xlu1 %v281_v20, 264 }
  0x44   : > { %302 = vbcast.lane.b32.xlu1 %v300_v23, 256 }
  0x46   : > { %283 = vbcast.lane.b32.xlu0 %v281_v20, 256 }
  0x48   : > { %306 = vbcast.lane.b32.xlu1 %v300_v23, 264 }
  0x4a   : > { %291 = vbcast.lane.b32.xlu0 %v281_v20, 272 }
  0x4c   : > { %310 = vbcast.lane.b32.xlu1 %v300_v23, 272 }
  0x4e   : > { %295 = vbcast.lane.b32.xlu0 %v281_v20, 280 }
  0x50   : > { %314 = vbcast.lane.b32.xlu1 %v300_v23, 280  ;;  %v373_v23 = vsub.s32 %v370_v14, %v2533_v17 }
  0xac   : > { %v255_v24 = vpop.xlane.xlu1 %254 }
  0xad   : > { %v249_v25 = vpop.xlane.xlu0 %248  ;;  %v261_v49 = vmul.f32 0.00390625, %v255_v24  ;;  %v387_v24 = vsub.s32 %v384_v15, %v2533_v17 }
  0xae   : > { %v259_v46 = vmul.f32 0.00390625, %v249_v25  ;;  %v380_v25 = vsub.s32 %v377_v19, %v2533_v17 }
  0xb0   : > { %v258_v26 = vpop.xlane.xlu1 %257 }
  0xb1   : > { %v252_v27 = vpop.xlane.xlu0 %251  ;;  %v262_v53 = vmul.f32 0.00390625, %v258_v26 }
  0xb2   : > { %v260_v42 = vmul.f32 0.00390625, %v252_v27 }
  0xb4   : > { %v268_v28 = vpop.xlane.xlu1 %267 }
  0xb5   : > { %v265_v29 = vpop.xlane.xlu0 %264 }
  0xb8   : > { %v274_v30 = vpop.xlane.xlu1 %273 }
  0xb9   : > { %v271_v31 = vpop.xlane.xlu0 %270 }
  0xbc   : > { %v288_v32 = vpop.permute.xlu1 %287 }
  0xbd   : > { %v419_v33 = vmul.f32 %v288_v32, %v268_v28  ;;  %v284_v34 = vpop.permute.xlu0 %283  ;;  %v325_v45 = vmul.f32 %v288_v32, %v260_v42 }
  0xbe   : > { %v418_v35 = vmul.f32 %v284_v34, %v265_v29  ;;  %v324_v47 = vmul.f32 %v284_v34, %v259_v46 }
  0xbf   : > { %438 = vperm.xlu0 %2385, %v419_v33  }
  0xc0   : > { %435 = vperm.xlu1 %2384, %v418_v35   ;;  %v303_v36 = vpop.permute.xlu1 %302 }
  0xc1   : > { %v422_v37 = vmul.f32 %v303_v36, %v265_v29  ;;  %v292_v38 = vpop.permute.xlu0 %291  ;;  %v328_v48 = vmul.f32 %v303_v36, %v259_v46 }
  0xc2   : > { %v420_v41 = vmul.f32 %v292_v38, %v271_v31  ;;  %v326_v51 = vmul.f32 %v292_v38, %v261_v49 }
  0xc4   : > { %447 = vperm.xlu1 %2384, %v422_v37   ;;  %v307_v39 = vpop.permute.xlu1 %306 }
  0xc5   : > { %v423_v40 = vmul.f32 %v307_v39, %v268_v28  ;;  %v329_v50 = vmul.f32 %v307_v39, %v260_v42  ;;  %v296_v52 = vpop.permute.xlu0 %295 }
  0xc6   : > { %v327_v55 = vmul.f32 %v296_v52, %v262_v53  ;;  %v421_v58 = vmul.f32 %v296_v52, %v274_v30 }
  0xc7   : > { %450 = vperm.xlu0 %2385, %v423_v40  }
  0xc8   : > { %441 = vperm.xlu1 %2384, %v420_v41   ;;  %v311_v43 = vpop.permute.xlu1 %310 }
  0xc9   : > { %v424_v44 = vmul.f32 %v311_v43, %v271_v31  ;;  %v330_v54 = vmul.f32 %v311_v43, %v261_v49 }
  0xcb   : > { %453 = vperm.xlu0 %2385, %v424_v44  }
  0xcc   : > { %344 = vperm.xlu1 %2384, %v325_v45   ;;  %v315_v56 = vpop.permute.xlu1 %314 }
  0xcd   : > { %v331_v57 = vmul.f32 %v315_v56, %v262_v53  ;;  %v425_v59 = vmul.f32 %v315_v56, %v274_v30 }
  0xcf   : > { %341 = vperm.xlu0 %2385, %v324_v47  }
  0xd0   : > { %353 = vperm.xlu1 %2384, %v328_v48  }
  0xd3   : > { %356 = vperm.xlu0 %2385, %v329_v50  }
  0xd4   : > { %347 = vperm.xlu1 %2384, %v326_v51  }
  0xd7   : > { %359 = vperm.xlu0 %2385, %v330_v54  }
  0xd8   : > { %350 = vperm.xlu1 %2384, %v327_v55  }
  0xdb   : > { %362 = vperm.xlu0 %2385, %v331_v57  }
  0xdc   : > { %444 = vperm.xlu1 %2384, %v421_v58  }
  0xdf   : > { %456 = vperm.xlu0 %2385, %v425_v59  }
 0x13a   : > { %v439_v61 = vpop.permute.xlu0 %438 }
 0x13b   : > { %v436_v60 = vpop.permute.xlu1 %435  ;;  %v465_v35 = vrot.slane %v439_v61, %v373_v23 }
 0x13c   : > { %v461_v34 = vrot.slane %v436_v60, %v368_v22 }
 0x13e   : > { %v466_v51 = vsel %vm375_vm0, %v465_v35, %v461_v34 }
 0x13f   : > { %v448_v62 = vpop.permute.xlu1 %447 }
 0x140   : > { %v480_v45 = vrot.slane %v448_v62, %v368_v22 }
 0x142   : > { %v451_v63 = vpop.permute.xlu0 %450 }
 0x143   : > { %v442_v3 = vpop.permute.xlu1 %441  ;;  %v484_v37 = vrot.slane %v451_v63, %v373_v23 }
 0x144   : > { %v470_v41 = vrot.slane %v442_v3, %v380_v25 }
 0x145   : > { %v485_v52 = vsel %vm375_vm0, %v484_v37, %v480_v45 }
 0x146   : > { %v454_v7 = vpop.permute.xlu0 %453  ;;  %v471_v55 = vsel %vm382_vm1, %v470_v41, %v466_v51 }
 0x147   : > { %v345_v10 = vpop.permute.xlu1 %344  ;;  %v489_v42 = vrot.slane %v454_v7, %v380_v25  ;;  %v276_v7 = vld [vmem:[%s3573_s2] sm:$0x3] }
 0x148   : > { %v374_v31 = vrot.slane %v345_v10, %v373_v23 }
 0x149   : > { %v490_v56 = vsel %vm382_vm1, %v489_v42, %v485_v52 }
 0x14a   : > { %v342_v12 = vpop.permute.xlu0 %341 }
 0x14b   : > { %v354_v13 = vpop.permute.xlu1 %353  ;;  %v369_v27 = vrot.slane %v342_v12, %v368_v22 }
 0x14c   : > { %v394_v32 = vrot.slane %v354_v13, %v368_v22 }
 0x14d   : > { %v376_v17 = vsel %vm375_vm0, %v374_v31, %v369_v27 }
 0x14e   : > { %v357_v20 = vpop.permute.xlu0 %356 }
 0x14f   : > { %v348_v21 = vpop.permute.xlu1 %347  ;;  %v398_v28 = vrot.slane %v357_v20, %v373_v23 }
 0x150   : > { %v381_v16 = vrot.slane %v348_v21, %v380_v25 }
 0x151   : > { %v399_v38 = vsel %vm375_vm0, %v398_v28, %v394_v32  ;;  %vm1672_vm0 = vcmask 1014784  }
 0x152   : > { %v360_v26 = vpop.permute.xlu0 %359  ;;  %v383_v43 = vsel %vm382_vm1, %v381_v16, %v376_v17 }
 0x153   : > { %v351_v29 = vpop.permute.xlu1 %350  ;;  %v403_v30 = vrot.slane %v360_v26, %v380_v25 }
 0x154   : > { %v388_v33 = vrot.slane %v351_v29, %v387_v24 }
 0x155   : > { %v404_v44 = vsel %vm382_vm1, %v403_v30, %v399_v38  ;;  %vm2118_vm1 = vcmask 998400  }
 0x156   : > { %v363_v36 = vpop.permute.xlu0 %362  ;;  %v390_v47 = vsel %vm389_vm2, %v388_v33, %v383_v43 }
 0x157   : > { %v445_v39 = vpop.permute.xlu1 %444  ;;  %v408_v40 = vrot.slane %v363_v36, %v387_v24 }
 0x158   : > { %v475_v46 = vrot.slane %v445_v39, %v387_v24 }
 0x159   : > { %v409_v48 = vsel %vm389_vm2, %v408_v40, %v404_v44 }
 0x15a   : > { %v457_v49 = vpop.permute.xlu0 %456  ;;  %v411_v50 = vsel %vm410_vm3, %v409_v48, %v390_v47  ;;  %v476_v57 = vsel %vm389_vm2, %v475_v46, %v471_v55 }
 0x15b   : > { %v494_v53 = vrot.slane %v457_v49, %v387_v24  ;;  %v414_v54 = vsel %vm413_vm4, %v411_v50, 0.0 }
 0x15c   : > { %415 = vadd.xlane.f32.xlu1 %v414_v54 }
 0x15d   : > { %v495_v58 = vsel %vm389_vm2, %v494_v53, %v490_v56 }
 0x15e   : > { %v496_v59 = vsel %vm410_vm3, %v495_v58, %v476_v57 }
 0x15f   : > { %v498_v60 = vsel %vm413_vm4, %v496_v59, 0.0 }
 0x160   : > { %499 = vadd.xlane.f32.xlu0 %v498_v60 }
 0x1e5   : > { %v416_v61 = vpop.xlane.xlu1 %415 }
 0x1e6   : > { %v417_v63 = vmax.f32 %v416_v61, 0.0 }
 0x1e9   : > { %v500_v62 = vpop.xlane.xlu0 %499 }
 0x1ea   : > { %v501_v3 = vmax.f32 %v500_v62, 0.0 }
 0x1ec   : > { %v502_v10 = vadd.f32 %v501_v3, %v417_v63 }
 0x1ee   : > { %v503_v11 = vmul.f32 %v502_v10, %v276_v7 }
 0x1f0   : > { %v504_v12 = vsel %vm413_vm4, %v503_v11, 0.0 }
 0x1f1   : > { %v505_v13 = vrot.slane %v504_v12, 4 }
 0x1f3   : > { %v506_v14 = vadd.f32 %v505_v13, %v504_v12 }
 0x1f5   : > { %v507_v15 = vrot.slane %v506_v14, 2 }
 0x1f7   : > { %v508_v19 = vadd.f32 %v507_v15, %v506_v14  ;;  %v618_v14 = vstv %s2249_s11  ;;  %v623_v15 = vstv %s2250_s10  ;;  %s2267_s10 = sld [smem:[#allocation2 + $0x16]] }
 0x1f8   : > { %s2268_s11 = sld [smem:[#allocation2 + $0x47]] }
 0x1f9   : > { %v509_v20 = vrot.slane %v508_v19, 1 }
 0x1fb   : > { %v510_v21 = vadd.f32 %v509_v20, %v508_v19 }
 0x1fd   : > { %v2247_v22 = vmul.f32 -1.442695, %v510_v21 }
 0x1ff   : > { %2386 = vpow2.f32 %v2247_v22 }
 0x20c   : > { %v2387_v23 = vpop.eup %2386 }
 0x20d   : > { %v514_v24 = vadd.f32 1.0, %v2387_v23 }
 0x20f   : > { %2388 = vrcp.f32 %v514_v24  ;;  %v647_v24 = vstv %s2251_s12  ;;  %s2269_s12 = sld [smem:[#allocation2 + $0x1d]] }
 0x21c   : > { %v2389_v25 = vpop.eup %2388 }
 0x21d   : > { %522 = vbcast.lane.b32.xlu1 %v2389_v25, 264  ;;  %518 = vbcast.lane.b32.xlu0 %v2389_v25, 256 }
 0x221   : > { %526 = vbcast.lane.b32.xlu1 %v2389_v25, 272  ;;  %530 = vbcast.lane.b32.xlu0 %v2389_v25, 280 }
 0x28f   : > { %v523_v26 = vpop.permute.xlu1 %522  ;;  %v519_v27 = vpop.permute.xlu0 %518 }
 0x290   : > { %v2569_v28 = vmul.f32 %v523_v26, %v2516_v8  ;;  %v2572_v29 = vmul.f32 %v523_v26, %v2518_v9  ;;  %v2575_v16 = vmul.f32 %v519_v27, %v2504_v2  ;;  %v2578_v30 = vmul.f32 %v519_v27, %v2508_v4 }
 0x292   : > { %3595 = vst [vmem:[#allocation6_spill] sm:$0xff] %v2569_v28  ;;  %3596 = vst [vmem:[#allocation7_spill] sm:$0xff] %v2572_v29  ;;  %v540_v31 = vadd.f32 %v2569_v28, %v2575_v16  ;;  %v549_v32 = vadd.f32 %v2572_v29, %v2578_v30 }
 0x293   : > { %3597 = vst [vmem:[#allocation8_spill] sm:$0xff] %v2575_v16  ;;  %3598 = vst [vmem:[#allocation9_spill] sm:$0xff] %v2578_v30  ;;  %v527_v33 = vpop.permute.xlu1 %526  ;;  %v531_v34 = vpop.permute.xlu0 %530 }
 0x294   : > { %v2585_v8 = vmul.f32 %v527_v33, %v2500_v0  ;;  %v2588_v9 = vmul.f32 %v527_v33, %v2502_v1  ;;  %v2591_v2 = vmul.f32 %v531_v34, %v2510_v5  ;;  %v2594_v4 = vmul.f32 %v531_v34, %v2512_v6 }
 0x295   : > { %v652_v33 = vstv %s2252_s13  ;;  %s2270_s13 = sld [smem:[#allocation2 + $0x4e]] }
 0x296   : > { %3599 = vst [vmem:[#allocation10_spill] sm:$0xff] %v2585_v8  ;;  %3600 = vst [vmem:[#allocation11_spill] sm:$0xff] %v2588_v9  ;;  %v541_v35 = vadd.f32 %v540_v31, %v2585_v8  ;;  %v550_v36 = vadd.f32 %v549_v32, %v2588_v9  ;;  %v560_v37 = vmax.f32 %v2575_v16, %v2585_v8 }
 0x297   : > { %3601 = vst [vmem:[#allocation12_spill] sm:$0xff] %v2591_v2  ;;  %3602 = vst [vmem:[#allocation13_spill] sm:$0xff] %v2594_v4  ;;  %v569_v0 = vmax.f32 %v2578_v30, %v2588_v9  ;;  %v561_v1 = vmax.f32 %v2569_v28, %v2591_v2  ;;  %v570_v5 = vmax.f32 %v2572_v29, %v2594_v4 }
 0x298   : > { %v542_v17 = vadd.f32 %v541_v35, %v2591_v2  ;;  %v551_v6 = vadd.f32 %v550_v36, %v2594_v4 }
 0x299   : > { %v571_v38 = vmax.f32 %v569_v0, %v570_v5  ;;  %v562_v39 = vmax.f32 %v560_v37, %v561_v1 }
 0x29a   : > { %v543_v40 = vrot.slane %v542_v17, 4  ;;  %v552_v41 = vrot.slane %v551_v6, 4 }
 0x29b   : > { %v572_v42 = vrot.slane %v571_v38, 4  ;;  %v563_v43 = vrot.slane %v562_v39, 4 }
 0x29c   : > { %v553_v44 = vadd.f32 %v552_v41, %v551_v6  ;;  %v544_v45 = vadd.f32 %v543_v40, %v542_v17 }
 0x29d   : > { %v573_v46 = vmax.f32 %v571_v38, %v572_v42  ;;  %v564_v47 = vmax.f32 %v562_v39, %v563_v43  ;;  %v676_v39 = vstv %s2253_s14  ;;  %v681_v42 = vstv %s2254_s15  ;;  %s2271_s14 = sld [smem:[#allocation2 + $0x24]] }
 0x29e   : > { %v554_v48 = vrot.slane %v553_v44, 2  ;;  %v545_v49 = vrot.slane %v544_v45, 2  ;;  %s2262_s15 = sld [smem:[#allocation2 + $0x32]] }
 0x29f   : > { %v574_v50 = vrot.slane %v573_v46, 2  ;;  %v565_v51 = vrot.slane %v564_v47, 2 }
 0x2a0   : > { %v555_v52 = vadd.f32 %v554_v48, %v553_v44  ;;  %v546_v53 = vadd.f32 %v545_v49, %v544_v45 }
 0x2a1   : > { %v575_v54 = vmax.f32 %v573_v46, %v574_v50  ;;  %v566_v55 = vmax.f32 %v564_v47, %v565_v51  ;;  %v705_v47 = vstv %s2255_s16  ;;  %v710_v50 = vstv %s2256_s20  ;;  %s2261_s16 = sld [smem:[#allocation2 + $0x1]] }
 0x2a2   : > { %v556_v56 = vrot.slane %v555_v52, 1  ;;  %v547_v57 = vrot.slane %v546_v53, 1  ;;  %s2272_s20 = sld [smem:[#allocation2 + $0x55]] }
 0x2a3   : > { %v576_v58 = vrot.slane %v575_v54, 1  ;;  %v567_v59 = vrot.slane %v566_v55, 1 }
 0x2a4   : > { %v557_v62 = vadd.f32 %v556_v56, %v555_v52  ;;  %v548_v63 = vadd.f32 %v547_v57, %v546_v53 }
 0x2a5   : > { %v577_v60 = vmax.f32 %v575_v54, %v576_v58  ;;  %v568_v61 = vmax.f32 %v566_v55, %v567_v59 }
 0x2a6   : > { %v559_v3 = vmul.f32 0.03125, %v557_v62  ;;  %v558_v7 = vmul.f32 0.03125, %v548_v63 }
 0x2a7   : > { %595 = vrot.lane.b32.xlu0 %v577_v60, %s2427_s9  ;;  %593 = vrot.lane.b32.xlu1 %v568_v61, %s2427_s9  ;;  %v734_v61 = vstv %s2257_s22  ;;  %s2273_s22 = sld [smem:[#allocation2 + $0x2b]] }
 0x2ab   : > { %582 = vrot.lane.b32.xlu0 %v559_v3, %s2427_s9  ;;  %580 = vrot.lane.b32.xlu1 %v558_v7, %s2427_s9  ;;  %v739_v3 = vstv %s2258_s23  ;;  %s2433_s9 = smov 32   ;;  %s2274_s23 = sld [smem:[#allocation2 + $0x5c]] }
 0x319   : > { %v596_v10 = vpop.permute.xlu0 %595  ;;  %v594_v11 = vpop.permute.xlu1 %593 }
 0x31a   : > { %v2609_v12 = vsel %vm584_vm5, %v594_v11, %v596_v10  ;;  %v2612_v13 = vsel %vm584_vm5, 0.0, %v594_v11  ;;  %v2628_v32 = vsel %vm584_vm5, %v596_v10, 0.0 }
 0x31b   : > { %v624_v26 = vmul.f32 %v623_v15, %v2612_v13  ;;  %v625_v31 = vmul.f32 %v623_v15, %v2609_v12  ;;  %v626_v0 = vmul.f32 %v623_v15, %v2628_v32  ;;  %v653_v1 = vmul.f32 %v652_v33, %v2612_v13 }
 0x31c   : > { %v654_v40 = vmul.f32 %v652_v33, %v2609_v12  ;;  %v655_v41 = vmul.f32 %v652_v33, %v2628_v32  ;;  %v682_v48 = vmul.f32 %v681_v42, %v2612_v13  ;;  %v683_v49 = vmul.f32 %v681_v42, %v2609_v12 }
 0x31d   : > { %v583_v19 = vpop.permute.xlu0 %582  ;;  %v581_v20 = vpop.permute.xlu1 %580  ;;  %v684_v55 = vmul.f32 %v681_v42, %v2628_v32  ;;  %v711_v56 = vmul.f32 %v710_v50, %v2612_v13  ;;  %v712_v62 = vmul.f32 %v710_v50, %v2609_v12  ;;  %v713_v63 = vmul.f32 %v710_v50, %v2628_v32 }
 0x31e   : > { %v2615_v21 = vsel %vm584_vm5, %v583_v19, 0.0  ;;  %v2618_v22 = vsel %vm584_vm5, %v581_v20, %v583_v19  ;;  %v2621_v23 = vsel %vm584_vm5, 0.0, %v581_v20  ;;  %v763_v15 = vstv %s2259_s24  ;;  %s2277_s24 = sld [smem:[#allocation2 + $0x9]] }
 0x31f   : > { %v619_v25 = vmul.f32 %v618_v14, %v2621_v23  ;;  %v620_v27 = vmul.f32 %v618_v14, %v2618_v22  ;;  %v621_v36 = vmul.f32 %v618_v14, %v2615_v21  ;;  %v648_v37 = vmul.f32 %v647_v24, %v2621_v23 }
 0x320   : > { %v649_v6 = vmul.f32 %v647_v24, %v2618_v22  ;;  %v650_v38 = vmul.f32 %v647_v24, %v2615_v21  ;;  %v677_v45 = vmul.f32 %v676_v39, %v2621_v23  ;;  %v678_v46 = vmul.f32 %v676_v39, %v2618_v22 }
 0x321   : > { %v627_v34 = vadd.f32 %v624_v26, %v619_v25  ;;  %v628_v35 = vadd.f32 %v625_v31, %v620_v27  ;;  %v629_v5 = vadd.f32 %v626_v0, %v621_v36  ;;  %v656_v17 = vadd.f32 %v653_v1, %v648_v37 }
 0x322   : > { %v657_v43 = vadd.f32 %v654_v40, %v649_v6  ;;  %v658_v44 = vadd.f32 %v655_v41, %v650_v38  ;;  %v685_v51 = vadd.f32 %v682_v48, %v677_v45  ;;  %v686_v52 = vadd.f32 %v683_v49, %v678_v46 }
 0x323   : > { %633 = vrot.lane.b32.xlu1 %v627_v34, %s2428_s17  ;;  %635 = vrot.lane.b32.xlu0 %v628_v35, %s2428_s17  ;;  %v679_v53 = vmul.f32 %v676_v39, %v2615_v21  ;;  %v706_v54 = vmul.f32 %v705_v47, %v2621_v23  ;;  %v707_v59 = vmul.f32 %v705_v47, %v2618_v22  ;;  %v768_v24 = vstv %s2260_s27  ;;  %s2278_s27 = sld [smem:[#allocation2 + $0x3a]] }
 0x324   : > { %v708_v60 = vmul.f32 %v705_v47, %v2615_v21  ;;  %v735_v11 = vmul.f32 %v734_v61, %v2621_v23  ;;  %v736_v14 = vmul.f32 %v734_v61, %v2618_v22  ;;  %v740_v19 = vmul.f32 %v739_v3, %v2612_v13 }
 0x325   : > { %v687_v57 = vadd.f32 %v684_v55, %v679_v53  ;;  %v714_v58 = vadd.f32 %v711_v56, %v706_v54  ;;  %v715_v7 = vadd.f32 %v712_v62, %v707_v59  ;;  %v741_v20 = vmul.f32 %v739_v3, %v2609_v12 }
 0x326   : > { %v716_v10 = vadd.f32 %v713_v63, %v708_v60  ;;  %v743_v25 = vadd.f32 %v740_v19, %v735_v11  ;;  %v737_v27 = vmul.f32 %v734_v61, %v2615_v21  ;;  %v764_v31 = vmul.f32 %v763_v15, %v2621_v23 }
 0x327   : > { %637 = vrot.lane.b32.xlu1 %v629_v5, %s2428_s17  ;;  %662 = vrot.lane.b32.xlu0 %v656_v17, %s2429_s21  ;;  %v744_v26 = vadd.f32 %v741_v20, %v736_v14  ;;  %v742_v33 = vmul.f32 %v739_v3, %v2628_v32  ;;  %v769_v34 = vmul.f32 %v768_v24, %v2612_v13  ;;  %v812_v1 = vstv %s2263_s29  ;;  %s2279_s29 = sld [smem:[#allocation2 + $0x10]] }
 0x328   : > { %v765_v37 = vmul.f32 %v763_v15, %v2618_v22  ;;  %v766_v0 = vmul.f32 %v763_v15, %v2615_v21  ;;  %v770_v5 = vmul.f32 %v768_v24, %v2609_v12  ;;  %v771_v17 = vmul.f32 %v768_v24, %v2628_v32 }
 0x329   : > { %v745_v35 = vadd.f32 %v742_v33, %v737_v27  ;;  %v772_v36 = vadd.f32 %v769_v34, %v764_v31  ;;  %v817_v6 = vstv %s2264_s30  ;;  %v813_v40 = vmul.f32 %v812_v1, %v2621_v23  ;;  %s2275_s30 = sld [smem:[#allocation2 + $0x2]] }
 0x32a   : > { %v773_v38 = vadd.f32 %v770_v5, %v765_v37  ;;  %v774_v39 = vadd.f32 %v771_v17, %v766_v0  ;;  %v814_v41 = vmul.f32 %v812_v1, %v2618_v22  ;;  %v842_v42 = vstv %s2265_s6  ;;  %s2276_s6 = sld [smem:[#allocation2 + $0x33]] }
 0x32b   : > { %664 = vrot.lane.b32.xlu1 %v657_v43, %s2429_s21  ;;  %666 = vrot.lane.b32.xlu0 %v658_v44, %s2429_s21  ;;  %v818_v43 = vmul.f32 %v817_v6, %v2612_v13  ;;  %v819_v44 = vmul.f32 %v817_v6, %v2609_v12  ;;  %v847_v45 = vstv %s2266_s8  ;;  %v815_v48 = vmul.f32 %v812_v1, %v2615_v21  ;;  %s2280_s8 = sld [smem:[#allocation2 + $0x41]] }
 0x32c   : > { %v843_v49 = vmul.f32 %v842_v42, %v2621_v23  ;;  %v820_v50 = vmul.f32 %v817_v6, %v2628_v32  ;;  %v844_v54 = vmul.f32 %v842_v42, %v2618_v22  ;;  %v845_v55 = vmul.f32 %v842_v42, %v2615_v21 }
 0x32d   : > { %v821_v46 = vadd.f32 %v818_v43, %v813_v40  ;;  %v822_v47 = vadd.f32 %v819_v44, %v814_v41  ;;  %v872_v56 = vstv %s2267_s10  ;;  %v877_v59 = vstv %s2268_s11  ;;  %s2281_s10 = sld [smem:[#allocation2 + $0x17]] }
 0x32e   : > { %v873_v62 = vmul.f32 %v872_v56, %v2621_v23  ;;  %v874_v63 = vmul.f32 %v872_v56, %v2618_v22  ;;  %v902_v3 = vstv %s2269_s12  ;;  %v907_v11 = vstv %s2270_s13  ;;  %s2282_s11 = sld [smem:[#allocation2 + $0x48]] }
 0x32f   : > { %691 = vrot.lane.b32.xlu1 %v685_v51, %s2430_s25  ;;  %693 = vrot.lane.b32.xlu0 %v686_v52, %s2430_s25  ;;  %v848_v51 = vmul.f32 %v847_v45, %v2612_v13  ;;  %v823_v52 = vadd.f32 %v820_v50, %v815_v48  ;;  %v875_v19 = vmul.f32 %v872_v56, %v2615_v21  ;;  %v932_v34 = vstv %s2271_s14  ;;  %s2283_s12 = sld [smem:[#allocation2 + $0x1e]] }
 0x330   : > { %v903_v20 = vmul.f32 %v902_v3, %v2621_v23  ;;  %v880_v24 = vmul.f32 %v877_v59, %v2628_v32  ;;  %v905_v33 = vmul.f32 %v902_v3, %v2615_v21  ;;  %v2713_v37 = vstv %s2262_s15  ;;  %s2284_s13 = sld [smem:[#allocation2 + $0x4f]] }
 0x331   : > { %v851_v53 = vadd.f32 %v848_v51, %v843_v49  ;;  %v910_v0 = vmul.f32 %v907_v11, %v2628_v32  ;;  %v937_v1 = vstv %s2272_s20  ;;  %v933_v17 = vmul.f32 %v932_v34, %v2621_v23  ;;  %s2285_s14 = sld [smem:[#allocation2 + $0x25]] }
 0x332   : > { %v883_v27 = vadd.f32 %v880_v24, %v875_v19  ;;  %v802_v40 = vmul.f32 %v2713_v37, %v2612_v13  ;;  %v938_v41 = vmul.f32 %v937_v1, %v2612_v13  ;;  %v962_v42 = vstv %s2273_s22  ;;  %s2286_s15 = sld [smem:[#allocation2 + $0x56]] }
 0x333   : > { %695 = vrot.lane.b32.xlu1 %v687_v57, %s2430_s25  ;;  %720 = vrot.lane.b32.xlu0 %v714_v58, %s2431_s28  ;;  %v849_v57 = vmul.f32 %v847_v45, %v2609_v12  ;;  %v850_v58 = vmul.f32 %v847_v45, %v2628_v32  ;;  %v913_v6 = vadd.f32 %v910_v0, %v905_v33  ;;  %s2288_s20 = sld [smem:[#allocation2 + $0x5d]] }
 0x334   : > { %v939_v43 = vmul.f32 %v937_v1, %v2609_v12  ;;  %v941_v48 = vadd.f32 %v938_v41, %v933_v17  ;;  %v935_v50 = vmul.f32 %v932_v34, %v2615_v21  ;;  %v963_v51 = vmul.f32 %v962_v42, %v2621_v23  ;;  %s2291_s22 = sld [smem:[#allocation2 + $0xa]] }
 0x335   : > { %v852_v60 = vadd.f32 %v849_v57, %v844_v54  ;;  %v853_v61 = vadd.f32 %v850_v58, %v845_v55  ;;  %v964_v57 = vmul.f32 %v962_v42, %v2618_v22  ;;  %v965_v58 = vmul.f32 %v962_v42, %v2615_v21 }
 0x336   : > { %v1095_v41 = vstv %s2281_s10  ;;  %s2305_s10 = sld [smem:[#allocation2 + $0xb]] }
 0x337   : > { %722 = vrot.lane.b32.xlu1 %v715_v7, %s2431_s28  ;;  %724 = vrot.lane.b32.xlu0 %v716_v10, %s2431_s28  ;;  %v878_v7 = vmul.f32 %v877_v59, %v2612_v13  ;;  %v879_v10 = vmul.f32 %v877_v59, %v2609_v12  ;;  %v1035_v59 = vstv %s2277_s24  ;;  %s2293_s24 = sld [smem:[#allocation2 + $0x11]] }
 0x339   : > { %v881_v14 = vadd.f32 %v878_v7, %v873_v62  ;;  %v882_v15 = vadd.f32 %v879_v10, %v874_v63  ;;  %v1040_v62 = vstv %s2278_s27  ;;  %v1065_v63 = vstv %s2279_s29  ;;  %s2294_s27 = sld [smem:[#allocation2 + $0x42]] }
 0x33a   : > { %v1037_v10 = vmul.f32 %v1035_v59, %v2618_v22  ;;  %v1041_v19 = vmul.f32 %v1040_v62, %v2612_v13  ;;  %v1066_v24 = vmul.f32 %v1065_v63, %v2621_v23  ;;  %v1043_v0 = vmul.f32 %v1040_v62, %v2628_v32  ;;  %s2295_s29 = sld [smem:[#allocation2 + $0x18]] }
 0x33b   : > { %749 = vrot.lane.b32.xlu1 %v743_v25, %s2432_s7  ;;  %751 = vrot.lane.b32.xlu0 %v744_v26, %s2432_s7  ;;  %v908_v25 = vmul.f32 %v907_v11, %v2612_v13  ;;  %v904_v26 = vmul.f32 %v902_v3, %v2618_v22 }
 0x33d   : > { %v911_v31 = vadd.f32 %v908_v25, %v903_v20  ;;  %v2756_v20 = vstv %s2276_s6  ;;  %v1070_v25 = vstv %s2280_s8  ;;  %s2297_s6 = sld [smem:[#allocation2 + $0x1f]] }
 0x33e   : > { %v1073_v42 = vmul.f32 %v1070_v25, %v2628_v32  ;;  %s2298_s8 = sld [smem:[#allocation2 + $0x50]] }
 0x33f   : > { %753 = vrot.lane.b32.xlu1 %v745_v35, %s2432_s7  ;;  %778 = vrot.lane.b32.xlu0 %v772_v36, %s2433_s9  ;;  %v909_v35 = vmul.f32 %v907_v11, %v2609_v12  ;;  %v2711_v36 = vstv %s2261_s16  ;;  %v1036_v11 = vmul.f32 %v1035_v59, %v2621_v23  ;;  %s2287_s16 = sld [smem:[#allocation2 + $0x2c]] }
 0x340   : > { %v798_v45 = vmul.f32 %v2711_v36, %v2618_v22 }
 0x341   : > { %v912_v5 = vadd.f32 %v909_v35, %v904_v26  ;;  %v1071_v35 = vmul.f32 %v1070_v25, %v2612_v13 }
 0x343   : > { %780 = vrot.lane.b32.xlu1 %v773_v38, %s2433_s9  ;;  %782 = vrot.lane.b32.xlu0 %v774_v39, %s2433_s9  ;;  %v934_v38 = vmul.f32 %v932_v34, %v2618_v22  ;;  %v797_v39 = vmul.f32 %v2711_v36, %v2621_v23  ;;  %v1025_v34 = vmul.f32 %v2756_v20, %v2612_v13 }
 0x345   : > { %v2728_v44 = vadd.f32 %v802_v40, %v797_v39  ;;  %v942_v49 = vadd.f32 %v939_v43, %v934_v38  ;;  %v1067_v39 = vmul.f32 %v1065_v63, %v2618_v22  ;;  %v1026_v40 = vmul.f32 %v2756_v20, %v2609_v12 }
 0x346   : > { %v1072_v43 = vmul.f32 %v1070_v25, %v2609_v12 }
 0x347   : > { %827 = vrot.lane.b32.xlu1 %v821_v46, %s2428_s17  ;;  %829 = vrot.lane.b32.xlu0 %v822_v47, %s2428_s17  ;;  %v967_v46 = vstv %s2274_s23  ;;  %v803_v47 = vmul.f32 %v2713_v37, %v2609_v12  ;;  %s2292_s23 = sld [smem:[#allocation2 + $0x3b]] }
 0x348   : > { %v968_v54 = vmul.f32 %v967_v46, %v2612_v13 }
 0x34a   : > { %v971_v56 = vadd.f32 %v968_v54, %v963_v51  ;;  %v1125_v51 = vstv %s2283_s12  ;;  %s2307_s12 = sld [smem:[#allocation2 + $0x12]] }
 0x34b   : > { %831 = vrot.lane.b32.xlu1 %v823_v52, %s2428_s17  ;;  %857 = vrot.lane.b32.xlu0 %v851_v53, %s2429_s21  ;;  %v2736_v52 = vadd.f32 %v803_v47, %v798_v45  ;;  %v940_v53 = vmul.f32 %v937_v1, %v2628_v32  ;;  %v1068_v1 = vmul.f32 %v1065_v63, %v2615_v21 }
 0x34d   : > { %v943_v55 = vadd.f32 %v940_v53, %v935_v50  ;;  %v1076_v47 = vadd.f32 %v1073_v42, %v1068_v1  ;;  %v1096_v50 = vmul.f32 %v1095_v41, %v2621_v23 }
 0x34f   : > { %859 = vrot.lane.b32.xlu1 %v852_v60, %s2429_s21  ;;  %861 = vrot.lane.b32.xlu0 %v853_v61, %s2429_s21  ;;  %v969_v60 = vmul.f32 %v967_v46, %v2609_v12  ;;  %v970_v61 = vmul.f32 %v967_v46, %v2628_v32  ;;  %v1100_v46 = vstv %s2282_s11  ;;  %s2306_s11 = sld [smem:[#allocation2 + $0x3c]] }
 0x350   : > { %v1102_v53 = vmul.f32 %v1100_v46, %v2609_v12  ;;  %v1101_v54 = vmul.f32 %v1100_v46, %v2612_v13 }
 0x351   : > { %v972_v3 = vadd.f32 %v969_v60, %v964_v57  ;;  %v973_v7 = vadd.f32 %v970_v61, %v965_v58  ;;  %v1126_v58 = vmul.f32 %v1125_v51, %v2621_v23  ;;  %v1103_v61 = vmul.f32 %v1100_v46, %v2628_v32 }
 0x352   : > { %v1104_v57 = vadd.f32 %v1101_v54, %v1096_v50  ;;  %v1258_v46 = vstv %s2291_s22  ;;  %s2321_s22 = sld [smem:[#allocation2 + $0x13]] }
 0x353   : > { %887 = vrot.lane.b32.xlu1 %v881_v14, %s2430_s25  ;;  %889 = vrot.lane.b32.xlu0 %v882_v15, %s2430_s25  ;;  %v2750_v14 = vstv %s2275_s30  ;;  %v1042_v15 = vmul.f32 %v1040_v62, %v2609_v12  ;;  %v1260_v54 = vmul.f32 %v1258_v46, %v2618_v22  ;;  %s2296_s30 = sld [smem:[#allocation2 + $0x49]] }
 0x354   : > { %v1020_v33 = vmul.f32 %v2750_v14, %v2621_v23  ;;  %v1021_v17 = vmul.f32 %v2750_v14, %v2618_v22 }
 0x355   : > { %v1045_v26 = vadd.f32 %v1042_v15, %v1037_v10  ;;  %v1155_v10 = vstv %s2285_s14  ;;  %s2319_s14 = sld [smem:[#allocation2 + $0xc]] }
 0x356   : > { %v2780_v45 = vadd.f32 %v1026_v40, %v1021_v17 }
 0x357   : > { %891 = vrot.lane.b32.xlu1 %v883_v27, %s2430_s25  ;;  %917 = vrot.lane.b32.xlu0 %v911_v31, %s2431_s28  ;;  %v1044_v27 = vadd.f32 %v1041_v19, %v1036_v11  ;;  %v1038_v31 = vmul.f32 %v1035_v59, %v2615_v21  ;;  %v1098_v59 = vmul.f32 %v1095_v41, %v2615_v21  ;;  %v1160_v19 = vstv %s2286_s15  ;;  %s2320_s15 = sld [smem:[#allocation2 + $0x3d]] }
 0x359   : > { %v1046_v38 = vadd.f32 %v1043_v0, %v1038_v31  ;;  %v1106_v63 = vadd.f32 %v1103_v61, %v1098_v59  ;;  %v1185_v31 = vstv %s2287_s16  ;;  %v1261_v61 = vmul.f32 %v1258_v46, %v2615_v21  ;;  %s2309_s16 = sld [smem:[#allocation2 + $0x19]] }
 0x35a   : > { %v1186_v17 = vmul.f32 %v1185_v31, %v2621_v23  ;;  %v1188_v42 = vmul.f32 %v1185_v31, %v2615_v21 }
 0x35b   : > { %919 = vrot.lane.b32.xlu1 %v912_v5, %s2431_s28  ;;  %921 = vrot.lane.b32.xlu0 %v913_v6, %s2431_s28  ;;  %v2769_v5 = vadd.f32 %v1025_v34, %v1020_v33  ;;  %v1074_v6 = vadd.f32 %v1071_v35, %v1066_v24  ;;  %v1162_v33 = vmul.f32 %v1160_v19, %v2609_v12  ;;  %v1190_v35 = vstv %s2288_s20  ;;  %s2310_s20 = sld [smem:[#allocation2 + $0x4a]] }
 0x35c   : > { %v1161_v34 = vmul.f32 %v1160_v19, %v2612_v13 }
 0x35f   : > { %947 = vrot.lane.b32.xlu1 %v941_v48, %s2432_s7  ;;  %949 = vrot.lane.b32.xlu0 %v942_v49, %s2432_s7  ;;  %v1075_v48 = vadd.f32 %v1072_v43, %v1067_v39  ;;  %v1097_v49 = vmul.f32 %v1095_v41, %v2618_v22  ;;  %v1163_v39 = vmul.f32 %v1160_v19, %v2628_v32  ;;  %v1318_v19 = vstv %s2295_s29  ;;  %s2299_s29 = sld [smem:[#allocation2 + $0x26]] }
 0x360   : > { %v1187_v43 = vmul.f32 %v1185_v31, %v2618_v22 }
 0x363   : > { %951 = vrot.lane.b32.xlu1 %v943_v55, %s2432_s7  ;;  %977 = vrot.lane.b32.xlu0 %v971_v56, %s2433_s9  ;;  %v1130_v55 = vstv %s2284_s13  ;;  %v1105_v56 = vadd.f32 %v1102_v53, %v1097_v49  ;;  %v1263_v49 = vstv %s2292_s23  ;;  %v1259_v53 = vmul.f32 %v1258_v46, %v2621_v23  ;;  %s2308_s13 = sld [smem:[#allocation2 + $0x43]] }
 0x364   : > { %v1131_v60 = vmul.f32 %v1130_v55, %v2612_v13  ;;  %v1133_v11 = vmul.f32 %v1130_v55, %v2628_v32  ;;  %v1132_v15 = vmul.f32 %v1130_v55, %v2609_v12  ;;  %v1288_v55 = vstv %s2293_s24  ;;  %s2322_s23 = sld [smem:[#allocation2 + $0x44]] }
 0x365   : > { %s2333_s24 = sld [smem:[#allocation2 + $0xd]] }
 0x366   : > { %v1134_v62 = vadd.f32 %v1131_v60, %v1126_v58  ;;  %v1293_v58 = vstv %s2294_s27  ;;  %s2334_s27 = sld [smem:[#allocation2 + $0x3e]] }
 0x367   : > { %979 = vrot.lane.b32.xlu1 %v972_v3, %s2433_s9  ;;  %981 = vrot.lane.b32.xlu0 %v973_v7, %s2433_s9  ;;  %v1128_v3 = vmul.f32 %v1125_v51, %v2615_v21  ;;  %v1127_v7 = vmul.f32 %v1125_v51, %v2618_v22 }
 0x369   : > { %v1136_v24 = vadd.f32 %v1133_v11, %v1128_v3  ;;  %v1135_v25 = vadd.f32 %v1132_v15, %v1127_v7  ;;  %v1294_v3 = vmul.f32 %v1293_v58, %v2612_v13  ;;  %v1290_v11 = vmul.f32 %v1288_v55, %v2618_v22 }
 0x36a   : > { %v1291_v15 = vmul.f32 %v1288_v55, %v2615_v21 }
 0x36b   : > { %1052 = vrot.lane.b32.xlu1 %v1045_v26, %s2428_s17  ;;  %1050 = vrot.lane.b32.xlu0 %v1044_v27, %s2428_s17  ;;  %v1157_v26 = vmul.f32 %v1155_v10, %v2618_v22  ;;  %v1156_v27 = vmul.f32 %v1155_v10, %v2621_v23 }
 0x36d   : > { %v1165_v0 = vadd.f32 %v1162_v33, %v1157_v26  ;;  %v1164_v1 = vadd.f32 %v1161_v34, %v1156_v27  ;;  %v1323_v26 = vstv %s2296_s30  ;;  %s2300_s30 = sld [smem:[#allocation2 + $0x57]] }
 0x36f   : > { %1080 = vrot.lane.b32.xlu1 %v1074_v6, %s2429_s21  ;;  %1054 = vrot.lane.b32.xlu0 %v1046_v38, %s2428_s17  ;;  %v1158_v6 = vmul.f32 %v1155_v10, %v2615_v21  ;;  %v1191_v38 = vmul.f32 %v1190_v35, %v2612_v13 }
 0x371   : > { %v1194_v40 = vadd.f32 %v1191_v38, %v1186_v17  ;;  %v1166_v41 = vadd.f32 %v1163_v39, %v1158_v6  ;;  %v1324_v17 = vmul.f32 %v1323_v26, %v2612_v13  ;;  %v1325_v6 = vmul.f32 %v1323_v26, %v2609_v12 }
 0x372   : > { %v2848_v38 = vstv %s2298_s8  ;;  %s2312_s8 = sld [smem:[#allocation2 + $0x51]] }
 0x373   : > { %1084 = vrot.lane.b32.xlu1 %v1076_v47, %s2429_s21  ;;  %1082 = vrot.lane.b32.xlu0 %v1075_v48, %s2429_s21  ;;  %v1193_v47 = vmul.f32 %v1190_v35, %v2628_v32  ;;  %v1192_v48 = vmul.f32 %v1190_v35, %v2609_v12  ;;  %v1319_v35 = vmul.f32 %v1318_v19, %v2621_v23 }
 0x375   : > { %v1196_v50 = vadd.f32 %v1193_v47, %v1188_v42  ;;  %v1195_v51 = vadd.f32 %v1192_v48, %v1187_v43  ;;  %v1321_v43 = vmul.f32 %v1318_v19, %v2615_v21  ;;  %v1481_v47 = vstv %s2305_s10  ;;  %s2323_s10 = sld [smem:[#allocation2 + $0x1a]] }
 0x376   : > { %v1326_v48 = vmul.f32 %v1323_v26, %v2628_v32 }
 0x377   : > { %1112 = vrot.lane.b32.xlu1 %v1105_v56, %s2430_s25  ;;  %1110 = vrot.lane.b32.xlu0 %v1104_v57, %s2430_s25  ;;  %v1264_v56 = vmul.f32 %v1263_v49, %v2612_v13  ;;  %v1265_v57 = vmul.f32 %v1263_v49, %v2609_v12 }
 0x379   : > { %v1267_v59 = vadd.f32 %v1264_v56, %v1259_v53  ;;  %v1268_v60 = vadd.f32 %v1265_v57, %v1260_v54  ;;  %v1329_v54 = vadd.f32 %v1326_v48, %v1321_v43  ;;  %v1482_v57 = vmul.f32 %v1481_v47, %v2621_v23 }
 0x37b   : > { %1140 = vrot.lane.b32.xlu1 %v1134_v62, %s2431_s28  ;;  %1114 = vrot.lane.b32.xlu0 %v1106_v63, %s2430_s25  ;;  %v1289_v62 = vmul.f32 %v1288_v55, %v2621_v23  ;;  %v1266_v63 = vmul.f32 %v1263_v49, %v2628_v32  ;;  %v1354_v49 = vmul.f32 %v2848_v38, %v2612_v13 }
 0x37d   : > { %v1269_v7 = vadd.f32 %v1266_v63, %v1261_v61  ;;  %v1297_v10 = vadd.f32 %v1294_v3, %v1289_v62  ;;  %v1483_v3 = vmul.f32 %v1481_v47, %v2618_v22 }
 0x37f   : > { %1144 = vrot.lane.b32.xlu1 %v1136_v24, %s2431_s28  ;;  %1142 = vrot.lane.b32.xlu0 %v1135_v25, %s2431_s28  ;;  %v1295_v24 = vmul.f32 %v1293_v58, %v2609_v12  ;;  %v1296_v25 = vmul.f32 %v1293_v58, %v2628_v32  ;;  %v1355_v58 = vmul.f32 %v2848_v38, %v2609_v12 }
 0x381   : > { %v1298_v33 = vadd.f32 %v1295_v24, %v1290_v11  ;;  %v1299_v34 = vadd.f32 %v1296_v25, %v1291_v15 }
 0x383   : > { %1172 = vrot.lane.b32.xlu1 %v1165_v0, %s2432_s7  ;;  %1170 = vrot.lane.b32.xlu0 %v1164_v1, %s2432_s7  ;;  %v1320_v0 = vmul.f32 %v1318_v19, %v2618_v22  ;;  %v2842_v1 = vstv %s2297_s6  ;;  %v1516_v19 = vstv %s2308_s13  ;;  %s2311_s6 = sld [smem:[#allocation2 + $0x20]] }
 0x384   : > { %v1349_v46 = vmul.f32 %v2842_v1, %v2621_v23  ;;  %v1350_v56 = vmul.f32 %v2842_v1, %v2618_v22  ;;  %s2301_s13 = sld [smem:[#allocation2 + $0x2d]] }
 0x385   : > { %v1328_v42 = vadd.f32 %v1325_v6, %v1320_v0  ;;  %v1704_v0 = vstv %s2319_s14  ;;  %v1518_v6 = vmul.f32 %v1516_v19, %v2609_v12  ;;  %s2302_s14 = sld [smem:[#allocation2 + $0x5e]] }
 0x386   : > { %v1357_v55 = vadd.f32 %v1354_v49, %v1349_v46  ;;  %v1358_v62 = vadd.f32 %v1355_v58, %v1350_v56  ;;  %v1705_v49 = vmul.f32 %v1704_v0, %v2621_v23 }
 0x387   : > { %1200 = vrot.lane.b32.xlu1 %v1194_v40, %s2433_s9  ;;  %1174 = vrot.lane.b32.xlu0 %v1166_v41, %s2432_s7  ;;  %v1327_v41 = vadd.f32 %v1324_v17, %v1319_v35  ;;  %v1517_v17 = vmul.f32 %v1516_v19, %v2612_v13 }
 0x38b   : > { %1204 = vrot.lane.b32.xlu1 %v1196_v50, %s2433_s9  ;;  %1202 = vrot.lane.b32.xlu0 %v1195_v51, %s2433_s9  ;;  %v1486_v50 = vstv %s2306_s11  ;;  %s2324_s11 = sld [smem:[#allocation2 + $0x4b]] }
 0x38c   : > { %v1488_v11 = vmul.f32 %v1486_v50, %v2609_v12  ;;  %v1489_v15 = vmul.f32 %v1486_v50, %v2628_v32 }
 0x38e   : > { %v1491_v26 = vadd.f32 %v1488_v11, %v1483_v3 }
 0x38f   : > { %1273 = vrot.lane.b32.xlu1 %v1267_v59, %s2428_s17  ;;  %1275 = vrot.lane.b32.xlu0 %v1268_v60, %s2428_s17  ;;  %v1487_v59 = vmul.f32 %v1486_v50, %v2612_v13  ;;  %v1519_v50 = vmul.f32 %v1516_v19, %v2628_v32 }
 0x391   : > { %v1490_v63 = vadd.f32 %v1487_v59, %v1482_v57  ;;  %v1706_v59 = vmul.f32 %v1704_v0, %v2618_v22 }
 0x393   : > { %1277 = vrot.lane.b32.xlu1 %v1269_v7, %s2428_s17  ;;  %1303 = vrot.lane.b32.xlu0 %v1297_v10, %s2429_s21  ;;  %v1484_v7 = vmul.f32 %v1481_v47, %v2615_v21  ;;  %v1511_v10 = vstv %s2307_s12  ;;  %s2335_s12 = sld [smem:[#allocation2 + $0x14]] }
 0x394   : > { %v1513_v35 = vmul.f32 %v1511_v10, %v2618_v22  ;;  %v1514_v48 = vmul.f32 %v1511_v10, %v2615_v21 }
 0x395   : > { %v2836_v27 = vpop.permute.xlu1 %633  ;;  %v2838_v31 = vpop.permute.xlu0 %635 }
 0x396   : > { %3603 = vst [vmem:[#allocation14_spill] sm:$0xff] %v2836_v27  ;;  %3604 = vst [vmem:[#allocation15_spill] sm:$0xff] %v2838_v31  ;;  %v1521_v47 = vadd.f32 %v1518_v6, %v1513_v35  ;;  %v1522_v57 = vadd.f32 %v1519_v50, %v1514_v48  ;;  %v1356_v35 = vmul.f32 %v2848_v38, %v2628_v32  ;;  %v1734_v48 = vstv %s2321_s22  ;;  %s2326_s22 = sld [smem:[#allocation2 + $0x52]] }
 0x397   : > { %1305 = vrot.lane.b32.xlu1 %v1298_v33, %s2429_s21  ;;  %1307 = vrot.lane.b32.xlu0 %v1299_v34, %s2429_s21  ;;  %v1492_v33 = vadd.f32 %v1489_v15, %v1484_v7  ;;  %v1512_v34 = vmul.f32 %v1511_v10, %v2621_v23  ;;  %v1546_v10 = vstv %s2310_s20  ;;  %v1739_v50 = vstv %s2322_s23  ;;  %s2325_s20 = sld [smem:[#allocation2 + $0x21]] }
 0x398   : > { %v1548_v38 = vmul.f32 %v1546_v10, %v2609_v12  ;;  %s2337_s23 = sld [smem:[#allocation2 + $0x1b]] }
 0x399   : > { %v2850_v39 = vpop.permute.xlu1 %637  ;;  %v2852_v40 = vpop.permute.xlu0 %662  ;;  %v1520_v46 = vadd.f32 %v1517_v17, %v1512_v34 }
 0x39a   : > { %3605 = vst [vmem:[#allocation16_spill] sm:$0xff] %v2850_v39  ;;  %3606 = vst [vmem:[#allocation17_spill] sm:$0xff] %v2852_v40 }
 0x39b   : > { %1333 = vrot.lane.b32.xlu1 %v1327_v41, %s2430_s25  ;;  %1335 = vrot.lane.b32.xlu0 %v1328_v42, %s2430_s25  ;;  %v1709_v41 = vstv %s2320_s15  ;;  %s2313_s15 = sld [smem:[#allocation2 + $0x27]] }
 0x39c   : > { %v1711_v3 = vmul.f32 %v1709_v41, %v2609_v12  ;;  %v1712_v7 = vmul.f32 %v1709_v41, %v2628_v32 }
 0x39d   : > { %v2862_v51 = vpop.permute.xlu1 %664  ;;  %v2864_v53 = vpop.permute.xlu0 %666 }
 0x39e   : > { %3607 = vst [vmem:[#allocation18_spill] sm:$0xff] %v2862_v51  ;;  %3608 = vst [vmem:[#allocation19_spill] sm:$0xff] %v2864_v53  ;;  %v1714_v19 = vadd.f32 %v1711_v3, %v1706_v59  ;;  %v1927_v3 = vstv %s2333_s24  ;;  %s3054_s24 = sld [smem:[#allocation2 + $0x2e]] }
 0x39f   : > { %1337 = vrot.lane.b32.xlu1 %v1329_v54, %s2430_s25  ;;  %1363 = vrot.lane.b32.xlu0 %v1357_v55, %s2431_s28  ;;  %v1710_v54 = vmul.f32 %v1709_v41, %v2612_v13 }
 0x3a1   : > { %v2874_v60 = vpop.permute.xlu1 %691  ;;  %v2876_v61 = vpop.permute.xlu0 %693  ;;  %v1713_v58 = vadd.f32 %v1710_v54, %v1705_v49  ;;  %v1549_v49 = vmul.f32 %v1546_v10, %v2628_v32 }
 0x3a2   : > { %3609 = vst [vmem:[#allocation20_spill] sm:$0xff] %v2874_v60  ;;  %3610 = vst [vmem:[#allocation21_spill] sm:$0xff] %v2876_v61 }
 0x3a3   : > { %1365 = vrot.lane.b32.xlu1 %v1358_v62, %s2431_s28  ;;  %1496 = vrot.lane.b32.xlu0 %v1490_v63, %s2428_s17  ;;  %v1707_v62 = vmul.f32 %v1704_v0, %v2615_v21  ;;  %v1541_v63 = vstv %s2309_s16  ;;  %v1547_v0 = vmul.f32 %v1546_v10, %v2612_v13  ;;  %v1741_v10 = vmul.f32 %v1739_v50, %v2609_v12  ;;  %s2314_s16 = sld [smem:[#allocation2 + $0x58]] }
 0x3a4   : > { %v1542_v34 = vmul.f32 %v1541_v63, %v2621_v23 }
 0x3a5   : > { %v2884_v24 = vpop.permute.xlu1 %695  ;;  %v2886_v25 = vpop.permute.xlu0 %720 }
 0x3a6   : > { %3611 = vst [vmem:[#allocation22_spill] sm:$0xff] %v2884_v24  ;;  %3612 = vst [vmem:[#allocation23_spill] sm:$0xff] %v2886_v25  ;;  %v1794_v25 = vstv %s2325_s20  ;;  %s3195_s20 = sld [smem:[#allocation2 + $0x35]] }
 0x3a7   : > { %1498 = vrot.lane.b32.xlu1 %v1491_v26, %s2428_s17  ;;  %1500 = vrot.lane.b32.xlu0 %v1492_v33, %s2428_s17  ;;  %v1715_v26 = vadd.f32 %v1712_v7, %v1707_v62  ;;  %v1351_v33 = vmul.f32 %v2842_v1, %v2615_v21  ;;  %v1543_v1 = vmul.f32 %v1541_v63, %v2618_v22 }
 0x3a8   : > { %v1735_v62 = vmul.f32 %v1734_v48, %v2621_v23  ;;  %v1740_v7 = vmul.f32 %v1739_v50, %v2612_v13 }
 0x3a9   : > { %v2894_v42 = vpop.permute.xlu1 %722  ;;  %v2896_v43 = vpop.permute.xlu0 %724  ;;  %v1359_v41 = vadd.f32 %v1356_v35, %v1351_v33 }
 0x3aa   : > { %3613 = vst [vmem:[#allocation24_spill] sm:$0xff] %v2894_v42  ;;  %3614 = vst [vmem:[#allocation25_spill] sm:$0xff] %v2896_v43 }
 0x3ab   : > { %1526 = vrot.lane.b32.xlu1 %v1520_v46, %s2429_s21  ;;  %1528 = vrot.lane.b32.xlu0 %v1521_v47, %s2429_s21  ;;  %v1550_v46 = vadd.f32 %v1547_v0, %v1542_v34  ;;  %v1544_v47 = vmul.f32 %v1541_v63, %v2615_v21  ;;  %v1736_v63 = vmul.f32 %v1734_v48, %v2618_v22 }
 0x3ac   : > { %v1743_v34 = vadd.f32 %v1740_v7, %v1735_v62  ;;  %v1737_v0 = vmul.f32 %v1734_v48, %v2615_v21  ;;  %v1929_v48 = vmul.f32 %v1927_v3, %v2618_v22  ;;  %v1378_v62 = vstv %s2299_s29  ;;  %s3074_s29 = sld [smem:[#allocation2 + $0x28]] }
 0x3ad   : > { %v2904_v55 = vpop.permute.xlu1 %749  ;;  %v2906_v56 = vpop.permute.xlu0 %751  ;;  %v1552_v59 = vadd.f32 %v1549_v49, %v1544_v47  ;;  %v1744_v35 = vadd.f32 %v1741_v10, %v1736_v63  ;;  %v1383_v7 = vstv %s2300_s30  ;;  %s3081_s30 = sld [smem:[#allocation2 + $0x59]] }
 0x3ae   : > { %3615 = vst [vmem:[#allocation26_spill] sm:$0xff] %v2904_v55  ;;  %3616 = vst [vmem:[#allocation27_spill] sm:$0xff] %v2906_v56 }
 0x3af   : > { %1530 = vrot.lane.b32.xlu1 %v1522_v57, %s2429_s21  ;;  %1719 = vrot.lane.b32.xlu0 %v1713_v58, %s2428_s17  ;;  %v1551_v58 = vadd.f32 %v1548_v38, %v1543_v1 }
 0x3b1   : > { %v2914_v11 = vpop.permute.xlu1 %753  ;;  %v2916_v15 = vpop.permute.xlu0 %778 }
 0x3b2   : > { %3617 = vst [vmem:[#allocation28_spill] sm:$0xff] %v2914_v11  ;;  %3618 = vst [vmem:[#allocation29_spill] sm:$0xff] %v2916_v15 }
 0x3b3   : > { %1721 = vrot.lane.b32.xlu1 %v1714_v19, %s2428_s17  ;;  %1723 = vrot.lane.b32.xlu0 %v1715_v26, %s2428_s17  ;;  %v1932_v19 = vstv %s2334_s27  ;;  %s3063_s27 = sld [smem:[#allocation2 + $0x5f]] }
 0x3b4   : > { %v1933_v1 = vmul.f32 %v1932_v19, %v2612_v13  ;;  %v1935_v63 = vmul.f32 %v1932_v19, %v2628_v32 }
 0x3b5   : > { %v2926_v17 = vpop.permute.xlu1 %780  ;;  %v2928_v6 = vpop.permute.xlu0 %782 }
 0x3b6   : > { %3619 = vst [vmem:[#allocation30_spill] sm:$0xff] %v2926_v17  ;;  %3620 = vst [vmem:[#allocation31_spill] sm:$0xff] %v2928_v6 }
 0x3b7   : > { %1367 = vrot.lane.b32.xlu1 %v1359_v41, %s2431_s28  ;;  %1556 = vrot.lane.b32.xlu0 %v1550_v46, %s2430_s25  ;;  %v1928_v41 = vmul.f32 %v1927_v3, %v2621_v23  ;;  %v1742_v46 = vmul.f32 %v1739_v50, %v2628_v32  ;;  %v1934_v50 = vmul.f32 %v1932_v19, %v2609_v12 }
 0x3b8   : > { %v1385_v19 = vmul.f32 %v1383_v7, %v2609_v12 }
 0x3b9   : > { %v2936_v54 = vpop.permute.xlu1 %827  ;;  %v2938_v57 = vpop.permute.xlu0 %829  ;;  %v1745_v49 = vadd.f32 %v1742_v46, %v1737_v0  ;;  %v1571_v46 = vstv %s2311_s6  ;;  %s3094_s6 = sld [smem:[#allocation2 + $0x34]] }
 0x3ba   : > { %v1572_v4 = vmul.f32 %v1571_v46, %v2621_v23 }
 0x3bb   : > { %1558 = vrot.lane.b32.xlu1 %v1551_v58, %s2430_s25  ;;  %1560 = vrot.lane.b32.xlu0 %v1552_v59, %s2430_s25  ;;  %v1936_v58 = vadd.f32 %v1933_v1, %v1928_v41  ;;  %v1930_v59 = vmul.f32 %v1927_v3, %v2615_v21  ;;  %v1379_v41 = vmul.f32 %v1378_v62, %v2621_v23 }
 0x3bc   : > { %v1380_v3 = vmul.f32 %v1378_v62, %v2618_v22  ;;  %v1384_v1 = vmul.f32 %v1383_v7, %v2612_v13 }
 0x3bd   : > { %v2946_v26 = vpop.permute.xlu1 %831  ;;  %v2948_v33 = vpop.permute.xlu0 %857  ;;  %v1938_v0 = vadd.f32 %v1935_v63, %v1930_v59  ;;  %v1381_v63 = vmul.f32 %v1378_v62, %v2615_v21  ;;  %v1573_v62 = vmul.f32 %v1571_v46, %v2618_v22 }
 0x3be   : > { %v1387_v59 = vadd.f32 %v1384_v1, %v1379_v41  ;;  %v1574_v1 = vmul.f32 %v1571_v46, %v2615_v21 }
 0x3bf   : > { %1749 = vrot.lane.b32.xlu1 %v1743_v34, %s2429_s21  ;;  %1751 = vrot.lane.b32.xlu0 %v1744_v35, %s2429_s21  ;;  %v1937_v35 = vadd.f32 %v1934_v50, %v1929_v48  ;;  %v1388_v50 = vadd.f32 %v1385_v19, %v1380_v3  ;;  %v1764_v19 = vstv %s2323_s10  ;;  %s3102_s10 = sld [smem:[#allocation2 + $0x22]] }
 0x3c0   : > { %v1766_v46 = vmul.f32 %v1764_v19, %v2618_v22 }
 0x3c1   : > { %v2956_v47 = vpop.permute.xlu1 %859  ;;  %v2958_v38 = vpop.permute.xlu0 %861 }
 0x3c3   : > { %1753 = vrot.lane.b32.xlu1 %v1745_v49, %s2429_s21  ;;  %1942 = vrot.lane.b32.xlu0 %v1936_v58, %s2428_s17  ;;  %v1576_v49 = vstv %s2312_s8  ;;  %s3098_s8 = sld [smem:[#allocation2 + $0x3]] }
 0x3c5   : > { %v2966_v10 = vpop.permute.xlu1 %887  ;;  %v2968_v34 = vpop.permute.xlu0 %889 }
 0x3c7   : > { %1944 = vrot.lane.b32.xlu1 %v1937_v35, %s2428_s17  ;;  %1946 = vrot.lane.b32.xlu0 %v1938_v0, %s2428_s17  ;;  %v1386_v35 = vmul.f32 %v1383_v7, %v2628_v32  ;;  %v1577_v0 = vmul.f32 %v1576_v49, %v2612_v13  ;;  %s2336_s17 = sld [smem:[#allocation2 + $0x45]]  ;;  %v1578_v7 = vmul.f32 %v1576_v49, %v2609_v12 }
 0x3c9   : > { %v2976_v58 = vpop.permute.xlu1 %891  ;;  %v2978_v48 = vpop.permute.xlu0 %917  ;;  %v1389_v41 = vadd.f32 %v1386_v35, %v1381_v63  ;;  %v1580_v3 = vadd.f32 %v1577_v0, %v1572_v4  ;;  %v1581_v63 = vadd.f32 %v1578_v7, %v1573_v62  ;;  %v1765_v35 = vmul.f32 %v1764_v19, %v2621_v23 }
 0x3ca   : > { %v1957_v0 = vstv %s2335_s12  ;;  %s3111_s12 = sld [smem:[#allocation2 + $0x2f]] }
 0x3cb   : > { %1393 = vrot.lane.b32.xlu1 %v1387_v59, %s2432_s7  ;;  %1395 = vrot.lane.b32.xlu0 %v1388_v50, %s2432_s7  ;;  %v1579_v59 = vmul.f32 %v1576_v49, %v2628_v32  ;;  %v1769_v50 = vstv %s2324_s11  ;;  %v1958_v28 = vmul.f32 %v1957_v0, %v2621_v23  ;;  %s3108_s11 = sld [smem:[#allocation2 + $0x53]] }
 0x3cc   : > { %v1771_v49 = vmul.f32 %v1769_v50, %v2609_v12 }
 0x3cd   : > { %v2986_v9 = vpop.permute.xlu1 %919  ;;  %v2988_v29 = vpop.permute.xlu0 %921  ;;  %v1582_v4 = vadd.f32 %v1579_v59, %v1574_v1  ;;  %v1767_v59 = vmul.f32 %v1764_v19, %v2615_v21  ;;  %v1959_v19 = vmul.f32 %v1957_v0, %v2618_v22 }
 0x3ce   : > { %v1774_v7 = vadd.f32 %v1771_v49, %v1766_v46  ;;  %v1408_v49 = vstv %s2301_s13  ;;  %s3160_s13 = sld [smem:[#allocation2 + $0x5a]] }
 0x3cf   : > { %1397 = vrot.lane.b32.xlu1 %v1389_v41, %s2432_s7  ;;  %1586 = vrot.lane.b32.xlu0 %v1580_v3, %s2431_s28  ;;  %v1770_v41 = vmul.f32 %v1769_v50, %v2612_v13  ;;  %v1962_v3 = vstv %s2336_s17  ;;  %s3142_s17 = sld [smem:[#allocation2 + $0x29]] }
 0x3d1   : > { %v2996_v30 = vpop.permute.xlu1 %947  ;;  %v2998_v2 = vpop.permute.xlu0 %949  ;;  %v1773_v1 = vadd.f32 %v1770_v41, %v1765_v35  ;;  %v1960_v41 = vmul.f32 %v1957_v0, %v2615_v21  ;;  %v1601_v0 = vstv %s2313_s15  ;;  %s3179_s15 = sld [smem:[#allocation2 + $0x61]] }
 0x3d3   : > { %1588 = vrot.lane.b32.xlu1 %v1581_v63, %s2431_s28  ;;  %1590 = vrot.lane.b32.xlu0 %v1582_v4, %s2431_s28  ;;  %v1772_v63 = vmul.f32 %v1769_v50, %v2628_v32  ;;  %v1963_v4 = vmul.f32 %v1962_v3, %v2612_v13  ;;  %v1964_v50 = vmul.f32 %v1962_v3, %v2609_v12 }
 0x3d5   : > { %v3006_v8 = vpop.permute.xlu1 %951  ;;  %v3008_v62 = vpop.permute.xlu0 %977  ;;  %v1775_v35 = vadd.f32 %v1772_v63, %v1767_v59  ;;  %v1966_v46 = vadd.f32 %v1963_v4, %v1958_v28  ;;  %v1967_v17 = vadd.f32 %v1964_v50, %v1959_v19  ;;  %v1409_v28 = vmul.f32 %v1408_v49, %v2621_v23 }
 0x3d6   : > { %3621 = vst [vmem:[#allocation32_spill] sm:$0xff] %v3008_v62  ;;  %v1410_v63 = vmul.f32 %v1408_v49, %v2618_v22  ;;  %v1411_v50 = vmul.f32 %v1408_v49, %v2615_v21  ;;  %v1603_v49 = vmul.f32 %v1601_v0, %v2618_v22 }
 0x3d7   : > { %1779 = vrot.lane.b32.xlu1 %v1773_v1, %s2430_s25  ;;  %1781 = vrot.lane.b32.xlu0 %v1774_v7, %s2430_s25  ;;  %v1965_v1 = vmul.f32 %v1962_v3, %v2628_v32  ;;  %v1413_v7 = vstv %s2302_s14  ;;  %v1606_v3 = vstv %s2314_s16  ;;  %s3167_s14 = sld [smem:[#allocation2 + $0x30]] }
 0x3d8   : > { %v1414_v4 = vmul.f32 %v1413_v7, %v2612_v13  ;;  %s3192_s16 = sld [smem:[#allocation2 + $0x4]] }
 0x3d9   : > { %v3016_v16 = vpop.permute.xlu1 %979  ;;  %v3018_v18 = vpop.permute.xlu0 %981  ;;  %v1968_v59 = vadd.f32 %v1965_v1, %v1960_v41  ;;  %v1602_v1 = vmul.f32 %v1601_v0, %v2621_v23 }
 0x3da   : > { %v1417_v19 = vadd.f32 %v1414_v4, %v1409_v28  ;;  %v1604_v4 = vmul.f32 %v1601_v0, %v2615_v21 }
 0x3db   : > { %1783 = vrot.lane.b32.xlu1 %v1775_v35, %s2430_s25  ;;  %1972 = vrot.lane.b32.xlu0 %v1966_v46, %s2429_s21  ;;  %v1415_v35 = vmul.f32 %v1413_v7, %v2609_v12 }
 0x3dd   : > { %v1053_v15 = vpop.permute.xlu1 %1052  ;;  %v1051_v55 = vpop.permute.xlu0 %1050  ;;  %v1418_v41 = vadd.f32 %v1415_v35, %v1410_v63  ;;  %v1608_v35 = vmul.f32 %v1606_v3, %v2609_v12 }
 0x3de   : > { %v1056_v0 = vsel %vm639_vm6, %v1051_v55, %v1053_v15 }
 0x3df   : > { %1974 = vrot.lane.b32.xlu1 %v1967_v17, %s2429_s21  ;;  %1976 = vrot.lane.b32.xlu0 %v1968_v59, %s2429_s21  ;;  %v1416_v17 = vmul.f32 %v1413_v7, %v2628_v32  ;;  %v1607_v59 = vmul.f32 %v1606_v3, %v2612_v13  ;;  %s2338_s21 = sld [smem:[#allocation2 + $0x4c]]  ;;  %v1609_v7 = vmul.f32 %v1606_v3, %v2628_v32 }
 0x3e1   : > { %v1081_v46 = vpop.permute.xlu1 %1080  ;;  %v3032_v6 = vpop.permute.xlu0 %1054  ;;  %v1419_v28 = vadd.f32 %v1416_v17, %v1411_v50  ;;  %v1610_v63 = vadd.f32 %v1607_v59, %v1602_v1  ;;  %v1611_v50 = vadd.f32 %v1608_v35, %v1603_v49  ;;  %v1612_v1 = vadd.f32 %v1609_v7, %v1604_v4 }
 0x3e2   : > { %v1796_v17 = vmul.f32 %v1794_v25, %v2618_v22  ;;  %v1057_v59 = vsel %vm639_vm6, %v1053_v15, %v3032_v6  ;;  %v1797_v35 = vmul.f32 %v1794_v25, %v2615_v21  ;;  %v1061_v7 = vadd.f32 %v1056_v0, %v2769_v5 }
 0x3e3   : > { %1423 = vrot.lane.b32.xlu1 %v1417_v19, %s2433_s9  ;;  %1425 = vrot.lane.b32.xlu0 %v1418_v41, %s2433_s9  ;;  %v1799_v19 = vstv %s2326_s22  ;;  %v1795_v41 = vmul.f32 %v1794_v25, %v2621_v23  ;;  %v1062_v43 = vadd.f32 %v1057_v59, %v2780_v45  ;;  %s2318_s22 = sld [smem:[#allocation2 + $0x36]] }
 0x3e4   : > { %v1801_v3 = vmul.f32 %v1799_v19, %v2609_v12 }
 0x3e5   : > { %v3040_v56 = vpop.permute.xlu1 %1084  ;;  %v1083_v11 = vpop.permute.xlu0 %1082  ;;  %v1992_v49 = vstv %s2338_s21  ;;  %s2331_s21 = sld [smem:[#allocation2 + $0x6]] }
 0x3e6   : > { %v1086_v4 = vsel %vm668_vm7, %v1081_v46, %v1083_v11  ;;  %v1087_v55 = vsel %vm668_vm7, %v1083_v11, %v3040_v56  ;;  %v1993_v5 = vmul.f32 %v1992_v49, %v2612_v13 }
 0x3e7   : > { %1427 = vrot.lane.b32.xlu1 %v1419_v28, %s2433_s9  ;;  %1616 = vrot.lane.b32.xlu0 %v1610_v63, %s2432_s7  ;;  %v1800_v28 = vmul.f32 %v1799_v19, %v2612_v13  ;;  %v1987_v63 = vstv %s2337_s23  ;;  %v1091_v25 = vadd.f32 %v1086_v4, %v1061_v7  ;;  %s2436_s23 = smov 125  }
 0x3e8   : > { %v1988_v61 = vmul.f32 %v1987_v63, %v2621_v23  ;;  %v1989_v45 = vmul.f32 %v1987_v63, %v2618_v22 }
 0x3e9   : > { %v1113_v60 = vpop.permute.xlu1 %1112  ;;  %v1111_v42 = vpop.permute.xlu0 %1110  ;;  %v1803_v15 = vadd.f32 %v1800_v28, %v1795_v41  ;;  %v1802_v41 = vmul.f32 %v1799_v19, %v2628_v32  ;;  %v1092_v28 = vadd.f32 %v1087_v55, %v1062_v43  ;;  %v1994_v55 = vmul.f32 %v1992_v49, %v2609_v12 }
 0x3ea   : > { %v1116_v46 = vsel %vm697_vm8, %v1111_v42, %v1113_v60  ;;  %v1990_v42 = vmul.f32 %v1987_v63, %v2615_v21  ;;  %v1996_v59 = vadd.f32 %v1993_v5, %v1988_v61  ;;  %v1824_v5 = vstv %s3074_s29  ;;  %s2438_s29 = smov 123  }
 0x3eb   : > { %1618 = vrot.lane.b32.xlu1 %v1611_v50, %s2432_s7  ;;  %1620 = vrot.lane.b32.xlu0 %v1612_v1, %s2432_s7  ;;  %v1804_v1 = vadd.f32 %v1801_v3, %v1796_v17  ;;  %v1805_v0 = vadd.f32 %v1802_v41, %v1797_v35  ;;  %v1636_v35 = vstv %s3063_s27  ;;  %s2437_s27 = smov 124  }
 0x3ed   : > { %v1141_v50 = vpop.permute.xlu1 %1140  ;;  %v3067_v40 = vpop.permute.xlu0 %1114 }
 0x3ee   : > { %v1117_v11 = vsel %vm697_vm8, %v1113_v60, %v3067_v40  ;;  %v1121_v60 = vadd.f32 %v1116_v46, %v1091_v25  ;;  %v1997_v46 = vadd.f32 %v1994_v55, %v1989_v45  ;;  %v1638_v45 = vmul.f32 %v1636_v35, %v2609_v12 }
 0x3ef   : > { %1809 = vrot.lane.b32.xlu1 %v1803_v15, %s2431_s28  ;;  %1811 = vrot.lane.b32.xlu0 %v1804_v1, %s2431_s28  ;;  %v1122_v19 = vadd.f32 %v1117_v11, %v1092_v28  ;;  %v1631_v15 = vstv %s3054_s24  ;;  %v1995_v1 = vmul.f32 %v1992_v49, %v2628_v32  ;;  %s2332_s24 = sld [smem:[#allocation2 + $0x37]] }
 0x3f0   : > { %v1632_v41 = vmul.f32 %v1631_v15, %v2621_v23  ;;  %v1633_v25 = vmul.f32 %v1631_v15, %v2618_v22 }
 0x3f1   : > { %v3083_v17 = vpop.permute.xlu1 %1144  ;;  %v1143_v43 = vpop.permute.xlu0 %1142  ;;  %v1998_v11 = vadd.f32 %v1995_v1, %v1990_v42  ;;  %v1829_v42 = vstv %s3081_s30  ;;  %v1639_v1 = vmul.f32 %v1636_v35, %v2628_v32  ;;  %s2439_s30 = smov 122  }
 0x3f2   : > { %v1146_v3 = vsel %vm726_vm9, %v1141_v50, %v1143_v43  ;;  %v1147_v4 = vsel %vm726_vm9, %v1143_v43, %v3083_v17 }
 0x3f3   : > { %v1151_v7 = vadd.f32 %v1146_v3, %v1121_v60  ;;  %v1152_v63 = vadd.f32 %v1147_v4, %v1122_v19  ;;  %1813 = vrot.lane.b32.xlu1 %v1805_v0, %s2431_s28  ;;  %2002 = vrot.lane.b32.xlu0 %v1996_v59, %s2430_s25  ;;  %v1637_v60 = vmul.f32 %v1636_v35, %v2612_v13 }
 0x3f4   : > { %v1641_v59 = vadd.f32 %v1638_v45, %v1633_v25  ;;  %v1634_v3 = vmul.f32 %v1631_v15, %v2615_v21  ;;  %v1825_v4 = vmul.f32 %v1824_v5, %v2621_v23 }
 0x3f5   : > { %v1173_v61 = vpop.permute.xlu1 %1172  ;;  %v1171_v50 = vpop.permute.xlu0 %1170  ;;  %v1640_v0 = vadd.f32 %v1637_v60, %v1632_v41  ;;  %v1827_v41 = vmul.f32 %v1824_v5, %v2615_v21  ;;  %v2017_v60 = vstv %s3102_s10 }
 0x3f6   : > { %v1176_v28 = vsel %vm755_vm10, %v1171_v50, %v1173_v61  ;;  %v1830_v50 = vmul.f32 %v1829_v42, %v2612_v13  ;;  %v2020_v51 = vmul.f32 %v2017_v60, %v2615_v21 }
 0x3f7   : > { %v1181_v49 = vadd.f32 %v1176_v28, %v1151_v7  ;;  %2004 = vrot.lane.b32.xlu1 %v1997_v46, %s2430_s25  ;;  %2006 = vrot.lane.b32.xlu0 %v1998_v11, %s2430_s25  ;;  %s3123_s25 = sld [smem:[#allocation2 + $0x60]]  ;;  %v1642_v11 = vadd.f32 %v1639_v1, %v1634_v3  ;;  %v1831_v28 = vmul.f32 %v1829_v42, %v2609_v12 }
 0x3f8   : > { %v1832_v3 = vmul.f32 %v1829_v42, %v2628_v32 }
 0x3f9   : > { %v1201_v19 = vpop.permute.xlu1 %1200  ;;  %v3113_v43 = vpop.permute.xlu0 %1174 }
 0x3fa   : > { %v1177_v55 = vsel %vm755_vm10, %v1173_v61, %v3113_v43  ;;  %v1826_v61 = vmul.f32 %v1824_v5, %v2618_v22  ;;  %v1247_v5 = vstv %s3094_s6  ;;  %s605_s6 = sld [smem:[#allocation2]] }
 0x3fb   : > { %v1182_v7 = vadd.f32 %v1177_v55, %v1152_v63  ;;  %1646 = vrot.lane.b32.xlu1 %v1640_v0, %s2433_s9  ;;  %1648 = vrot.lane.b32.xlu0 %v1641_v59, %s2433_s9  ;;  %v1833_v63 = vadd.f32 %v1830_v50, %v1825_v4  ;;  %v1242_v59 = vstv %s3098_s8  ;;  %v1854_v4 = vstv %s3111_s12  ;;  %s2248_s8 = sld [smem:[#allocation2 + $0x31]] }
 0x3fc   : > { %v1834_v50 = vadd.f32 %v1831_v28, %v1826_v61  ;;  %v1244_v61 = vmul.f32 %v1242_v59, %v2618_v22  ;;  %v1855_v53 = vmul.f32 %v1854_v4, %v2621_v23 }
 0x3fd   : > { %v3125_v15 = vpop.permute.xlu1 %1204  ;;  %v1203_v46 = vpop.permute.xlu0 %1202  ;;  %v1859_v28 = vstv %s3123_s25 }
 0x3fe   : > { %v1206_v35 = vsel %vm784_vm11, %v1201_v19, %v1203_v46  ;;  %v1207_v25 = vsel %vm784_vm11, %v1203_v46, %v3125_v15  ;;  %v2022_v19 = vstv %s3108_s11  ;;  %v2019_v46 = vmul.f32 %v2017_v60, %v2618_v22 }
 0x3ff   : > { %v3134_v45 = vadd.f32 %v1206_v35, %v1181_v49  ;;  %v3136_v0 = vadd.f32 %v1207_v25, %v1182_v7  ;;  %1650 = vrot.lane.b32.xlu1 %v1642_v11, %s2433_s9  ;;  %1839 = vrot.lane.b32.xlu0 %v1833_v63, %s2432_s7  ;;  %v1835_v49 = vadd.f32 %v1832_v3, %v1827_v41 }
 0x400   : > { %v2018_v7 = vmul.f32 %v2017_v60, %v2621_v23  ;;  %v799_v11 = vmul.f32 %v2711_v36, %v2615_v21  ;;  %v1243_v63 = vmul.f32 %v1242_v59, %v2621_v23  ;;  %v1245_v35 = vmul.f32 %v1242_v59, %v2615_v21 }
 0x401   : > { %3622 = vst [vmem:[#allocation33_spill] sm:$0xff] %v3136_v0  ;;  %v1274_v55 = vpop.permute.xlu1 %1273  ;;  %v1276_v1 = vpop.permute.xlu0 %1275  ;;  %v2023_v41 = vmul.f32 %v2022_v19, %v2612_v13  ;;  %v2024_v25 = vmul.f32 %v2022_v19, %v2609_v12  ;;  %v804_v36 = vmul.f32 %v2713_v37, %v2628_v32  ;;  %v1248_v3 = vmul.f32 %v1247_v5, %v2612_v13 }
 0x402   : > { %v1279_v42 = vsel %vm639_vm6, %v1274_v55, %v1276_v1  ;;  %v1249_v55 = vmul.f32 %v1247_v5, %v2609_v12  ;;  %v1022_v37 = vmul.f32 %v2750_v14, %v2615_v21  ;;  %v1027_v60 = vmul.f32 %v2756_v20, %v2628_v32 }
 0x403   : > { %1841 = vrot.lane.b32.xlu1 %v1834_v50, %s2432_s7  ;;  %1843 = vrot.lane.b32.xlu0 %v1835_v49, %s2432_s7  ;;  %v1250_v50 = vmul.f32 %v1247_v5, %v2628_v32  ;;  %v2026_v24 = vadd.f32 %v2023_v41, %v2018_v7  ;;  %v2027_v27 = vadd.f32 %v2024_v25, %v2019_v46  ;;  %v2047_v46 = vstv %s3142_s17 }
 0x404   : > { %v1251_v31 = vadd.f32 %v1248_v3, %v1243_v63  ;;  %v1252_v62 = vadd.f32 %v1249_v55, %v1244_v61  ;;  %v2025_v5 = vmul.f32 %v2022_v19, %v2628_v32  ;;  %v1860_v7 = vmul.f32 %v1859_v28, %v2612_v13 }
 0x405   : > { %v1278_v59 = vpop.permute.xlu1 %1277  ;;  %v1304_v49 = vpop.permute.xlu0 %1303  ;;  %v1253_v39 = vadd.f32 %v1250_v50, %v1245_v35  ;;  %v1856_v63 = vmul.f32 %v1854_v4, %v2618_v22  ;;  %v1861_v20 = vmul.f32 %v1859_v28, %v2609_v12 }
 0x406   : > { %v1280_v0 = vsel %vm639_vm6, %v1276_v1, %v1278_v59  ;;  %v1857_v1 = vmul.f32 %v1854_v4, %v2615_v21  ;;  %v1284_v35 = vadd.f32 %v1279_v42, %v1251_v31  ;;  %v2028_v19 = vadd.f32 %v2025_v5, %v2020_v51 }
 0x407   : > { %2032 = vrot.lane.b32.xlu1 %v2026_v24, %s2431_s28  ;;  %2034 = vrot.lane.b32.xlu0 %v2027_v27, %s2431_s28  ;;  %v1286_v14 = vadd.f32 %v1278_v59, %v1253_v39  ;;  %v1285_v24 = vadd.f32 %v1280_v0, %v1252_v62  ;;  %v1863_v41 = vadd.f32 %v1860_v7, %v1855_v53  ;;  %v2052_v62 = vstv %s3160_s13 }
 0x408   : > { %v1862_v31 = vmul.f32 %v1859_v28, %v2628_v32  ;;  %v807_v51 = vadd.f32 %v804_v36, %v799_v11  ;;  %v1030_v53 = vadd.f32 %v1027_v60, %v1022_v37  ;;  %v2077_v0 = vstv %s3167_s14  ;;  %s238_s14 = scalar_lea.vmem %s3576_s5, %s2349_s26 }
 0x409   : > { %v1306_v61 = vpop.permute.xlu1 %1305  ;;  %v1308_v27 = vpop.permute.xlu0 %1307  ;;  %v1864_v59 = vadd.f32 %v1861_v20, %v1856_v63  ;;  %v2048_v5 = vmul.f32 %v2047_v46, %v2621_v23  ;;  %v2049_v7 = vmul.f32 %v2047_v46, %v2618_v22  ;;  %v2053_v28 = vmul.f32 %v2052_v62, %v2612_v13 }
 0x40a   : > { %v1309_v25 = vsel %vm668_vm7, %v1304_v49, %v1306_v61  ;;  %v1310_v3 = vsel %vm668_vm7, %v1306_v61, %v1308_v27  ;;  %v1316_v55 = vadd.f32 %v1308_v27, %v1286_v14  ;;  %v1865_v49 = vadd.f32 %v1862_v31, %v1857_v1 }
 0x40b   : > { %v1314_v39 = vadd.f32 %v1309_v25, %v1284_v35  ;;  %v1315_v50 = vadd.f32 %v1310_v3, %v1285_v24  ;;  %2036 = vrot.lane.b32.xlu1 %v2028_v19, %s2431_s28  ;;  %1869 = vrot.lane.b32.xlu0 %v1863_v41, %s2433_s9  ;;  %v2054_v35 = vmul.f32 %v2052_v62, %v2609_v12  ;;  %v2082_v60 = vstv %s3179_s15  ;;  %s2434_s28 = smov 127  }
 0x40c   : > { %v840_v11 = vadd.f32 %v2946_v26, %v807_v51  ;;  %v1063_v36 = vadd.f32 %v3032_v6, %v1030_v53  ;;  %v2050_v63 = vmul.f32 %v2047_v46, %v2615_v21  ;;  %v2078_v1 = vmul.f32 %v2077_v0, %v2621_v23 }
 0x40d   : > { %v1334_v4 = vpop.permute.xlu1 %1333  ;;  %v1336_v42 = vpop.permute.xlu0 %1335  ;;  %v2056_v41 = vadd.f32 %v2053_v28, %v2048_v5  ;;  %v2057_v6 = vadd.f32 %v2054_v35, %v2049_v7  ;;  %v2055_v20 = vmul.f32 %v2052_v62, %v2628_v32  ;;  %v2083_v46 = vmul.f32 %v2082_v60, %v2612_v13 }
 0x40e   : > { %v1339_v14 = vsel %vm697_vm8, %v1334_v4, %v1336_v42  ;;  %v870_v24 = vadd.f32 %v2958_v38, %v840_v11  ;;  %v1093_v61 = vadd.f32 %v3040_v56, %v1063_v36  ;;  %v1465_v56 = vstv %s3192_s16 }
 0x40f   : > { %v1344_v37 = vadd.f32 %v1339_v14, %v1314_v39  ;;  %1871 = vrot.lane.b32.xlu1 %v1864_v59, %s2433_s9  ;;  %1873 = vrot.lane.b32.xlu0 %v1865_v49, %s2433_s9  ;;  %v2058_v53 = vadd.f32 %v2055_v20, %v2050_v63  ;;  %v2086_v4 = vadd.f32 %v2083_v46, %v2078_v1 }
 0x410   : > { %v900_v39 = vadd.f32 %v2976_v58, %v870_v24  ;;  %v1123_v31 = vadd.f32 %v3067_v40, %v1093_v61  ;;  %v2079_v5 = vmul.f32 %v2077_v0, %v2618_v22  ;;  %v2080_v40 = vmul.f32 %v2077_v0, %v2615_v21 }
 0x411   : > { %v1338_v27 = vpop.permute.xlu1 %1337  ;;  %v1364_v19 = vpop.permute.xlu0 %1363  ;;  %v1466_v7 = vmul.f32 %v1465_v56, %v2621_v23  ;;  %v2084_v14 = vmul.f32 %v2082_v60, %v2609_v12  ;;  %v2085_v28 = vmul.f32 %v2082_v60, %v2628_v32 }
 0x412   : > { %v1340_v25 = vsel %vm697_vm8, %v1336_v42, %v1338_v27  ;;  %v3212_v3 = vadd.f32 %v1338_v27, %v1316_v55  ;;  %v1470_v42 = vstv %s3195_s20  ;;  %v930_v55 = vadd.f32 %v2988_v29, %v900_v39 }
 0x413   : > { %v3218_v51 = vadd.f32 %v1340_v25, %v1315_v50  ;;  %2062 = vrot.lane.b32.xlu1 %v2056_v41, %s2432_s7  ;;  %2064 = vrot.lane.b32.xlu0 %v2057_v6, %s2432_s7  ;;  %v1153_v62 = vadd.f32 %v3083_v17, %v1123_v31  ;;  %v1471_v17 = vmul.f32 %v1470_v42, %v2612_v13 }
 0x414   : > { %v960_v35 = vadd.f32 %v3006_v8, %v930_v55  ;;  %v2087_v61 = vadd.f32 %v2084_v14, %v2079_v5  ;;  %v2088_v60 = vadd.f32 %v2085_v28, %v2080_v40  ;;  %v1467_v41 = vmul.f32 %v1465_v56, %v2618_v22 }
 0x415   : > { %v1366_v59 = vpop.permute.xlu1 %1365  ;;  %v1497_v49 = vpop.permute.xlu0 %1496  ;;  %v1183_v11 = vadd.f32 %v3113_v43, %v1153_v62  ;;  %v1468_v43 = vmul.f32 %v1465_v56, %v2615_v21  ;;  %v1473_v6 = vmul.f32 %v1470_v42, %v2628_v32  ;;  %v1472_v46 = vmul.f32 %v1470_v42, %v2609_v12 }
 0x416   : > { %v1369_v50 = vsel %vm726_vm9, %v1364_v19, %v1366_v59  ;;  %v990_v0 = vadd.f32 %v3018_v18, %v960_v35  ;;  %v1474_v19 = vadd.f32 %v1471_v17, %v1466_v7 }
 0x417   : > { %v3234_v36 = vadd.f32 %v1369_v50, %v1344_v37  ;;  %2066 = vrot.lane.b32.xlu1 %v2058_v53, %s2432_s7  ;;  %2092 = vrot.lane.b32.xlu0 %v2086_v4, %s2433_s9  ;;  %v1213_v63 = vadd.f32 %v3125_v15, %v1183_v11  ;;  %v1476_v53 = vadd.f32 %v1473_v6, %v1468_v43  ;;  %s2435_s7 = smov 126  }
 0x418   : > { %v996_v15 = vrot.slane %v990_v0, 7  ;;  %v1475_v55 = vadd.f32 %v1472_v46, %v1467_v41 }
 0x419   : > { %v1499_v1 = vpop.permute.xlu1 %1498  ;;  %v1501_v24 = vpop.permute.xlu0 %1500  ;;  %v1219_v25 = vrot.slane %v1213_v63, 6 }
 0x41a   : > { %v1502_v27 = vsel %vm639_vm6, %v1497_v49, %v1499_v1  ;;  %v1503_v37 = vsel %vm639_vm6, %v1499_v1, %v1501_v24  ;;  %v1509_v56 = vadd.f32 %v1501_v24, %v1476_v53  ;;  %v1693_v1 = vstv %s2318_s22 }
 0x41b   : > { %2094 = vrot.lane.b32.xlu1 %v2087_v61, %s2433_s9  ;;  %2096 = vrot.lane.b32.xlu0 %v2088_v60, %s2433_s9  ;;  %v1507_v20 = vadd.f32 %v1502_v27, %v1474_v19  ;;  %s2317_s9 = sld [smem:[#allocation2 + $0x5]]  ;;  %v1508_v49 = vadd.f32 %v1503_v37, %v1475_v55  ;;  %v1694_v27 = vmul.f32 %v1693_v1, %v2612_v13 }
 0x41d   : > { %v1527_v39 = vpop.permute.xlu1 %1526  ;;  %v1529_v31 = vpop.permute.xlu0 %1528 }
 0x41e   : > { %v1532_v4 = vsel %vm668_vm7, %v1527_v39, %v1529_v31  ;;  %v1695_v39 = vmul.f32 %v1693_v1, %v2609_v12 }
 0x41f   : > { %v1537_v62 = vadd.f32 %v1532_v4, %v1507_v20  ;;  %1001 = vrot.lane.b32.xlu1 %v996_v15, %s2434_s28  ;;  %1224 = vrot.lane.b32.xlu0 %v1219_v25, %s2435_s7 }
 0x421   : > { %v1531_v5 = vpop.permute.xlu1 %1530  ;;  %v1720_v40 = vpop.permute.xlu0 %1719  ;;  %v1688_v17 = vstv %s2317_s9 }
 0x422   : > { %v1533_v42 = vsel %vm668_vm7, %v1529_v31, %v1531_v5  ;;  %v3253_v50 = vadd.f32 %v1531_v5, %v1509_v56  ;;  %v1689_v61 = vmul.f32 %v1688_v17, %v2621_v23  ;;  %v1691_v19 = vmul.f32 %v1688_v17, %v2615_v21 }
 0x423   : > { %v1538_v7 = vadd.f32 %v1533_v42, %v1508_v49 }
 0x424   : > { %v1697_v15 = vadd.f32 %v1694_v27, %v1689_v61 }
 0x425   : > { %v1722_v14 = vpop.permute.xlu1 %1721  ;;  %v1724_v28 = vpop.permute.xlu0 %1723 }
 0x426   : > { %v1725_v35 = vsel %vm639_vm6, %v1720_v40, %v1722_v14  ;;  %v1726_v11 = vsel %vm639_vm6, %v1722_v14, %v1724_v28 }
 0x427   : > { %v1730_v46 = vadd.f32 %v1725_v35, %v1697_v15 }
 0x429   : > { %v1368_v0 = vpop.permute.xlu1 %1367  ;;  %v1557_v63 = vpop.permute.xlu0 %1556 }
 0x42a   : > { %v1370_v24 = vsel %vm726_vm9, %v1366_v59, %v1368_v0  ;;  %v1690_v59 = vmul.f32 %v1688_v17, %v2618_v22 }
 0x42b   : > { %v3260_v60 = vadd.f32 %v1370_v24, %v3218_v51  ;;  %v1696_v51 = vmul.f32 %v1693_v1, %v2628_v32 }
 0x42c   : > { %v1698_v56 = vadd.f32 %v1695_v39, %v1690_v59 }
 0x42d   : > { %v1559_v43 = vpop.permute.xlu1 %1558  ;;  %v3263_v37 = vpop.permute.xlu0 %1560  ;;  %v1699_v4 = vadd.f32 %v1696_v51, %v1691_v19 }
 0x42e   : > { %v1562_v41 = vsel %vm697_vm8, %v1557_v63, %v1559_v43  ;;  %v1563_v6 = vsel %vm697_vm8, %v1559_v43, %v3263_v37  ;;  %v1731_v40 = vadd.f32 %v1726_v11, %v1698_v56 }
 0x42f   : > { %v3270_v25 = vadd.f32 %v1562_v41, %v1537_v62  ;;  %v1568_v20 = vadd.f32 %v1563_v6, %v1538_v7  ;;  %v1732_v5 = vadd.f32 %v1724_v28, %v1699_v4 }
 0x431   : > { %v1750_v31 = vpop.permute.xlu1 %1749  ;;  %v1752_v53 = vpop.permute.xlu0 %1751 }
 0x432   : > { %v1755_v55 = vsel %vm668_vm7, %v1750_v31, %v1752_v53 }
 0x433   : > { %v1760_v49 = vadd.f32 %v1755_v55, %v1730_v46 }
 0x435   : > { %v1754_v42 = vpop.permute.xlu1 %1753  ;;  %v1943_v14 = vpop.permute.xlu0 %1942 }
 0x436   : > { %v1756_v62 = vsel %vm668_vm7, %v1752_v53, %v1754_v42  ;;  %v3276_v17 = vadd.f32 %v1754_v42, %v1732_v5  ;;  %v1376_v5 = vadd.f32 %v1368_v0, %v3212_v3  ;;  %v834_v3 = vsel %vm639_vm6, %v2938_v57, %v2946_v26 }
 0x437   : > { %v3278_v7 = vadd.f32 %v1756_v62, %v1731_v40  ;;  %v864_v0 = vsel %vm668_vm7, %v2956_v47, %v2958_v38  ;;  %v924_v26 = vsel %vm726_vm9, %v2986_v9, %v2988_v29 }
 0x439   : > { %v1945_v35 = vpop.permute.xlu1 %1944  ;;  %v3280_v63 = vpop.permute.xlu0 %1946 }
 0x43a   : > { %v3283_v1 = vsel %vm639_vm6, %v1943_v14, %v1945_v35  ;;  %v3287_v24 = vsel %vm639_vm6, %v1945_v35, %v3280_v63 }
 0x43b   : > { %3623 = vst [vmem:[#allocation34_spill] sm:$0xff] %v3287_v24 }
 0x43d   : > { %v1394_v28 = vpop.permute.xlu1 %1393  ;;  %v3289_v11 = vpop.permute.xlu0 %1395 }
 0x43e   : > { %v1399_v61 = vsel %vm755_vm10, %v1394_v28, %v3289_v11 }
 0x43f   : > { %v3294_v27 = vadd.f32 %v1399_v61, %v3234_v36 }
 0x441   : > { %3624 = vst [vmem:[#allocation35_spill] sm:$0xff] %v3294_v27  ;;  %v1398_v43 = vpop.permute.xlu1 %1397  ;;  %v3296_v19 = vpop.permute.xlu0 %1586 }
 0x442   : > { %v1406_v40 = vadd.f32 %v1398_v43, %v1376_v5 }
 0x445   : > { %v3298_v41 = vpop.permute.xlu1 %1588  ;;  %v1591_v6 = vpop.permute.xlu0 %1590 }
 0x446   : > { %v1593_v15 = vsel %vm726_vm9, %v3298_v41, %v1591_v6 }
 0x447   : > { %v3302_v59 = vadd.f32 %v1593_v15, %v1568_v20 }
 0x449   : > { %3625 = vst [vmem:[#allocation36_spill] sm:$0xff] %v3302_v59  ;;  %v1780_v51 = vpop.permute.xlu1 %1779  ;;  %v3304_v46 = vpop.permute.xlu0 %1781  ;;  %v1569_v59 = vadd.f32 %v3263_v37, %v3253_v50  ;;  %v984_v50 = vsel %vm784_vm11, %v3016_v16, %v3018_v18  ;;  %v1400_v18 = vsel %vm755_vm10, %v3289_v11, %v1398_v43  ;;  %v893_v11 = vsel %vm697_vm8, %v2966_v10, %v2968_v34 }
 0x44a   : > { %v1785_v39 = vsel %vm697_vm8, %v1780_v51, %v3304_v46  ;;  %v1911_v43 = vstv %s2331_s21 }
 0x44b   : > { %v3308_v31 = vadd.f32 %v1785_v39, %v1760_v49  ;;  %v1599_v27 = vadd.f32 %v1591_v6, %v1569_v59 }
 0x44d   : > { %3626 = vst [vmem:[#allocation37_spill] sm:$0xff] %v3308_v31  ;;  %v3310_v36 = vpop.permute.xlu1 %1783  ;;  %v3312_v53 = vpop.permute.xlu0 %1972 }
 0x451   : > { %v3314_v4 = vpop.permute.xlu1 %1974  ;;  %v3316_v55 = vpop.permute.xlu0 %1976 }
 0x455   : > { %v3318_v56 = vpop.permute.xlu1 %1423  ;;  %v3320_v20 = vpop.permute.xlu0 %1425 }
 0x459   : > { %v1428_v42 = vpop.permute.xlu1 %1427  ;;  %v1617_v14 = vpop.permute.xlu0 %1616 }
 0x45a   : > { %v1436_v62 = vadd.f32 %v1428_v42, %v1406_v40 }
 0x45c   : > { %v1442_v49 = vrot.slane %v1436_v62, 5  ;;  %v839_v62 = vadd.f32 %v834_v3, %v2736_v52  ;;  %v954_v52 = vsel %vm755_vm10, %v2998_v2, %v3006_v8 }
 0x45d   : > { %v3323_v35 = vpop.permute.xlu1 %1618  ;;  %v3325_v28 = vpop.permute.xlu0 %1620 }
 0x45e   : > { %1447 = vrot.lane.b32.xlu1 %v1442_v49, %s2436_s23  ;;  %v894_v49 = vsel %vm697_vm8, %v2968_v34, %v2976_v58  ;;  %v869_v31 = vadd.f32 %v864_v0, %v839_v62  ;;  %v1629_v58 = vadd.f32 %v3325_v28, %v1599_v27  ;;  %v833_v27 = vsel %vm639_vm6, %v2936_v54, %v2938_v57 }
 0x45f   : > { %v1430_v54 = vsel %vm784_vm11, %v3320_v20, %v1428_v42  ;;  %v1217_v42 = vrot.slane %v3134_v45, 6  ;;  %v1792_v34 = vadd.f32 %v3310_v36, %v3276_v17  ;;  %v953_v45 = vsel %vm755_vm10, %v2996_v30, %v2998_v2 }
 0x461   : > { %v3328_v61 = vpop.permute.xlu1 %1809  ;;  %v3330_v15 = vpop.permute.xlu0 %1811 }
 0x462   : > { %3627 = vst [vmem:[#allocation38_spill] sm:$0xff] %v3328_v61  ;;  %v899_v61 = vadd.f32 %v894_v49, %v869_v31 }
 0x464   : > { %v929_v3 = vadd.f32 %v924_v26, %v899_v61  ;;  %v863_v61 = vsel %vm668_vm7, %v2948_v33, %v2956_v47  ;;  %v838_v26 = vadd.f32 %v833_v27, %v2728_v44  ;;  %v1405_v33 = vadd.f32 %v1400_v18, %v3260_v60 }
 0x465   : > { %v1814_v51 = vpop.permute.xlu1 %1813  ;;  %v3332_v39 = vpop.permute.xlu0 %2002  ;;  %v923_v47 = vsel %vm726_vm9, %v2978_v48, %v2986_v9 }
 0x466   : > { %v959_v29 = vadd.f32 %v954_v52, %v929_v3  ;;  %v1592_v52 = vsel %vm726_vm9, %v3296_v19, %v3298_v41  ;;  %v868_v44 = vadd.f32 %v863_v61, %v838_v26  ;;  %v1786_v19 = vsel %vm697_vm8, %v3304_v46, %v3310_v36 }
 0x467   : > { %v1622_v41 = vsel %vm755_vm10, %v1617_v14, %v3323_v35  ;;  %v1597_v10 = vadd.f32 %v1592_v52, %v3270_v25  ;;  %v1435_v60 = vadd.f32 %v1430_v54, %v1405_v33  ;;  %v1816_v9 = vsel %vm726_vm9, %v3330_v15, %v1814_v51 }
 0x468   : > { %v989_v6 = vadd.f32 %v984_v50, %v959_v29  ;;  %v1916_v50 = vstv %s2332_s24  ;;  %v1791_v25 = vadd.f32 %v1786_v19, %v3278_v7  ;;  %v1822_v36 = vadd.f32 %v1814_v51, %v1792_v34 }
 0x469   : > { %v3340_v5 = vpop.permute.xlu1 %2004  ;;  %v3342_v40 = vpop.permute.xlu0 %2006  ;;  %v1627_v17 = vadd.f32 %v1622_v41, %v1597_v10  ;;  %v1441_v27 = vrot.slane %v1435_v60, 5  ;;  %v1917_v7 = vmul.f32 %v1916_v50, %v2612_v13  ;;  %v1914_v51 = vmul.f32 %v1911_v43, %v2615_v21 }
 0x46a   : > { %v995_v49 = vrot.slane %v989_v6, 7  ;;  %v1821_v18 = vadd.f32 %v1816_v9, %v1791_v25  ;;  %v2008_v60 = vsel %vm697_vm8, %v3332_v39, %v3340_v5  ;;  %v1913_v9 = vmul.f32 %v1911_v43, %v2618_v22 }
 0x46b   : > { %v1429_v39 = vsel %vm784_vm11, %v3318_v56, %v3320_v20 }
 0x46d   : > { %v1647_v24 = vpop.permute.xlu1 %1646  ;;  %v3353_v38 = vpop.permute.xlu0 %1648 }
 0x46e   : > { %v1652_v48 = vsel %vm784_vm11, %v1647_v24, %v3353_v38  ;;  %v1912_v24 = vmul.f32 %v1911_v43, %v2621_v23 }
 0x46f   : > { %v1657_v61 = vadd.f32 %v1652_v48, %v1627_v17 }
 0x470   : > { %v1920_v33 = vadd.f32 %v1917_v7, %v1912_v24  ;;  %v3630_v24 = vld [vmem:[#allocation35_spill] sm:$0xff] }
 0x471   : > { %v3362_v37 = vpop.permute.xlu1 %1650  ;;  %v3364_v0 = vpop.permute.xlu0 %1839 }
 0x472   : > { %v1659_v31 = vadd.f32 %v3362_v37, %v1629_v58  ;;  %v898_v58 = vadd.f32 %v893_v11, %v868_v44  ;;  %v1919_v44 = vmul.f32 %v1916_v50, %v2628_v32  ;;  %v1953_v41 = vadd.f32 %v3283_v1, %v1920_v33 }
 0x474   : > { %v1665_v59 = vrot.slane %v1659_v31, 4  ;;  %v928_v14 = vadd.f32 %v923_v47, %v898_v58  ;;  %v3628_v31 = vld [vmem:[#allocation32_spill] sm:$0xff]  ;;  %v1663_v47 = vrot.slane %v1657_v61, 4 }
 0x475   : > { %v3367_v62 = vpop.permute.xlu1 %1841  ;;  %v1844_v8 = vpop.permute.xlu0 %1843  ;;  %v983_v6 = vsel %vm784_vm11, %v3628_v31, %v3016_v16 }
 0x476   : > { %1670 = vrot.lane.b32.xlu0 %v1665_v59, %s2437_s27  ;;  %v1846_v59 = vsel %vm755_vm10, %v3367_v62, %v1844_v8  ;;  %v1852_v30 = vadd.f32 %v1844_v8, %v1822_v36  ;;  %v958_v2 = vadd.f32 %v953_v45, %v928_v14  ;;  %v1978_v8 = vsel %vm668_vm7, %v3312_v53, %v3314_v4 }
 0x477   : > { %v1851_v52 = vadd.f32 %v1846_v59, %v1821_v18  ;;  %v1983_v53 = vadd.f32 %v1978_v8, %v1953_v41  ;;  %v1918_v14 = vmul.f32 %v1916_v50, %v2609_v12  ;;  %v1979_v50 = vsel %vm668_vm7, %v3314_v4, %v3316_v55 }
 0x478   : > { %v988_v11 = vadd.f32 %v983_v6, %v958_v2  ;;  %v3629_v6 = vld [vmem:[#allocation33_spill] sm:$0xff]  ;;  %v1434_v59 = vadd.f32 %v1429_v39, %v3630_v24  ;;  %v3632_v2 = vld [vmem:[#allocation34_spill] sm:$0xff]  ;;  %v3635_v39 = vld [vmem:[#allocation16_spill] sm:$0xff] }
 0x479   : > { %v2033_v57 = vpop.permute.xlu1 %2032  ;;  %v3384_v3 = vpop.permute.xlu0 %2034  ;;  %v2013_v25 = vadd.f32 %v2008_v60, %v1983_v53  ;;  %v1218_v56 = vrot.slane %v3629_v6, 6  ;;  %v1921_v20 = vadd.f32 %v1918_v14, %v1913_v9  ;;  %v606_v53 = vstv %s605_s6  ;;  %v3641_v24 = vld [vmem:[#allocation21_spill] sm:$0xff] }
 0x47a   : > { %999 = vrot.lane.b32.xlu0 %v995_v49, %s2434_s28  ;;  %v994_v58 = vrot.slane %v988_v11, 7  ;;  %v2038_v1 = vsel %vm726_vm9, %v2033_v57, %v3384_v3  ;;  %v1623_v57 = vsel %vm755_vm10, %v3323_v35, %v3325_v28  ;;  %v1653_v35 = vsel %vm784_vm11, %v3353_v38, %v3362_v37  ;;  %v3634_v11 = vld [vmem:[#allocation37_spill] sm:$0xff] }
 0x47b   : > { %v2043_v31 = vadd.f32 %v2038_v1, %v2013_v25  ;;  %v1954_v7 = vadd.f32 %v3632_v2, %v1921_v20  ;;  %v1845_v38 = vsel %vm755_vm10, %v3364_v0, %v3367_v62  ;;  %v610_v9 = vstv %s2248_s8  ;;  %v3636_v25 = vld [vmem:[#allocation15_spill] sm:$0xff] }
 0x47d   : > { %v3407_v46 = vpop.permute.xlu1 %2036  ;;  %v3409_v29 = vpop.permute.xlu0 %1869 }
 0x47e   : > { %1220 = vrot.lane.b32.xlu0 %v1217_v42, %s2435_s7  ;;  %v1922_v42 = vadd.f32 %v1919_v44, %v1914_v51  ;;  %v3633_v51 = vld [vmem:[#allocation36_spill] sm:$0xff]  ;;  %v2039_v8 = vsel %vm726_vm9, %v3384_v3, %v3407_v46 }
 0x480   : > { %v1955_v32 = vadd.f32 %v3280_v63, %v1922_v42 }
 0x481   : > { %v3424_v49 = vpop.permute.xlu1 %1871  ;;  %v1874_v26 = vpop.permute.xlu0 %1873 }
 0x482   : > { %v1876_v16 = vsel %vm784_vm11, %v3424_v49, %v1874_v26  ;;  %v1882_v54 = vadd.f32 %v1874_v26, %v1852_v30  ;;  %1445 = vrot.lane.b32.xlu0 %v1441_v27, %s2436_s23  ;;  %v1985_v45 = vadd.f32 %v3316_v55, %v1955_v32  ;;  %v3631_v27 = vld [vmem:[#allocation38_spill] sm:$0xff]  ;;  %v1628_v26 = vadd.f32 %v1623_v57, %v3633_v51 }
 0x483   : > { %v1881_v21 = vadd.f32 %v1876_v16, %v1851_v52  ;;  %v1815_v18 = vsel %vm726_vm9, %v3631_v27, %v3330_v15  ;;  %v2009_v15 = vsel %vm697_vm8, %v3340_v5, %v3342_v40  ;;  %v1984_v16 = vadd.f32 %v1979_v50, %v1954_v7  ;;  %v3640_v50 = vld [vmem:[#allocation22_spill] sm:$0xff] }
 0x484   : > { %v1888_v19 = vrot.slane %v1882_v54, 3  ;;  %v2015_v43 = vadd.f32 %v3342_v40, %v1985_v45  ;;  %v1440_v54 = vrot.slane %v1434_v59, 5  ;;  %v1820_v33 = vadd.f32 %v1815_v18, %v3634_v11  ;;  %v3648_v11 = vld [vmem:[#allocation23_spill] sm:$0xff] }
 0x485   : > { %v2063_v10 = vpop.permute.xlu1 %2062  ;;  %v2065_v34 = vpop.permute.xlu0 %2064  ;;  %v1887_v48 = vrot.slane %v1881_v21, 3  ;;  %v1658_v44 = vadd.f32 %v1653_v35, %v1628_v26  ;;  %v2014_v21 = vadd.f32 %v2009_v15, %v1984_v16  ;;  %v612_v45 = vmul.f32 %v610_v9, %v2609_v12  ;;  %v3645_v26 = vld [vmem:[#allocation20_spill] sm:$0xff]  ;;  %v3647_v15 = vld [vmem:[#allocation27_spill] sm:$0xff] }
 0x486   : > { %1666 = vrot.lane.b32.xlu0 %v1663_v47, %s2437_s27  ;;  %1893 = vrot.lane.b32.xlu1 %v1888_v19, %s2438_s29  ;;  %v2068_v63 = vsel %vm755_vm10, %v2063_v10, %v2065_v34  ;;  %v2045_v28 = vadd.f32 %v3407_v46, %v2015_v43  ;;  %v1875_v47 = vsel %vm784_vm11, %v3409_v29, %v3424_v49  ;;  %v3637_v43 = vld [vmem:[#allocation19_spill] sm:$0xff] }
 0x487   : > { %v2073_v61 = vadd.f32 %v2068_v63, %v2043_v31  ;;  %v1850_v19 = vadd.f32 %v1845_v38, %v1820_v33  ;;  %v1664_v62 = vrot.slane %v1658_v44, 4  ;;  %v2044_v41 = vadd.f32 %v2039_v8, %v2014_v21  ;;  %v3638_v31 = vld [vmem:[#allocation18_spill] sm:$0xff]  ;;  %v3649_v44 = vld [vmem:[#allocation31_spill] sm:$0xff] }
 0x488   : > { %v607_v63 = vmul.f32 %v606_v53, %v2621_v23  ;;  %v670_v6 = vsel %vm668_vm7, %v3638_v31, %v3637_v43  ;;  %v699_v59 = vsel %vm697_vm8, %v3641_v24, %v3640_v50  ;;  %v3642_v23 = vld [vmem:[#allocation17_spill] sm:$0xff]  ;;  %v3650_v8 = vld [vmem:[#allocation30_spill] sm:$0xff] }
 0x489   : > { %v2067_v17 = vpop.permute.xlu1 %2066  ;;  %v2093_v36 = vpop.permute.xlu0 %2092  ;;  %v1880_v42 = vadd.f32 %v1875_v47, %v1850_v19  ;;  %v786_v47 = vsel %vm784_vm11, %v3650_v8, %v3649_v44  ;;  %v3529_v21 = vld [vmem:[%s3574_s3 + $0x8] sm:$0x7f] }
 0x48a   : > { %997 = vrot.lane.b32.xlu1 %v994_v58, %s2434_s28  ;;  %1891 = vrot.lane.b32.xlu0 %v1887_v48, %s2438_s29  ;;  %v2075_v37 = vadd.f32 %v2067_v17, %v2045_v28  ;;  %v2069_v0 = vsel %vm755_vm10, %v2065_v34, %v2067_v17  ;;  %v608_v48 = vmul.f32 %v606_v53, %v2618_v22  ;;  %v3639_v22 = vld [vmem:[#allocation14_spill] sm:$0xff] }
 0x48b   : > { %v2074_v46 = vadd.f32 %v2069_v0, %v2044_v41  ;;  %v1886_v29 = vrot.slane %v1880_v42, 3  ;;  %v641_v17 = vsel %vm639_vm6, %v3636_v25, %v3635_v39  ;;  %v640_v12 = vsel %vm639_vm6, %v3639_v22, %v3636_v25  ;;  %v3651_v19 = vld [vmem:[#allocation26_spill] sm:$0xff] }
 0x48c   : > { %v614_v57 = vadd.f32 %v612_v45, %v608_v48  ;;  %v669_v28 = vsel %vm668_vm7, %v3642_v23, %v3638_v31  ;;  %v756_v0 = vsel %vm755_vm10, %v3651_v19, %v3647_v15 }
 0x48d   : > { %v2095_v30 = vpop.permute.xlu1 %2094  ;;  %v2097_v55 = vpop.permute.xlu0 %2096 }
 0x48e   : > { %v2098_v4 = vsel %vm784_vm11, %v2093_v36, %v2095_v30  ;;  %1222 = vrot.lane.b32.xlu1 %v1218_v56, %s2435_s7  ;;  %v2105_v40 = vadd.f32 %v2097_v55, %v2075_v37  ;;  %v2099_v10 = vsel %vm784_vm11, %v2095_v30, %v2097_v55  ;;  %v611_v56 = vmul.f32 %v610_v9, %v2612_v13  ;;  %v3644_v30 = vld [vmem:[#allocation24_spill] sm:$0xff] }
 0x48f   : > { %v2103_v52 = vadd.f32 %v2098_v4, %v2073_v61  ;;  %v2104_v49 = vadd.f32 %v2099_v10, %v2074_v46  ;;  %v645_v20 = vadd.f32 %v641_v17, %v614_v57  ;;  %v3643_v61 = vld [vmem:[#allocation25_spill] sm:$0xff]  ;;  %v698_v4 = vsel %vm697_vm8, %v3645_v26, %v3641_v24  ;;  %v3646_v55 = vld [vmem:[#allocation28_spill] sm:$0xff] }
 0x490   : > { %v2111_v3 = vrot.slane %v2105_v40, 2  ;;  %v613_v18 = vadd.f32 %v611_v56, %v607_v63  ;;  %v728_v13 = vsel %vm726_vm9, %v3644_v30, %v3643_v61  ;;  %v757_v38 = vsel %vm755_vm10, %v3647_v15, %v3646_v55 }
 0x491   : > { %v2109_v5 = vrot.slane %v2103_v52, 2  ;;  %v2110_v60 = vrot.slane %v2104_v49, 2  ;;  %v1225_v32 = vpop.permute.xlu0 %1224  ;;  %v1002_v1 = vpop.permute.xlu1 %1001  ;;  %v674_v35 = vadd.f32 %v670_v6, %v645_v20  ;;  %v727_v33 = vsel %vm726_vm9, %v3648_v11, %v3644_v30  ;;  %v3652_v49 = vld [vmem:[#allocation29_spill] sm:$0xff] }
 0x492   : > { %1443 = vrot.lane.b32.xlu1 %v1440_v54, %s2436_s23  ;;  %v644_v7 = vadd.f32 %v640_v12, %v613_v18 }
 0x493   : > { %2112 = vrot.lane.b32.xlu0 %v2109_v5, %s2439_s30  ;;  %v703_v51 = vadd.f32 %v699_v59, %v674_v35 }
 0x494   : > { %v673_v52 = vadd.f32 %v669_v28, %v644_v7 }
 0x495   : > { %v732_v16 = vadd.f32 %v728_v13, %v703_v51 }
 0x496   : > { %1668 = vrot.lane.b32.xlu1 %v1664_v62, %s2437_s27  ;;  %v702_v5 = vadd.f32 %v698_v4, %v673_v52 }
 0x497   : > { %2116 = vrot.lane.b32.xlu0 %v2111_v3, %s2439_s30  ;;  %v761_v40 = vadd.f32 %v757_v38, %v732_v16 }
 0x498   : > { %v731_v10 = vadd.f32 %v727_v33, %v702_v5 }
 0x499   : > { %v790_v3 = vadd.f32 %v786_v47, %v761_v40 }
 0x49a   : > { %1889 = vrot.lane.b32.xlu1 %v1886_v29, %s2438_s29  ;;  %v760_v9 = vadd.f32 %v756_v0, %v731_v10 }
 0x49e   : > { %2114 = vrot.lane.b32.xlu1 %v2110_v60, %s2439_s30  ;;  %v785_v60 = vsel %vm784_vm11, %v3652_v49, %v3650_v8 }
 0x4d0   : > { %v1448_v36 = vpop.permute.xlu1 %1447 }
 0x4e8   : > { %v3489_v34 = vpop.permute.xlu0 %1670 }
 0x4ec   : > { %v1000_v58 = vpop.permute.xlu0 %999 }
 0x4ed   : > { %v1005_v54 = vsel %vm1003_vm12, %v1000_v58, %v1002_v1  ;;  %v603_v1 = vld [vmem:[%s3574_s3] sm:$0x7f] }
 0x4ee   : > { %v1009_v62 = vmul.f32 %v1005_v54, %v3529_v21 }
 0x4f0   : > { %v1221_v14 = vpop.permute.xlu0 %1220  ;;  %v1013_v45 = vrot.slane %v1009_v62, 1 }
 0x4f4   : > { %v1446_v2 = vpop.permute.xlu0 %1445 }
 0x4f5   : > { %v1451_v17 = vsel %vm1449_vm14, %v1446_v2, %v1448_v36 }
 0x4f6   : > { %v1455_v56 = vmul.f32 %v1451_v17, %v3529_v21  ;;  %v3657_v17 = vld [vmem:[#allocation12_spill] sm:$0xff] }
 0x4f8   : > { %v1894_v27 = vpop.permute.xlu1 %1893  ;;  %v1667_v41 = vpop.permute.xlu0 %1666  ;;  %v1459_v61 = vrot.slane %v1455_v56, 3  ;;  %v3660_v56 = vld [vmem:[#allocation11_spill] sm:$0xff] }
 0x4fc   : > { %v998_v37 = vpop.permute.xlu1 %997  ;;  %v1892_v57 = vpop.permute.xlu0 %1891 }
 0x4fd   : > { %v1004_v46 = vsel %vm1003_vm12, %v998_v37, %v1000_v58  ;;  %v789_v58 = vadd.f32 %v785_v60, %v760_v9  ;;  %v1897_v50 = vsel %vm1895_vm15, %v1892_v57, %v1894_v27 }
 0x4fe   : > { %v1008_v39 = vmul.f32 %v1004_v46, %v603_v1  ;;  %v1901_v51 = vmul.f32 %v1897_v50, %v3529_v21 }
 0x500   : > { %v1223_v42 = vpop.permute.xlu1 %1222  ;;  %v1012_v20 = vrot.slane %v1008_v39, 1  ;;  %v1905_v33 = vrot.slane %v1901_v51, 5  ;;  %v3655_v39 = vld [vmem:[#allocation6_spill] sm:$0xff] }
 0x501   : > { %v1228_v29 = vsel %vm1226_vm13, %v1223_v42, %v1225_v32  ;;  %v1227_v48 = vsel %vm1226_vm13, %v1221_v14, %v1223_v42  ;;  %v792_v32 = vmul.f32 %v790_v3, %v3529_v21  ;;  %v791_v14 = vmul.f32 %v789_v58, %v603_v1  ;;  %v3656_v58 = vld [vmem:[#allocation10_spill] sm:$0xff] }
 0x502   : > { %v1232_v53 = vmul.f32 %v1228_v29, %v3529_v21  ;;  %v1231_v43 = vmul.f32 %v1227_v48, %v603_v1  ;;  %v3654_v48 = vld [vmem:[#allocation8_spill] sm:$0xff] }
 0x503   : > { %v1017_v6 = vadd.f32 %v1013_v45, %v792_v32  ;;  %v1016_v30 = vadd.f32 %v1012_v20, %v791_v14 }
 0x504   : > { %v1444_v25 = vpop.permute.xlu1 %1443  ;;  %v1236_v31 = vrot.slane %v1232_v53, 2  ;;  %v1235_v18 = vrot.slane %v1231_v43, 2 }
 0x505   : > { %v1450_v63 = vsel %vm1449_vm14, %v1444_v25, %v1446_v2  ;;  %v2113_v35 = vpop.permute.xlu0 %2112 }
 0x506   : > { %v1454_v22 = vmul.f32 %v1450_v63, %v603_v1  ;;  %v1240_v36 = vadd.f32 %v1236_v31, %v1017_v6  ;;  %v1239_v27 = vadd.f32 %v1235_v18, %v1016_v30  ;;  %v3659_v31 = vld [vmem:[#allocation7_spill] sm:$0xff] }
 0x508   : > { %v1669_v12 = vpop.permute.xlu1 %1668  ;;  %v1458_v13 = vrot.slane %v1454_v22, 3  ;;  %v1463_v4 = vadd.f32 %v1459_v61, %v1240_v36  ;;  %v3661_v22 = vld [vmem:[#allocation13_spill] sm:$0xff] }
 0x509   : > { %v1673_v24 = vsel %vm1672_vm0, %v1667_v41, %v1669_v12  ;;  %v1674_v59 = vsel %vm1672_vm0, %v1669_v12, %v3489_v34  ;;  %v2117_v37 = vpop.permute.xlu0 %2116 }
 0x50a   : > { %v1677_v23 = vmul.f32 %v1673_v24, %v603_v1  ;;  %v1678_v28 = vmul.f32 %v1674_v59, %v3529_v21  ;;  %v1462_v15 = vadd.f32 %v1458_v13, %v1239_v27 }
 0x50c   : > { %v1682_v2 = vrot.slane %v1678_v28, 4  ;;  %v1890_v7 = vpop.permute.xlu1 %1889  ;;  %v1681_v55 = vrot.slane %v1677_v23, 4 }
 0x50d   : > { %v1896_v26 = vsel %vm1895_vm15, %v1890_v7, %v1892_v57  ;;  %v3658_v57 = vld [vmem:[#allocation9_spill] sm:$0xff] }
 0x50e   : > { %v1900_v34 = vmul.f32 %v1896_v26, %v603_v1  ;;  %v1686_v38 = vadd.f32 %v1682_v2, %v1463_v4  ;;  %v1685_v44 = vadd.f32 %v1681_v55, %v1462_v15 }
 0x510   : > { %v1904_v52 = vrot.slane %v1900_v34, 5  ;;  %v2115_v16 = vpop.permute.xlu1 %2114  ;;  %v1909_v40 = vadd.f32 %v1905_v33, %v1686_v38 }
 0x511   : > { %v2119_v54 = vsel %vm2118_vm1, %v2113_v35, %v2115_v16  ;;  %v2120_v11 = vsel %vm2118_vm1, %v2115_v16, %v2117_v37 }
 0x512   : > { %v2123_v8 = vmul.f32 %v2119_v54, %v603_v1  ;;  %v2124_v47 = vmul.f32 %v2120_v11, %v3529_v21  ;;  %v1908_v5 = vadd.f32 %v1904_v52, %v1685_v44  ;;  %v3653_v21 = vld [vmem:[#allocation5_spill] sm:$0xff] }
 0x514   : > { %v2127_v19 = vrot.slane %v2123_v8, 6  ;;  %v2128_v0 = vrot.slane %v2124_v47, 6 }
 0x516   : > { %v2131_v62 = vadd.f32 %v2127_v19, %v1908_v5  ;;  %v2132_v41 = vadd.f32 %v2128_v0, %v1909_v40 }
 0x518   : > { %v2345_v42 = vmul.f32 -1.442695, %v2131_v62  ;;  %v2346_v10 = vmul.f32 -1.442695, %v2132_v41 }
 0x51a   : > { %2390 = vpow2.f32 %v2345_v42 }
 0x51b   : > { %2392 = vpow2.f32 %v2346_v10 }
 0x527   : > { %v2391_v3 = vpop.eup %2390 }
 0x528   : > { %v2393_v46 = vpop.eup %2392  ;;  %v2139_v29 = vadd.f32 1.0, %v2391_v3 }
 0x529   : > { %v2140_v49 = vadd.f32 1.0, %v2393_v46 }
 0x52a   : > { %2394 = vrcp.f32 %v2139_v29 }
 0x52b   : > { %2396 = vrcp.f32 %v2140_v49 }
 0x537   : > { %v2395_v60 = vpop.eup %2394 }
 0x538   : > { %v2397_v53 = vpop.eup %2396  ;;  %v2148_v9 = vrot.slane %v2395_v60, %v3653_v21 }
 0x539   : > { %v2152_v1 = vrot.slane %v2397_v53, %v3653_v21 }
 0x53a   : > { %v2153_v45 = vmul.f32 %v2148_v9, %v3654_v48  ;;  %v2155_v25 = vmul.f32 %v2148_v9, %v3655_v39  ;;  %v2157_v32 = vmul.f32 %v2148_v9, %v3656_v58  ;;  %v2159_v63 = vmul.f32 %v2148_v9, %v3657_v17 }
 0x53b   : > { %v2154_v43 = vmul.f32 %v2152_v1, %v3658_v57  ;;  %v2156_v6 = vmul.f32 %v2152_v1, %v3659_v31  ;;  %v2158_v20 = vmul.f32 %v2152_v1, %v3660_v56  ;;  %v2160_v12 = vmul.f32 %v2152_v1, %v3661_v22 }
 0x53c   : > { %2161 = vst [vmem:[%s238_s14] sm:$0xff] %v2153_v45  ;;  %2163 = vst [vmem:[%s238_s14 + $0x10] sm:$0xff] %v2155_v25 }
 0x53d   : > { %2165 = vst [vmem:[%s238_s14 + $0x20] sm:$0xff] %v2157_v32  ;;  %2167 = vst [vmem:[%s238_s14 + $0x30] sm:$0xff] %v2159_v63 }
 0x53e   : > { %2162 = vst [vmem:[%s238_s14 + $0x8] sm:$0xff] %v2154_v43  ;;  %2164 = vst [vmem:[%s238_s14 + $0x18] sm:$0xff] %v2156_v6 }
 0x53f   : > { %2166 = vst [vmem:[%s238_s14 + $0x28] sm:$0xff] %v2158_v20  ;;  %2168 = vst [vmem:[%s238_s14 + $0x38] sm:$0xff] %v2160_v12 }
 0x540 PF: > { %s16_s18 = sadd.s32 1, %s2423_s18  }
 0x541   : > { %p13_p1 = scmp.ge.s32.totalorder %s16_s18, 4  }
 0x543   :  { %15 = sbr.rel (!%p13_p1) target bundleno = 1 (0x1), region = 75 }
 0x548   :  { %2190 = vsyncpa [#allocation3], 1 }
 0x549   :  { %2192 = vsyncpa [#allocation3 + $0x1], 1 }

</bundles_post_ra>
